<compile_context>
chip_gen: v5e
topology: v5e:2x2
jax: 0.10.0
libtpu: 0.0.40
codegen_flags: <defaults>
</compile_context>

<pallas_src>
import jax
import jax.numpy as jnp
from jax.experimental import pallas as pl
from jax.experimental.pallas import tpu as pltpu

H1_DIMS = 1000
Z_DIMS = 100
LANE = 128


def _round_up(n, m=LANE):
    return ((n + m - 1) // m) * m


H1_PAD = _round_up(H1_DIMS)  # 1024
Z_PAD = _round_up(Z_DIMS)    # 128


# ---------------------------------------------------------------------------
# Fused Pallas kernel body: one batch tile of the whole VAE forward.
# ---------------------------------------------------------------------------
def _vae_fused_kernel(x_ref, eps_ref,
                      w1_ref, b1_ref, w2_ref, b2_ref,
                      w3_ref, b3_ref, w4_ref, b4_ref,
                      recon_ref, mu_ref, logvar_ref):
    # ---- encode: fc1 + ReLU (MXU bf16, f32 accumulate) ----
    h1 = jnp.dot(x_ref[...], w1_ref[...], preferred_element_type=jnp.float32)
    h1 = jnp.maximum(h1 + b1_ref[...], 0.0)

    # ---- fused fc21 || fc22: single matmul, outputs [mu | logvar] ----
    mv = jnp.dot(h1.astype(jnp.bfloat16), w2_ref[...],
                 preferred_element_type=jnp.float32)
    mv = mv + b2_ref[...]
    mu = mv[:, :Z_PAD]        # lane-tile-aligned split
    logvar = mv[:, Z_PAD:]
    mu_ref[...] = mu
    logvar_ref[...] = logvar

    # ---- reparametrize: z = mu + eps * exp(0.5 * logvar)  (VPU + EUP) ----
    # eps padded lanes are zero, so z padded lanes stay zero (and fc3's padded
    # weight rows are zero anyway).
    z = mu + eps_ref[...] * jnp.exp(0.5 * logvar)

    # ---- decode: fc3 + ReLU ----
    h3 = jnp.dot(z.astype(jnp.bfloat16), w3_ref[...],
                 preferred_element_type=jnp.float32)
    h3 = jnp.maximum(h3 + b3_ref[...], 0.0)

    # ---- fc4 + sigmoid (logistic on EUP, f32 compute, bf16 store) ----
    y = jnp.dot(h3.astype(jnp.bfloat16), w4_ref[...],
                preferred_element_type=jnp.float32)
    recon_ref[...] = jax.nn.sigmoid(y + b4_ref[...]).astype(recon_ref.dtype)


# ---------------------------------------------------------------------------
# Parameter preparation: pad to lane multiples, fuse fc21/fc22, cast to bf16.
# ---------------------------------------------------------------------------
def init_params(key, input_size):
    """PyTorch nn.Linear default init: U(-1/sqrt(fan_in), +1/sqrt(fan_in))."""
    def linear_init(k, fan_in, fan_out):
        kw, kb = jax.random.split(k)
        bound = 1.0 / jnp.sqrt(fan_in)
        w = jax.random.uniform(kw, (fan_in, fan_out), jnp.float32, -bound, bound)
        b = jax.random.uniform(kb, (fan_out,), jnp.float32, -bound, bound)
        return w, b

    keys = jax.random.split(key, 5)
    params = {}
    params["fc1_w"], params["fc1_b"] = linear_init(keys[0], input_size, H1_DIMS)
    params["fc21_w"], params["fc21_b"] = linear_init(keys[1], H1_DIMS, Z_DIMS)
    params["fc22_w"], params["fc22_b"] = linear_init(keys[2], H1_DIMS, Z_DIMS)
    params["fc3_w"], params["fc3_b"] = linear_init(keys[3], Z_DIMS, H1_DIMS)
    params["fc4_w"], params["fc4_b"] = linear_init(keys[4], H1_DIMS, input_size)
    return params


def prepare_params(params):
    """Zero-pad to 128-lane multiples, fuse fc21||fc22, cast weights to bf16."""
    input_size = params["fc1_w"].shape[0]
    in_pad = _round_up(input_size)

    def pad2(w, r, c):
        return jnp.zeros((r, c), jnp.float32).at[: w.shape[0], : w.shape[1]].set(w)

    def pad1(b, n):
        return jnp.zeros((1, n), jnp.float32).at[0, : b.shape[0]].set(b)

    w1 = pad2(params["fc1_w"], in_pad, H1_PAD).astype(jnp.bfloat16)
    b1 = pad1(params["fc1_b"], H1_PAD)

    # fc21 || fc22 fused along output axis: cols [0:Z_PAD)=mu, [Z_PAD:2*Z_PAD)=logvar
    w2 = jnp.zeros((H1_PAD, 2 * Z_PAD), jnp.float32)
    w2 = w2.at[:H1_DIMS, :Z_DIMS].set(params["fc21_w"])
    w2 = w2.at[:H1_DIMS, Z_PAD:Z_PAD + Z_DIMS].set(params["fc22_w"])
    w2 = w2.astype(jnp.bfloat16)
    b2 = jnp.zeros((1, 2 * Z_PAD), jnp.float32)
    b2 = b2.at[0, :Z_DIMS].set(params["fc21_b"])
    b2 = b2.at[0, Z_PAD:Z_PAD + Z_DIMS].set(params["fc22_b"])

    w3 = pad2(params["fc3_w"], Z_PAD, H1_PAD).astype(jnp.bfloat16)
    b3 = pad1(params["fc3_b"], H1_PAD)

    w4 = pad2(params["fc4_w"], H1_PAD, in_pad).astype(jnp.bfloat16)
    b4 = pad1(params["fc4_b"], in_pad)

    return dict(w1=w1, b1=b1, w2=w2, b2=b2, w3=w3, b3=b3, w4=w4, b4=b4)


# ---------------------------------------------------------------------------
# Forward wrapper: batch-tiled pallas_call with VMEM-pinned weights.
# ---------------------------------------------------------------------------
def _choose_batch_tile(b):
    if b >= 512:
        return 512            # multiple of 256: fills v6e/v7x MXU
    if b >= 256:
        return 256
    return max(8, _round_up(b, 8))   # sublane-aligned for tiny batches


def autoencoder_forward(fused_params, x, eps):
    """Mirrors Autoencoder.forward: returns (recon, mu, logvar).
    eps ~ N(0,1), shape [B, Z_DIMS], supplied externally for determinism.
    recon is returned in bf16 (halved HBM writeback); mu/logvar are f32."""
    B, input_size = x.shape
    in_pad = fused_params["w1"].shape[0]

    tb = _choose_batch_tile(B)
    b_pad = _round_up(B, tb)
    n_tiles = b_pad // tb

    # Pad inputs only when needed (skip redundant copy for aligned shapes).
    x_bf = x.astype(jnp.bfloat16)
    if b_pad != B or in_pad != input_size:
        x_bf = jnp.pad(x_bf, ((0, b_pad - B), (0, in_pad - input_size)))
    eps_p = eps
    if b_pad != B or Z_PAD != Z_DIMS:
        eps_p = jnp.pad(eps, ((0, b_pad - B), (0, Z_PAD - Z_DIMS)))

    w1, b1 = fused_params["w1"], fused_params["b1"]
    w2, b2 = fused_params["w2"], fused_params["b2"]
    w3, b3 = fused_params["w3"], fused_params["b3"]
    w4, b4 = fused_params["w4"], fused_params["b4"]

    # Activation streams tiled along batch; weights/biases pinned in VMEM
    # (constant index_map -> fetched once, never re-DMA'd across grid steps).
    def act(n_cols):
        return pl.BlockSpec((tb, n_cols), lambda i: (i, 0))

    def pinned(arr):
        return pl.BlockSpec(arr.shape, lambda i: (0, 0))

    weight_bytes = sum(int(a.size) * a.dtype.itemsize
                       for a in (w1, b1, w2, b2, w3, b3, w4, b4))
    flops = 2 * b_pad * (in_pad * H1_PAD + H1_PAD * 2 * Z_PAD
                         + Z_PAD * H1_PAD + H1_PAD * in_pad)
    transcendentals = b_pad * (Z_PAD + in_pad)          # exp + sigmoid
    bytes_accessed = (weight_bytes
                      + int(x_bf.size) * 2 + int(eps_p.size) * 4   # inputs
                      + b_pad * in_pad * 2                          # recon (bf16)
                      + 2 * b_pad * Z_PAD * 4)                      # mu, logvar

    recon_p, mu_p, logvar_p = pl.pallas_call(
        _vae_fused_kernel,
        grid=(n_tiles,),
        out_shape=(
            jax.ShapeDtypeStruct((b_pad, in_pad), jnp.bfloat16),
            jax.ShapeDtypeStruct((b_pad, Z_PAD), jnp.float32),
            jax.ShapeDtypeStruct((b_pad, Z_PAD), jnp.float32),
        ),
        in_specs=[
            act(in_pad),                    # x
            act(Z_PAD),                     # eps
            pinned(w1), pinned(b1),
            pinned(w2), pinned(b2),
            pinned(w3), pinned(b3),
            pinned(w4), pinned(b4),
        ],
        out_specs=(
            act(in_pad),                    # recon
            act(Z_PAD),                     # mu
            act(Z_PAD),                     # logvar
        ),
        compiler_params=pltpu.CompilerParams(
            dimension_semantics=("parallel",)),
        cost_estimate=pl.CostEstimate(
            flops=flops,
            transcendentals=transcendentals,
            bytes_accessed=bytes_accessed),
    )(x_bf, eps_p, w1, b1, w2, b2, w3, b3, w4, b4)

    return (recon_p[:B, :input_size],
            mu_p[:B, :Z_DIMS],
            logvar_p[:B, :Z_DIMS])


# ---------------------------------------------------------------------------
# Pure-JAX f32 reference (for correctness check)
# ---------------------------------------------------------------------------
def reference_forward(params, x, eps):
    h1 = jnp.maximum(x @ params["fc1_w"] + params["fc1_b"], 0.0)
    mu = h1 @ params["fc21_w"] + params["fc21_b"]
    logvar = h1 @ params["fc22_w"] + params["fc22_b"]
    z = mu + eps * jnp.exp(0.5 * logvar)
    h3 = jnp.maximum(z @ params["fc3_w"] + params["fc3_b"], 0.0)
    recon = jax.nn.sigmoid(h3 @ params["fc4_w"] + params["fc4_b"])
    return recon, mu, logvar


# ---------------------------------------------------------------------------
# Main
# ---------------------------------------------------------------------------
if __name__ == "__main__":
    INPUT_SIZE = 256
    BATCH = 8  # small demo batch; grid/tiling scales to 256-512+ for throughput

    key = jax.random.PRNGKey(0)
    k_params, k_x, k_eps = jax.random.split(key, 3)

    params = init_params(k_params, INPUT_SIZE)
    fused_params = prepare_params(params)

    x = jax.random.uniform(k_x, (BATCH, INPUT_SIZE), jnp.float32)
    eps = jax.random.normal(k_eps, (BATCH, Z_DIMS), jnp.float32)

    fwd = jax.jit(autoencoder_forward)
    recon, mu, logvar = fwd(fused_params, x, eps)
    jax.block_until_ready((recon, mu, logvar))

    # Shape / range checks
    assert recon.shape == (BATCH, INPUT_SIZE)
    assert mu.shape == (BATCH, Z_DIMS)
    assert logvar.shape == (BATCH, Z_DIMS)
    recon_f32 = recon.astype(jnp.float32)
    assert bool(jnp.all(jnp.isfinite(recon_f32)))
    assert bool(jnp.all((recon_f32 >= 0.0) & (recon_f32 <= 1.0)))

    # Numerical check vs f32 reference (bf16 matmul / bf16 recon tolerance)
    r_ref, mu_ref_v, lv_ref = reference_forward(params, x, eps)
    assert float(jnp.max(jnp.abs(recon_f32 - r_ref))) < 0.1
    assert float(jnp.max(jnp.abs(mu - mu_ref_v))) < 0.1
    assert float(jnp.max(jnp.abs(logvar - lv_ref))) < 0.1

    print("KERNEL_OK")
</pallas_src>

<mosaic_0001>
module attributes {stable_mosaic.version = 11 : i64} {
  func.func @_vae_fused_kernel(%arg0: i32, %arg1: memref<8x256xbf16, #tpu.memory_space<vmem>>, %arg2: memref<8x128xf32, #tpu.memory_space<vmem>>, %arg3: memref<256x1024xbf16, #tpu.memory_space<vmem>>, %arg4: memref<1x1024xf32, #tpu.memory_space<vmem>>, %arg5: memref<1024x256xbf16, #tpu.memory_space<vmem>>, %arg6: memref<1x256xf32, #tpu.memory_space<vmem>>, %arg7: memref<128x1024xbf16, #tpu.memory_space<vmem>>, %arg8: memref<1x1024xf32, #tpu.memory_space<vmem>>, %arg9: memref<1024x256xbf16, #tpu.memory_space<vmem>>, %arg10: memref<1x256xf32, #tpu.memory_space<vmem>>, %arg11: memref<8x256xbf16, #tpu.memory_space<vmem>>, %arg12: memref<8x128xf32, #tpu.memory_space<vmem>>, %arg13: memref<8x128xf32, #tpu.memory_space<vmem>>) attributes {dimension_semantics = [#tpu.dimension_semantics<parallel>], iteration_bounds = array<i64: 1>, scalar_prefetch = 0 : i64, scratch_operands = 0 : i64, tpu.core_type = #tpu.core_type<tc>, window_params = [{transform_indices = @transform_0, window_bounds = array<i64: 8, 256>}, {transform_indices = @transform_1, window_bounds = array<i64: 8, 128>}, {pipeline_mode = #tpu.pipeline_mode<synchronous>, transform_indices = @transform_2, window_bounds = array<i64: 256, 1024>}, {pipeline_mode = #tpu.pipeline_mode<synchronous>, transform_indices = @transform_3, window_bounds = array<i64: 1, 1024>}, {pipeline_mode = #tpu.pipeline_mode<synchronous>, transform_indices = @transform_4, window_bounds = array<i64: 1024, 256>}, {pipeline_mode = #tpu.pipeline_mode<synchronous>, transform_indices = @transform_5, window_bounds = array<i64: 1, 256>}, {pipeline_mode = #tpu.pipeline_mode<synchronous>, transform_indices = @transform_6, window_bounds = array<i64: 128, 1024>}, {pipeline_mode = #tpu.pipeline_mode<synchronous>, transform_indices = @transform_7, window_bounds = array<i64: 1, 1024>}, {pipeline_mode = #tpu.pipeline_mode<synchronous>, transform_indices = @transform_8, window_bounds = array<i64: 1024, 256>}, {pipeline_mode = #tpu.pipeline_mode<synchronous>, transform_indices = @transform_9, window_bounds = array<i64: 1, 256>}, {transform_indices = @transform_10, window_bounds = array<i64: 8, 256>}, {transform_indices = @transform_11, window_bounds = array<i64: 8, 128>}, {transform_indices = @transform_12, window_bounds = array<i64: 8, 128>}]} {
    %c0 = arith.constant 0 : index
    %c0_0 = arith.constant 0 : index
    %0 = vector.load %arg1[%c0, %c0_0] : memref<8x256xbf16, #tpu.memory_space<vmem>>, vector<8x256xbf16>
    %c0_1 = arith.constant 0 : index
    %c0_2 = arith.constant 0 : index
    %1 = vector.load %arg3[%c0_1, %c0_2] : memref<256x1024xbf16, #tpu.memory_space<vmem>>, vector<256x1024xbf16>
    %cst = arith.constant dense<0.000000e+00> : vector<8x1024xf32>
    %2 = tpu.matmul %0, %1, %cst {dimension_numbers = #tpu.dot_dimension_numbers<[1], [0], [0], [1], [0, 0, 1, 1], [], []>} : vector<8x256xbf16>, vector<256x1024xbf16>, vector<8x1024xf32> -> vector<8x1024xf32>
    %c0_3 = arith.constant 0 : index
    %c0_4 = arith.constant 0 : index
    %3 = vector.load %arg4[%c0_3, %c0_4] : memref<1x1024xf32, #tpu.memory_space<vmem>>, vector<1x1024xf32>
    %4 = vector.broadcast %3 : vector<1x1024xf32> to vector<8x1024xf32>
    %5 = arith.addf %2, %4 : vector<8x1024xf32>
    %cst_5 = arith.constant 0.000000e+00 : f32
    %6 = vector.broadcast %cst_5 : f32 to vector<8x1024xf32>
    %7 = arith.maximumf %5, %6 : vector<8x1024xf32>
    %8 = arith.truncf %7 : vector<8x1024xf32> to vector<8x1024xbf16>
    %c0_6 = arith.constant 0 : index
    %c0_7 = arith.constant 0 : index
    %9 = vector.load %arg5[%c0_6, %c0_7] : memref<1024x256xbf16, #tpu.memory_space<vmem>>, vector<1024x256xbf16>
    %cst_8 = arith.constant dense<0.000000e+00> : vector<8x256xf32>
    %10 = tpu.matmul %8, %9, %cst_8 {dimension_numbers = #tpu.dot_dimension_numbers<[1], [0], [0], [1], [0, 0, 1, 1], [], []>} : vector<8x1024xbf16>, vector<1024x256xbf16>, vector<8x256xf32> -> vector<8x256xf32>
    %c0_9 = arith.constant 0 : index
    %c0_10 = arith.constant 0 : index
    %11 = vector.load %arg6[%c0_9, %c0_10] : memref<1x256xf32, #tpu.memory_space<vmem>>, vector<1x256xf32>
    %12 = vector.broadcast %11 : vector<1x256xf32> to vector<8x256xf32>
    %13 = arith.addf %10, %12 : vector<8x256xf32>
    %14 = vector.extract_strided_slice %13 {offsets = [0, 0], sizes = [8, 128], strides = [1, 1]} : vector<8x256xf32> to vector<8x128xf32>
    %15 = vector.extract_strided_slice %13 {offsets = [0, 128], sizes = [8, 128], strides = [1, 1]} : vector<8x256xf32> to vector<8x128xf32>
    %c0_11 = arith.constant 0 : index
    %c0_12 = arith.constant 0 : index
    %16 = vector.load %arg12[%c0_11, %c0_12] : memref<8x128xf32, #tpu.memory_space<vmem>>, vector<8x128xf32>
    tpu.vector_store %arg12[%c0_11, %c0_12], %14 {strides = array<i32>} : memref<8x128xf32, #tpu.memory_space<vmem>>, vector<8x128xf32>,
    %c0_13 = arith.constant 0 : index
    %c0_14 = arith.constant 0 : index
    %17 = vector.load %arg13[%c0_13, %c0_14] : memref<8x128xf32, #tpu.memory_space<vmem>>, vector<8x128xf32>
    tpu.vector_store %arg13[%c0_13, %c0_14], %15 {strides = array<i32>} : memref<8x128xf32, #tpu.memory_space<vmem>>, vector<8x128xf32>,
    %c0_15 = arith.constant 0 : index
    %c0_16 = arith.constant 0 : index
    %18 = vector.load %arg2[%c0_15, %c0_16] : memref<8x128xf32, #tpu.memory_space<vmem>>, vector<8x128xf32>
    %cst_17 = arith.constant 5.000000e-01 : f32
    %19 = vector.broadcast %cst_17 : f32 to vector<8x128xf32>
    %20 = arith.mulf %19, %15 : vector<8x128xf32>
    %21 = math.exp %20 : vector<8x128xf32>
    %22 = arith.mulf %18, %21 : vector<8x128xf32>
    %23 = arith.addf %14, %22 : vector<8x128xf32>
    %24 = arith.truncf %23 : vector<8x128xf32> to vector<8x128xbf16>
    %c0_18 = arith.constant 0 : index
    %c0_19 = arith.constant 0 : index
    %25 = vector.load %arg7[%c0_18, %c0_19] : memref<128x1024xbf16, #tpu.memory_space<vmem>>, vector<128x1024xbf16>
    %cst_20 = arith.constant dense<0.000000e+00> : vector<8x1024xf32>
    %26 = tpu.matmul %24, %25, %cst_20 {dimension_numbers = #tpu.dot_dimension_numbers<[1], [0], [0], [1], [0, 0, 1, 1], [], []>} : vector<8x128xbf16>, vector<128x1024xbf16>, vector<8x1024xf32> -> vector<8x1024xf32>
    %c0_21 = arith.constant 0 : index
    %c0_22 = arith.constant 0 : index
    %27 = vector.load %arg8[%c0_21, %c0_22] : memref<1x1024xf32, #tpu.memory_space<vmem>>, vector<1x1024xf32>
    %28 = vector.broadcast %27 : vector<1x1024xf32> to vector<8x1024xf32>
    %29 = arith.addf %26, %28 : vector<8x1024xf32>
    %cst_23 = arith.constant 0.000000e+00 : f32
    %30 = vector.broadcast %cst_23 : f32 to vector<8x1024xf32>
    %31 = arith.maximumf %29, %30 : vector<8x1024xf32>
    %32 = arith.truncf %31 : vector<8x1024xf32> to vector<8x1024xbf16>
    %c0_24 = arith.constant 0 : index
    %c0_25 = arith.constant 0 : index
    %33 = vector.load %arg9[%c0_24, %c0_25] : memref<1024x256xbf16, #tpu.memory_space<vmem>>, vector<1024x256xbf16>
    %cst_26 = arith.constant dense<0.000000e+00> : vector<8x256xf32>
    %34 = tpu.matmul %32, %33, %cst_26 {dimension_numbers = #tpu.dot_dimension_numbers<[1], [0], [0], [1], [0, 0, 1, 1], [], []>} : vector<8x1024xbf16>, vector<1024x256xbf16>, vector<8x256xf32> -> vector<8x256xf32>
    %c0_27 = arith.constant 0 : index
    %c0_28 = arith.constant 0 : index
    %35 = vector.load %arg10[%c0_27, %c0_28] : memref<1x256xf32, #tpu.memory_space<vmem>>, vector<1x256xf32>
    %36 = vector.broadcast %35 : vector<1x256xf32> to vector<8x256xf32>
    %37 = arith.addf %34, %36 : vector<8x256xf32>
    %38 = arith.negf %37 : vector<8x256xf32>
    %39 = math.exp %38 : vector<8x256xf32>
    %cst_29 = arith.constant 1.000000e+00 : f32
    %40 = vector.broadcast %cst_29 : f32 to vector<8x256xf32>
    %41 = arith.addf %40, %39 : vector<8x256xf32>
    %42 = arith.divf %40, %41 : vector<8x256xf32>
    %43 = arith.truncf %42 : vector<8x256xf32> to vector<8x256xbf16>
    %c0_30 = arith.constant 0 : index
    %c0_31 = arith.constant 0 : index
    %44 = vector.load %arg11[%c0_30, %c0_31] : memref<8x256xbf16, #tpu.memory_space<vmem>>, vector<8x256xbf16>
    tpu.vector_store %arg11[%c0_30, %c0_31], %43 {strides = array<i32>} : memref<8x256xbf16, #tpu.memory_space<vmem>>, vector<8x256xbf16>,
    return
  }
  func.func @transform_0(%arg0: i32) -> (i32, i32) {
    %c0_i32 = arith.constant 0 : i32
    %c0_i32_0 = arith.constant 0 : i32
    return %arg0, %c0_i32 : i32, i32
  }
  func.func @transform_1(%arg0: i32) -> (i32, i32) {
    %c0_i32 = arith.constant 0 : i32
    %c0_i32_0 = arith.constant 0 : i32
    return %arg0, %c0_i32 : i32, i32
  }
  func.func @transform_2(%arg0: i32) -> (i32, i32) {
    %c0_i32 = arith.constant 0 : i32
    %c0_i32_0 = arith.constant 0 : i32
    %c0_i32_1 = arith.constant 0 : i32
    return %c0_i32, %c0_i32_0 : i32, i32
  }
  func.func @transform_3(%arg0: i32) -> (i32, i32) {
    %c0_i32 = arith.constant 0 : i32
    %c0_i32_0 = arith.constant 0 : i32
    %c0_i32_1 = arith.constant 0 : i32
    return %c0_i32, %c0_i32_0 : i32, i32
  }
  func.func @transform_4(%arg0: i32) -> (i32, i32) {
    %c0_i32 = arith.constant 0 : i32
    %c0_i32_0 = arith.constant 0 : i32
    %c0_i32_1 = arith.constant 0 : i32
    return %c0_i32, %c0_i32_0 : i32, i32
  }
  func.func @transform_5(%arg0: i32) -> (i32, i32) {
    %c0_i32 = arith.constant 0 : i32
    %c0_i32_0 = arith.constant 0 : i32
    %c0_i32_1 = arith.constant 0 : i32
    return %c0_i32, %c0_i32_0 : i32, i32
  }
  func.func @transform_6(%arg0: i32) -> (i32, i32) {
    %c0_i32 = arith.constant 0 : i32
    %c0_i32_0 = arith.constant 0 : i32
    %c0_i32_1 = arith.constant 0 : i32
    return %c0_i32, %c0_i32_0 : i32, i32
  }
  func.func @transform_7(%arg0: i32) -> (i32, i32) {
    %c0_i32 = arith.constant 0 : i32
    %c0_i32_0 = arith.constant 0 : i32
    %c0_i32_1 = arith.constant 0 : i32
    return %c0_i32, %c0_i32_0 : i32, i32
  }
  func.func @transform_8(%arg0: i32) -> (i32, i32) {
    %c0_i32 = arith.constant 0 : i32
    %c0_i32_0 = arith.constant 0 : i32
    %c0_i32_1 = arith.constant 0 : i32
    return %c0_i32, %c0_i32_0 : i32, i32
  }
  func.func @transform_9(%arg0: i32) -> (i32, i32) {
    %c0_i32 = arith.constant 0 : i32
    %c0_i32_0 = arith.constant 0 : i32
    %c0_i32_1 = arith.constant 0 : i32
    return %c0_i32, %c0_i32_0 : i32, i32
  }
  func.func @transform_10(%arg0: i32) -> (i32, i32) {
    %c0_i32 = arith.constant 0 : i32
    %c0_i32_0 = arith.constant 0 : i32
    return %arg0, %c0_i32 : i32, i32
  }
  func.func @transform_11(%arg0: i32) -> (i32, i32) {
    %c0_i32 = arith.constant 0 : i32
    %c0_i32_0 = arith.constant 0 : i32
    return %arg0, %c0_i32 : i32, i32
  }
  func.func @transform_12(%arg0: i32) -> (i32, i32) {
    %c0_i32 = arith.constant 0 : i32
    %c0_i32_0 = arith.constant 0 : i32
    return %arg0, %c0_i32 : i32, i32
  }
}

</mosaic_0001>

<bundles_post_ra>
// kernel: autoencoder_forward.1
= control target key start
LH: loop header
LB: loop body
LE: loop exit
PB: predicated region body
PF: predicated region fallthrough
CT: control target
= control target key end

     0   :  { %18 = vsyncpa [#allocation3], 0  ;;  %s6407_s0 = inlined_call_operand.vmem [shape: bf16[8,256], index: 0, kind: input, shape index: {}]   ;;  %s6408_s1 = inlined_call_operand.vmem [shape: f32[8,128], index: 1, kind: input, shape index: {}]   ;;  %s6409_s2 = inlined_call_operand.hbm [shape: bf16[256,1024], index: 2, kind: input, shape index: {}]   ;;  %s6410_s3 = inlined_call_operand.vmem [shape: f32[1,1024], index: 3, kind: input, shape index: {}]   ;;  %s6411_s4 = inlined_call_operand.hbm [shape: bf16[1024,256], index: 4, kind: input, shape index: {}]   ;;  %s6412_s5 = inlined_call_operand.vmem [shape: f32[1,256], index: 5, kind: input, shape index: {}]   ;;  %s6413_s6 = inlined_call_operand.hbm [shape: bf16[128,1024], index: 6, kind: input, shape index: {}]   ;;  %s6414_s7 = inlined_call_operand.vmem [shape: f32[1,1024], index: 7, kind: input, shape index: {}]   ;;  %s6415_s8 = inlined_call_operand.hbm [shape: bf16[1024,256], index: 8, kind: input, shape index: {}]   ;;  %s6416_s9 = inlined_call_operand.vmem [shape: f32[1,256], index: 9, kind: input, shape index: {}]   ;;  %s6417_s10 = inlined_call_operand.hbm [shape: bf16[8,256], index: 10, kind: output, shape index: {0}]   ;;  %s6418_s11 = inlined_call_operand.hbm [shape: f32[8,128], index: 11, kind: output, shape index: {1}]   ;;  %s6419_s12 = inlined_call_operand.hbm [shape: f32[8,128], index: 12, kind: output, shape index: {2}]  }
   0x1   :  { %19 = vsyncpa [#allocation6], 0 }
   0x2   :  { %20 = vsyncpa [#allocation9], 0 }
   0x3   :  { %21 = vsyncpa [#allocation4], 0  ;;  %s46_s23 = sshll.u32 %s6411_s4, 4  ;;  %s47_s23 = int_to_ptr.hbm [resolvable:$true] %s46_s23 }
   0x4   :  { %22 = vsyncpa [#allocation12], 0  ;;  %s6147_s24 = smov [#allocation5]   ;;  %s31_s28 = sshll.u32 %s6409_s2, 4  ;;  %s32_s28 = int_to_ptr.hbm [resolvable:$true] %s31_s28 }
   0x5   :  { %s48_s25 = sshll.u32 %s6147_s24, 4  ;;  %s6148_s29 = smov 128   ;;  %s49_s25 = int_to_ptr.vmem [resolvable:$true] %s48_s25 }
   0x6   :  { %s6149_s30 = smov 8   ;;  %s6150_s13 = smov [#allocation2]  }
   0x7   :  { %54 = dma.hbm_to_vmem [thread:$0]  %s47_s23, 16384, %s49_s25, [#allocation6], %s6148_s29, %s6148_s29, %s6149_s30  }
   0x8   :  { %s33_s14 = sshll.u32 %s6150_s13, 4  ;;  %s6151_s15 = smov 512   ;;  %s34_s14 = int_to_ptr.vmem [resolvable:$true] %s33_s14 }
   0x9   :  { %s6152_s16 = smov 32   ;;  %s61_s18 = sshll.u32 %s6413_s6, 4  ;;  %s62_s18 = int_to_ptr.hbm [resolvable:$true] %s61_s18 }
   0xa   :  { %39 = dma.hbm_to_vmem [thread:$0]  %s32_s28, 16384, %s34_s14, [#allocation3], %s6151_s15, %s6151_s15, %s6152_s16  }
   0xb   :  { %s6153_s19 = smov [#allocation7]   ;;  %s76_s22 = sshll.u32 %s6415_s8, 4  ;;  %s77_s22 = int_to_ptr.hbm [resolvable:$true] %s76_s22 }
   0xc   :  { %s63_s20 = sshll.u32 %s6153_s19, 4  ;;  %s6154_s23 = smov [#allocation8]   ;;  %s64_s20 = int_to_ptr.vmem [resolvable:$true] %s63_s20 }
   0xd   :  { %69 = dma.hbm_to_vmem [thread:$0]  %s62_s18, 8192, %s64_s20, [#allocation6], %s6151_s15, %s6151_s15, %s6152_s16  }
   0xe   :  { %s78_s24 = sshll.u32 %s6154_s23, 4  ;;  %s79_s24 = int_to_ptr.vmem [resolvable:$true] %s78_s24 }
   0xf   :  { %84 = dma.hbm_to_vmem [thread:$0]  %s77_s22, 16384, %s79_s24, [#allocation9], %s6148_s29, %s6148_s29, %s6149_s30  }
  0x10   :  { %6137 = dma.done.wait [#allocation3], 16384  }
  0x11   :  { %6138 = vsyncadd [#allocation3], 4294950912 }
  0x12   :  { %6139 = dma.done.wait [#allocation6], 24576  }
  0x13   :  { %6140 = vsyncadd [#allocation6], 4294942720 }
  0x14   :  { %6141 = dma.done.wait [#allocation9], 16384  }
  0x15   :  { %6142 = vsyncadd [#allocation9], 4294950912  ;;  %v3932_v0 = vld [vmem:[#allocation2 + $0x1c0] sm:$0xf]  ;;  %v5556_v5 = vld [vmem:[#allocation2 + $0x1c4] sm:$0xf] }
  0x16   :  { %v5560_v1 = vld [vmem:[#allocation2 + $0x1dc] sm:$0xf0]  ;;  %v3934_v6 = vld [vmem:[#allocation2 + $0x1e0] sm:$0xf0]  ;;  %s3674_s30 = sshll.u32 %s6418_s11, 4  ;;  %s6155_s13 = smov [#allocation11]   ;;  %s3675_s30 = int_to_ptr.hbm [resolvable:$true] %s3674_s30 }
  0x17   :  { %v4188_v2 = vld [vmem:[#allocation2 + $0x3c0] sm:$0xf]  ;;  %v3933_v3 = vor.u32 %v5560_v1, %v3932_v0  ;;  %v3937_v8 = vor.u32 %v5556_v5, %v3934_v6  ;;  %v5620_v9 = vld [vmem:[#allocation2 + $0x3c4] sm:$0xf]  ;;  %s3672_s14 = sshll.u32 %s6155_s13, 4  ;;  %s6156_s15 = smov [#allocation13]   ;;  %s3673_s14 = int_to_ptr.vmem [resolvable:$true] %s3672_s14 }
  0x18   :  { %v5624_v4 = vld [vmem:[#allocation2 + $0x3dc] sm:$0xf0]  ;;  %v4190_v10 = vld [vmem:[#allocation2 + $0x3e0] sm:$0xf0]  ;;  %s3683_s16 = sshll.u32 %s6156_s15, 4  ;;  %s3685_s18 = sshll.u32 %s6419_s12, 4  ;;  %s3684_s16 = int_to_ptr.vmem [resolvable:$true] %s3683_s16  ;;  %s3686_s18 = int_to_ptr.hbm [resolvable:$true] %s3685_s18 }
  0x19   :  { %v4189_v7 = vor.u32 %v5624_v4, %v4188_v2  ;;  %v3900_v11 = vld [vmem:[#allocation2 + $0x180] sm:$0xf]  ;;  %897 = vmatpush.bf16.msra.mxu0 %v3933_v3  ;;  %v4193_v12 = vor.u32 %v5620_v9, %v4190_v10  ;;  %923 = vmatpush.bf16.msra.mxu2 %v3937_v8  ;;  %v5548_v18 = vld [vmem:[#allocation2 + $0x184] sm:$0xf]  ;;  %s3663_s2 = sshll.u32 %s6417_s10, 4  ;;  %s3664_s2 = int_to_ptr.hbm [resolvable:$true] %s3663_s2 }
  0x1a   :  { %v5552_v13 = vld [vmem:[#allocation2 + $0x19c] sm:$0xf0]  ;;  %v3902_v19 = vld [vmem:[#allocation2 + $0x1a0] sm:$0xf0] }
  0x1b   :  { %v4156_v14 = vld [vmem:[#allocation2 + $0x380] sm:$0xf]  ;;  %910 = vmatpush.bf16.msra.mxu1 %v4189_v7  ;;  %v3901_v16 = vor.u32 %v5552_v13, %v3900_v11  ;;  %v5612_v20 = vld [vmem:[#allocation2 + $0x384] sm:$0xf]  ;;  %936 = vmatpush.bf16.msra.mxu3 %v4193_v12  ;;  %v3905_v21 = vor.u32 %v5548_v18, %v3902_v19 }
  0x1c   :  { %v5616_v15 = vld [vmem:[#allocation2 + $0x39c] sm:$0xf0]  ;;  %v4158_v22 = vld [vmem:[#allocation2 + $0x3a0] sm:$0xf0] }
  0x1d   :  { %v4157_v17 = vor.u32 %v5616_v15, %v4156_v14  ;;  %v3868_v23 = vld [vmem:[#allocation2 + $0x140] sm:$0xf]  ;;  %v4161_v25 = vor.u32 %v5612_v20, %v4158_v22  ;;  %v5540_v28 = vld [vmem:[#allocation2 + $0x144] sm:$0xf]  ;;  %898 = vmatpush.bf16.msra.mxu0 %v3901_v16  ;;  %924 = vmatpush.bf16.msra.mxu2 %v3905_v21 }
  0x1e   :  { %v5544_v24 = vld [vmem:[#allocation2 + $0x15c] sm:$0xf0]  ;;  %v3870_v30 = vld [vmem:[#allocation2 + $0x160] sm:$0xf0] }
  0x1f   :  { %v4124_v26 = vld [vmem:[#allocation2 + $0x340] sm:$0xf]  ;;  %v3869_v29 = vor.u32 %v5544_v24, %v3868_v23  ;;  %v5604_v31 = vld [vmem:[#allocation2 + $0x344] sm:$0xf]  ;;  %911 = vmatpush.bf16.msra.mxu1 %v4157_v17  ;;  %v3873_v34 = vor.u32 %v5540_v28, %v3870_v30  ;;  %937 = vmatpush.bf16.msra.mxu3 %v4161_v25  ;;  %v3940_v28 = vld [vmem:[#allocation2 + $0x1c8] sm:$0xf] }
  0x20   :  { %v5608_v27 = vld [vmem:[#allocation2 + $0x35c] sm:$0xf0]  ;;  %v4126_v32 = vld [vmem:[#allocation2 + $0x360] sm:$0xf0]  ;;  %v4196_v30 = vld [vmem:[#allocation2 + $0x3c8] sm:$0xf] }
  0x21   :  { %v4125_v33 = vor.u32 %v5608_v27, %v4124_v26  ;;  %v3836_v35 = vld [vmem:[#allocation2 + $0x100] sm:$0xf]  ;;  %v4129_v38 = vor.u32 %v5604_v31, %v4126_v32  ;;  %v5532_v40 = vld [vmem:[#allocation2 + $0x104] sm:$0xf]  ;;  %899 = vmatpush.bf16.msra.mxu0 %v3869_v29  ;;  %925 = vmatpush.bf16.msra.mxu2 %v3873_v34  ;;  %v5561_v29 = vld [vmem:[#allocation2 + $0x1e4] sm:$0xf0] }
  0x22   :  { %v5536_v36 = vld [vmem:[#allocation2 + $0x11c] sm:$0xf0]  ;;  %v3838_v41 = vld [vmem:[#allocation2 + $0x120] sm:$0xf0]  ;;  %v5625_v32 = vld [vmem:[#allocation2 + $0x3e4] sm:$0xf0] }
  0x23   :  { %v4092_v37 = vld [vmem:[#allocation2 + $0x300] sm:$0xf]  ;;  %v5596_v42 = vld [vmem:[#allocation2 + $0x304] sm:$0xf]  ;;  %v3837_v44 = vor.u32 %v5536_v36, %v3836_v35  ;;  %912 = vmatpush.bf16.msra.mxu1 %v4125_v33  ;;  %v3841_v46 = vor.u32 %v5532_v40, %v3838_v41  ;;  %938 = vmatpush.bf16.msra.mxu3 %v4129_v38  ;;  %v5557_v33 = vld [vmem:[#allocation2 + $0x1cc] sm:$0xf]  ;;  %v3941_v40 = vor.u32 %v5561_v29, %v3940_v28 }
  0x24   :  { %v5600_v39 = vld [vmem:[#allocation2 + $0x31c] sm:$0xf0]  ;;  %v4094_v43 = vld [vmem:[#allocation2 + $0x320] sm:$0xf0]  ;;  %v3942_v34 = vld [vmem:[#allocation2 + $0x1e8] sm:$0xf0]  ;;  %v4197_v41 = vor.u32 %v5625_v32, %v4196_v30 }
  0x25   :  { %v4093_v45 = vor.u32 %v5600_v39, %v4092_v37  ;;  %v3804_v47 = vld [vmem:[#allocation2 + $0xc0] sm:$0xf]  ;;  %v4097_v50 = vor.u32 %v5596_v42, %v4094_v43  ;;  %v5524_v52 = vld [vmem:[#allocation2 + $0xc4] sm:$0xf]  ;;  %900 = vmatpush.bf16.msra.mxu0 %v3837_v44  ;;  %926 = vmatpush.bf16.msra.mxu2 %v3841_v46  ;;  %v5621_v37 = vld [vmem:[#allocation2 + $0x3cc] sm:$0xf]  ;;  %v3945_v42 = vor.u32 %v5557_v33, %v3942_v34 }
  0x26   :  { %v5528_v48 = vld [vmem:[#allocation2 + $0xdc] sm:$0xf0]  ;;  %v3806_v53 = vld [vmem:[#allocation2 + $0xe0] sm:$0xf0]  ;;  %v4198_v38 = vld [vmem:[#allocation2 + $0x3e8] sm:$0xf0] }
  0x27   :  { %v4060_v49 = vld [vmem:[#allocation2 + $0x2c0] sm:$0xf]  ;;  %v5588_v54 = vld [vmem:[#allocation2 + $0x2c4] sm:$0xf]  ;;  %v3805_v56 = vor.u32 %v5528_v48, %v3804_v47  ;;  %913 = vmatpush.bf16.msra.mxu1 %v4093_v45  ;;  %v3809_v58 = vor.u32 %v5524_v52, %v3806_v53  ;;  %939 = vmatpush.bf16.msra.mxu3 %v4097_v50  ;;  %v3908_v43 = vld [vmem:[#allocation2 + $0x188] sm:$0xf]  ;;  %v4201_v46 = vor.u32 %v5621_v37, %v4198_v38 }
  0x28   :  { %v5592_v51 = vld [vmem:[#allocation2 + $0x2dc] sm:$0xf0]  ;;  %v4062_v55 = vld [vmem:[#allocation2 + $0x2e0] sm:$0xf0]  ;;  %v5553_v44 = vld [vmem:[#allocation2 + $0x1a4] sm:$0xf0] }
  0x29   :  { %v4061_v57 = vor.u32 %v5592_v51, %v4060_v49  ;;  %v3772_v59 = vld [vmem:[#allocation2 + $0x80] sm:$0xf]  ;;  %v4065_v62 = vor.u32 %v5588_v54, %v4062_v55  ;;  %v5516_v0 = vld [vmem:[#allocation2 + $0x84] sm:$0xf]  ;;  %901 = vmatpush.bf16.msra.mxu0 %v3805_v56  ;;  %927 = vmatpush.bf16.msra.mxu2 %v3809_v58  ;;  %v4164_v45 = vld [vmem:[#allocation2 + $0x388] sm:$0xf]  ;;  %v3909_v53 = vor.u32 %v5553_v44, %v3908_v43 }
  0x2a   :  { %v5520_v60 = vld [vmem:[#allocation2 + $0x9c] sm:$0xf0]  ;;  %v3774_v1 = vld [vmem:[#allocation2 + $0xa0] sm:$0xf0]  ;;  %v5617_v47 = vld [vmem:[#allocation2 + $0x3a4] sm:$0xf0] }
  0x2b   :  { %v4028_v61 = vld [vmem:[#allocation2 + $0x280] sm:$0xf]  ;;  %v5580_v2 = vld [vmem:[#allocation2 + $0x284] sm:$0xf]  ;;  %v3773_v4 = vor.u32 %v5520_v60, %v3772_v59  ;;  %914 = vmatpush.bf16.msra.mxu1 %v4061_v57  ;;  %v3777_v6 = vor.u32 %v5516_v0, %v3774_v1  ;;  %940 = vmatpush.bf16.msra.mxu3 %v4065_v62  ;;  %v5549_v48 = vld [vmem:[#allocation2 + $0x18c] sm:$0xf]  ;;  %v4165_v56 = vor.u32 %v5617_v47, %v4164_v45 }
  0x2c   :  { %v5584_v63 = vld [vmem:[#allocation2 + $0x29c] sm:$0xf0]  ;;  %v4030_v3 = vld [vmem:[#allocation2 + $0x2a0] sm:$0xf0]  ;;  %v3910_v49 = vld [vmem:[#allocation2 + $0x1a8] sm:$0xf0] }
  0x2d   :  { %v4029_v5 = vor.u32 %v5584_v63, %v4028_v61  ;;  %v3740_v7 = vld [vmem:[#allocation2 + $0x40] sm:$0xf]  ;;  %v4033_v10 = vor.u32 %v5580_v2, %v4030_v3  ;;  %v5508_v12 = vld [vmem:[#allocation2 + $0x44] sm:$0xf]  ;;  %902 = vmatpush.bf16.msra.mxu0 %v3773_v4  ;;  %928 = vmatpush.bf16.msra.mxu2 %v3777_v6  ;;  %v5613_v50 = vld [vmem:[#allocation2 + $0x38c] sm:$0xf]  ;;  %v3913_v57 = vor.u32 %v5549_v48, %v3910_v49 }
  0x2e   :  { %v5512_v8 = vld [vmem:[#allocation2 + $0x5c] sm:$0xf0]  ;;  %v3742_v13 = vld [vmem:[#allocation2 + $0x60] sm:$0xf0]  ;;  %v4166_v51 = vld [vmem:[#allocation2 + $0x3a8] sm:$0xf0] }
  0x2f   :  { %v3996_v9 = vld [vmem:[#allocation2 + $0x240] sm:$0xf]  ;;  %v5572_v14 = vld [vmem:[#allocation2 + $0x244] sm:$0xf]  ;;  %v3741_v16 = vor.u32 %v5512_v8, %v3740_v7  ;;  %915 = vmatpush.bf16.msra.mxu1 %v4029_v5  ;;  %v3745_v20 = vor.u32 %v5508_v12, %v3742_v13  ;;  %941 = vmatpush.bf16.msra.mxu3 %v4033_v10  ;;  %v3876_v58 = vld [vmem:[#allocation2 + $0x148] sm:$0xf]  ;;  %v4169_v61 = vor.u32 %v5613_v50, %v4166_v51 }
  0x30   :  { %v5576_v11 = vld [vmem:[#allocation2 + $0x25c] sm:$0xf0]  ;;  %v3998_v15 = vld [vmem:[#allocation2 + $0x260] sm:$0xf0]  ;;  %v5545_v59 = vld [vmem:[#allocation2 + $0x164] sm:$0xf0] }
  0x31   :  { %v3708_v17 = vld [vmem:[#allocation2] sm:$0xf]  ;;  %v3997_v19 = vor.u32 %v5576_v11, %v3996_v9  ;;  %v5500_v23 = vld [vmem:[#allocation2 + $0x4] sm:$0xf]  ;;  %v4001_v24 = vor.u32 %v5572_v14, %v3998_v15  ;;  %903 = vmatpush.bf16.msra.mxu0 %v3741_v16  ;;  %929 = vmatpush.bf16.msra.mxu2 %v3745_v20  ;;  %v4132_v60 = vld [vmem:[#allocation2 + $0x348] sm:$0xf]  ;;  %v3877_v5 = vor.u32 %v5545_v59, %v3876_v58 }
  0x32   :  { %v5504_v18 = vld [vmem:[#allocation2 + $0x1c] sm:$0xf0]  ;;  %v3710_v25 = vld [vmem:[#allocation2 + $0x20] sm:$0xf0]  ;;  %v5609_v62 = vld [vmem:[#allocation2 + $0x364] sm:$0xf0] }
  0x33   :  { %v3964_v21 = vld [vmem:[#allocation2 + $0x200] sm:$0xf]  ;;  %v5564_v26 = vld [vmem:[#allocation2 + $0x204] sm:$0xf]  ;;  %v3709_v31 = vor.u32 %v5504_v18, %v3708_v17  ;;  %916 = vmatpush.bf16.msra.mxu1 %v3997_v19  ;;  %v3713_v36 = vor.u32 %v5500_v23, %v3710_v25  ;;  %942 = vmatpush.bf16.msra.mxu3 %v4001_v24  ;;  %v5541_v63 = vld [vmem:[#allocation2 + $0x14c] sm:$0xf]  ;;  %v4133_v6 = vor.u32 %v5609_v62, %v4132_v60 }
  0x34   :  { %v5568_v22 = vld [vmem:[#allocation2 + $0x21c] sm:$0xf0]  ;;  %v3966_v27 = vld [vmem:[#allocation2 + $0x220] sm:$0xf0]  ;;  %v3878_v0 = vld [vmem:[#allocation2 + $0x168] sm:$0xf0] }
  0x35   :  { %v3965_v35 = vor.u32 %v5568_v22, %v3964_v21  ;;  %v3969_v39 = vor.u32 %v5564_v26, %v3966_v27  ;;  %904 = vmatpush.bf16.msra.mxu0 %v3709_v31  ;;  %930 = vmatpush.bf16.msra.mxu2 %v3713_v36  ;;  %v103_v52 = vld [vmem:[%s6407_s0] sm:$0xff]  ;;  %v5605_v2 = vld [vmem:[#allocation2 + $0x34c] sm:$0xf]  ;;  %v3881_v7 = vor.u32 %v5541_v63, %v3878_v0  ;;  %v3844_v8 = vld [vmem:[#allocation2 + $0x108] sm:$0xf] }
  0x36   :  { %v251_v54 = vunpack.c.l.b16 %v103_v52  ;;  %v252_v55 = vunpack.c.h.b16 %v103_v52  ;;  %v4134_v3 = vld [vmem:[#allocation2 + $0x368] sm:$0xf0]  ;;  %v5537_v9 = vld [vmem:[#allocation2 + $0x124] sm:$0xf0] }
  0x37   :  { %917 = vmatpush.bf16.msra.mxu1 %v3965_v35  ;;  %943 = vmatpush.bf16.msra.mxu3 %v3969_v39  ;;  %v4100_v10 = vld [vmem:[#allocation2 + $0x308] sm:$0xf]  ;;  %v4137_v11 = vor.u32 %v5605_v2, %v4134_v3  ;;  %v5533_v13 = vld [vmem:[#allocation2 + $0x10c] sm:$0xf]  ;;  %v3845_v17 = vor.u32 %v5537_v9, %v3844_v8  ;;  %v3948_v2 = vld [vmem:[#allocation2 + $0x1d0] sm:$0xf] }
  0x38   :  { %v6238_v1 = vpack.c.b16 %v251_v54, %v251_v54  ;;  %v6240_v4 = vpack.c.b16 %v252_v55, %v252_v55  ;;  %v5601_v12 = vld [vmem:[#allocation2 + $0x324] sm:$0xf0]  ;;  %v3846_v14 = vld [vmem:[#allocation2 + $0x128] sm:$0xf0]  ;;  %v5562_v3 = vld [vmem:[#allocation2 + $0x1ec] sm:$0xf0] }
  0x39   :  { %949 = vmatpush.bf16.msrb.mxu0 %v3941_v40  ;;  %975 = vmatpush.bf16.msrb.mxu2 %v3945_v42  ;;  %v5597_v15 = vld [vmem:[#allocation2 + $0x30c] sm:$0xf]  ;;  %v4101_v18 = vor.u32 %v5601_v12, %v4100_v10  ;;  %v3849_v19 = vor.u32 %v5533_v13, %v3846_v14  ;;  %v3812_v20 = vld [vmem:[#allocation2 + $0xc8] sm:$0xf]  ;;  %v5558_v8 = vld [vmem:[#allocation2 + $0x1d4] sm:$0xf] }
  0x3a   :  { %931 = vmatmul.bf16.vlgmr.msra.gmra.mxu2 %v6238_v1  ;;  %905 = vmatmul.bf16.vlgmr.msra.gmra.mxu0 %v6238_v1  ;;  %v4102_v16 = vld [vmem:[#allocation2 + $0x328] sm:$0xf0]  ;;  %v5529_v21 = vld [vmem:[#allocation2 + $0xe4] sm:$0xf0]  ;;  %v3950_v9 = vld [vmem:[#allocation2 + $0x1f0] sm:$0xf0] }
  0x3b   :  { %962 = vmatpush.bf16.msrb.mxu1 %v4197_v41  ;;  %988 = vmatpush.bf16.msrb.mxu3 %v4201_v46  ;;  %v4068_v22 = vld [vmem:[#allocation2 + $0x2c8] sm:$0xf]  ;;  %v4105_v23 = vor.u32 %v5597_v15, %v4102_v16  ;;  %v5525_v25 = vld [vmem:[#allocation2 + $0xcc] sm:$0xf]  ;;  %v3813_v29 = vor.u32 %v5529_v21, %v3812_v20  ;;  %v5622_v12 = vld [vmem:[#allocation2 + $0x3d4] sm:$0xf]  ;;  %v3949_v15 = vor.u32 %v5562_v3, %v3948_v2 }
  0x3c   :  { %918 = vmatmul.bf16.vlgmr.msra.gmra.mxu1 %v6240_v4  ;;  %944 = vmatmul.bf16.vlgmr.msra.gmra.mxu3 %v6240_v4  ;;  %v5593_v24 = vld [vmem:[#allocation2 + $0x2e4] sm:$0xf0]  ;;  %v3814_v26 = vld [vmem:[#allocation2 + $0xe8] sm:$0xf0]  ;;  %v4206_v13 = vld [vmem:[#allocation2 + $0x3f0] sm:$0xf0] }
  0x3d   :  { %950 = vmatpush.bf16.msrb.mxu0 %v3909_v53  ;;  %976 = vmatpush.bf16.msrb.mxu2 %v3913_v57  ;;  %v5589_v27 = vld [vmem:[#allocation2 + $0x2cc] sm:$0xf]  ;;  %v4069_v30 = vor.u32 %v5593_v24, %v4068_v22  ;;  %v3817_v31 = vor.u32 %v5525_v25, %v3814_v26  ;;  %v3780_v32 = vld [vmem:[#allocation2 + $0x88] sm:$0xf]  ;;  %v4172_v20 = vld [vmem:[#allocation2 + $0x390] sm:$0xf]  ;;  %v4209_v21 = vor.u32 %v5622_v12, %v4206_v13 }
  0x3e   :  { %v4070_v28 = vld [vmem:[#allocation2 + $0x2e8] sm:$0xf0]  ;;  %v5521_v33 = vld [vmem:[#allocation2 + $0xa4] sm:$0xf0]  ;;  %v5618_v22 = vld [vmem:[#allocation2 + $0x3ac] sm:$0xf0] }
  0x3f   :  { %963 = vmatpush.bf16.msrb.mxu1 %v4165_v56  ;;  %989 = vmatpush.bf16.msrb.mxu3 %v4169_v61  ;;  %v4036_v34 = vld [vmem:[#allocation2 + $0x288] sm:$0xf]  ;;  %v4073_v35 = vor.u32 %v5589_v27, %v4070_v28  ;;  %v5517_v37 = vld [vmem:[#allocation2 + $0x8c] sm:$0xf]  ;;  %v3781_v41 = vor.u32 %v5521_v33, %v3780_v32  ;;  %v3918_v24 = vld [vmem:[#allocation2 + $0x1b0] sm:$0xf0]  ;;  %v4173_v28 = vor.u32 %v5618_v22, %v4172_v20 }
  0x40   :  { %v5585_v36 = vld [vmem:[#allocation2 + $0x2a4] sm:$0xf0]  ;;  %v3782_v38 = vld [vmem:[#allocation2 + $0xa8] sm:$0xf0]  ;;  %v5614_v25 = vld [vmem:[#allocation2 + $0x394] sm:$0xf] }
  0x41   :  { %951 = vmatpush.bf16.msrb.mxu0 %v3877_v5  ;;  %977 = vmatpush.bf16.msrb.mxu2 %v3881_v7  ;;  %v5581_v39 = vld [vmem:[#allocation2 + $0x28c] sm:$0xf]  ;;  %v4037_v42 = vor.u32 %v5585_v36, %v4036_v34  ;;  %v3785_v43 = vor.u32 %v5517_v37, %v3782_v38  ;;  %v3748_v44 = vld [vmem:[#allocation2 + $0x48] sm:$0xf]  ;;  %v4204_v5 = vld [vmem:[#allocation2 + $0x3d0] sm:$0xf] }
  0x42   :  { %v4038_v40 = vld [vmem:[#allocation2 + $0x2a8] sm:$0xf0]  ;;  %v5513_v45 = vld [vmem:[#allocation2 + $0x64] sm:$0xf0]  ;;  %v5626_v7 = vld [vmem:[#allocation2 + $0x3ec] sm:$0xf0] }
  0x43   :  { %964 = vmatpush.bf16.msrb.mxu1 %v4133_v6  ;;  %990 = vmatpush.bf16.msrb.mxu3 %v4137_v11  ;;  %v4004_v46 = vld [vmem:[#allocation2 + $0x248] sm:$0xf]  ;;  %v4041_v47 = vor.u32 %v5581_v39, %v4038_v40  ;;  %v5509_v49 = vld [vmem:[#allocation2 + $0x4c] sm:$0xf]  ;;  %v3749_v53 = vor.u32 %v5513_v45, %v3748_v44  ;;  %v4205_v16 = vor.u32 %v5626_v7, %v4204_v5  ;;  %v4174_v26 = vld [vmem:[#allocation2 + $0x3b0] sm:$0xf0] }
  0x44   :  { %v5577_v48 = vld [vmem:[#allocation2 + $0x264] sm:$0xf0]  ;;  %v3750_v50 = vld [vmem:[#allocation2 + $0x68] sm:$0xf0]  ;;  %v4140_v32 = vld [vmem:[#allocation2 + $0x350] sm:$0xf]  ;;  %v4177_v33 = vor.u32 %v5614_v25, %v4174_v26 }
  0x45   :  { %952 = vmatpush.bf16.msrb.mxu0 %v3845_v17  ;;  %978 = vmatpush.bf16.msrb.mxu2 %v3849_v19  ;;  %v5573_v51 = vld [vmem:[#allocation2 + $0x24c] sm:$0xf]  ;;  %v3716_v54 = vld [vmem:[#allocation2 + $0x8] sm:$0xf]  ;;  %v4005_v56 = vor.u32 %v5577_v48, %v4004_v46  ;;  %v3753_v57 = vor.u32 %v5509_v49, %v3750_v50  ;;  %v3953_v17 = vor.u32 %v5558_v8, %v3950_v9  ;;  %v5554_v19 = vld [vmem:[#allocation2 + $0x1ac] sm:$0xf0] }
  0x46   :  { %v4006_v52 = vld [vmem:[#allocation2 + $0x268] sm:$0xf0]  ;;  %v5505_v55 = vld [vmem:[#allocation2 + $0x24] sm:$0xf0]  ;;  %v5610_v34 = vld [vmem:[#allocation2 + $0x36c] sm:$0xf0] }
  0x47   :  { %965 = vmatpush.bf16.msrb.mxu1 %v4101_v18  ;;  %991 = vmatpush.bf16.msrb.mxu3 %v4105_v23  ;;  %v3972_v58 = vld [vmem:[#allocation2 + $0x208] sm:$0xf]  ;;  %v5501_v60 = vld [vmem:[#allocation2 + $0xc] sm:$0xf]  ;;  %v4009_v61 = vor.u32 %v5573_v51, %v4006_v52  ;;  %v3717_v6 = vor.u32 %v5505_v55, %v3716_v54  ;;  %v3916_v18 = vld [vmem:[#allocation2 + $0x190] sm:$0xf]  ;;  %v4141_v40 = vor.u32 %v5610_v34, %v4140_v32 }
  0x48   :  { %v5569_v59 = vld [vmem:[#allocation2 + $0x224] sm:$0xf0]  ;;  %v3718_v62 = vld [vmem:[#allocation2 + $0x28] sm:$0xf0]  ;;  %v5550_v23 = vld [vmem:[#allocation2 + $0x194] sm:$0xf]  ;;  %v3917_v27 = vor.u32 %v5554_v19, %v3916_v18 }
  0x49   :  { %953 = vmatpush.bf16.msrb.mxu0 %v3813_v29  ;;  %979 = vmatpush.bf16.msrb.mxu2 %v3817_v31  ;;  %v5565_v63 = vld [vmem:[#allocation2 + $0x20c] sm:$0xf]  ;;  %v3973_v10 = vor.u32 %v5569_v59, %v3972_v58  ;;  %v3721_v11 = vor.u32 %v5501_v60, %v3718_v62  ;;  %v3921_v29 = vor.u32 %v5550_v23, %v3918_v24  ;;  %v5546_v31 = vld [vmem:[#allocation2 + $0x16c] sm:$0xf0]  ;;  %v3886_v36 = vld [vmem:[#allocation2 + $0x170] sm:$0xf0] }
  0x4a   :  { %v3974_v0 = vld [vmem:[#allocation2 + $0x228] sm:$0xf0]  ;;  %v5606_v37 = vld [vmem:[#allocation2 + $0x354] sm:$0xf]  ;;  %v4108_v44 = vld [vmem:[#allocation2 + $0x310] sm:$0xf] }
  0x4b   :  { %966 = vmatpush.bf16.msrb.mxu1 %v4069_v30  ;;  %992 = vmatpush.bf16.msrb.mxu3 %v4073_v35  ;;  %v3977_v14 = vor.u32 %v5565_v63, %v3974_v0  ;;  %v3884_v30 = vld [vmem:[#allocation2 + $0x150] sm:$0xf]  ;;  %v5542_v35 = vld [vmem:[#allocation2 + $0x154] sm:$0xf] }
  0x4c   :  { %v4142_v38 = vld [vmem:[#allocation2 + $0x370] sm:$0xf0]  ;;  %v3885_v39 = vor.u32 %v5546_v31, %v3884_v30  ;;  %v5602_v46 = vld [vmem:[#allocation2 + $0x32c] sm:$0xf0] }
  0x4d   :  { %954 = vmatpush.bf16.msrb.mxu0 %v3781_v41  ;;  %980 = vmatpush.bf16.msrb.mxu2 %v3785_v43  ;;  %v3889_v41 = vor.u32 %v5542_v35, %v3886_v36  ;;  %v5538_v43 = vld [vmem:[#allocation2 + $0x12c] sm:$0xf0]  ;;  %v4145_v45 = vor.u32 %v5606_v37, %v4142_v38  ;;  %v3854_v48 = vld [vmem:[#allocation2 + $0x130] sm:$0xf0]  ;;  %v4109_v52 = vor.u32 %v5602_v46, %v4108_v44  ;;  %v3956_v37 = vld [vmem:[#allocation2 + $0x1d8] sm:$0xf] }
  0x4e   :  { %v5598_v49 = vld [vmem:[#allocation2 + $0x314] sm:$0xf]  ;;  %v3820_v54 = vld [vmem:[#allocation2 + $0xd0] sm:$0xf]  ;;  %v5563_v38 = vld [vmem:[#allocation2 + $0x1f4] sm:$0xf0] }
  0x4f   :  { %967 = vmatpush.bf16.msrb.mxu1 %v4037_v42  ;;  %993 = vmatpush.bf16.msrb.mxu3 %v4041_v47  ;;  %v3852_v42 = vld [vmem:[#allocation2 + $0x110] sm:$0xf]  ;;  %v5534_v47 = vld [vmem:[#allocation2 + $0x114] sm:$0xf]  ;;  %v5623_v46 = vld [vmem:[#allocation2 + $0x3dc] sm:$0xf] }
  0x50   :  { %v4110_v50 = vld [vmem:[#allocation2 + $0x330] sm:$0xf0]  ;;  %v3853_v51 = vor.u32 %v5538_v43, %v3852_v42  ;;  %v5530_v55 = vld [vmem:[#allocation2 + $0xec] sm:$0xf0]  ;;  %v5559_v42 = vld [vmem:[#allocation2 + $0x1dc] sm:$0xf] }
  0x51   :  { %955 = vmatpush.bf16.msrb.mxu0 %v3749_v53  ;;  %981 = vmatpush.bf16.msrb.mxu2 %v3753_v57  ;;  %v3857_v53 = vor.u32 %v5534_v47, %v3854_v48  ;;  %v4113_v57 = vor.u32 %v5598_v49, %v4110_v50  ;;  %v5594_v58 = vld [vmem:[#allocation2 + $0x2ec] sm:$0xf0]  ;;  %v5526_v59 = vld [vmem:[#allocation2 + $0xd4] sm:$0xf]  ;;  %v3821_v63 = vor.u32 %v5530_v55, %v3820_v54  ;;  %v3958_v43 = vld [vmem:[#allocation2 + $0x1f8] sm:$0xf0] }
  0x52   :  { %v3822_v60 = vld [vmem:[#allocation2 + $0xf0] sm:$0xf0]  ;;  %v3788_v3 = vld [vmem:[#allocation2 + $0x90] sm:$0xf]  ;;  %v4214_v47 = vld [vmem:[#allocation2 + $0x3f8] sm:$0xf0]  ;;  %v3957_v49 = vor.u32 %v5563_v38, %v3956_v37 }
  0x53   :  { %968 = vmatpush.bf16.msrb.mxu1 %v4005_v56  ;;  %994 = vmatpush.bf16.msrb.mxu3 %v4009_v61  ;;  %v4076_v56 = vld [vmem:[#allocation2 + $0x2d0] sm:$0xf]  ;;  %v5590_v61 = vld [vmem:[#allocation2 + $0x2d4] sm:$0xf]  ;;  %v3825_v2 = vor.u32 %v5526_v59, %v3822_v60  ;;  %v4180_v54 = vld [vmem:[#allocation2 + $0x398] sm:$0xf]  ;;  %v4217_v55 = vor.u32 %v5623_v46, %v4214_v47 }
  0x54   :  { %v4078_v62 = vld [vmem:[#allocation2 + $0x2f0] sm:$0xf0]  ;;  %v4077_v0 = vor.u32 %v5594_v58, %v4076_v56  ;;  %v5522_v5 = vld [vmem:[#allocation2 + $0xac] sm:$0xf0]  ;;  %v5619_v56 = vld [vmem:[#allocation2 + $0x3b4] sm:$0xf0] }
  0x55   :  { %956 = vmatpush.bf16.msrb.mxu0 %v3717_v6  ;;  %982 = vmatpush.bf16.msrb.mxu2 %v3721_v11  ;;  %v4044_v6 = vld [vmem:[#allocation2 + $0x290] sm:$0xf]  ;;  %v4081_v7 = vor.u32 %v5590_v61, %v4078_v62  ;;  %v5518_v9 = vld [vmem:[#allocation2 + $0x94] sm:$0xf]  ;;  %v3789_v13 = vor.u32 %v5522_v5, %v3788_v3  ;;  %v3926_v58 = vld [vmem:[#allocation2 + $0x1b8] sm:$0xf0]  ;;  %v4181_v62 = vor.u32 %v5619_v56, %v4180_v54 }
  0x56   :  { %v5586_v8 = vld [vmem:[#allocation2 + $0x2ac] sm:$0xf0]  ;;  %v5582_v11 = vld [vmem:[#allocation2 + $0x294] sm:$0xf]  ;;  %v5615_v59 = vld [vmem:[#allocation2 + $0x39c] sm:$0xf] }
  0x57   :  { %969 = vmatpush.bf16.msrb.mxu1 %v3973_v10  ;;  %995 = vmatpush.bf16.msrb.mxu3 %v3977_v14  ;;  %v3790_v10 = vld [vmem:[#allocation2 + $0xb0] sm:$0xf0]  ;;  %v4045_v14 = vor.u32 %v5586_v8, %v4044_v6  ;;  %v4012_v18 = vld [vmem:[#allocation2 + $0x250] sm:$0xf]  ;;  %v4182_v60 = vld [vmem:[#allocation2 + $0x3b8] sm:$0xf0] }
  0x58   :  { %957 = vmatmul.bf16.vlgmr.msrb.gmra.mxu0 %v6238_v1  ;;  %983 = vmatmul.bf16.vlgmr.msrb.gmra.mxu2 %v6238_v1  ;;  %v4046_v12 = vld [vmem:[#allocation2 + $0x2b0] sm:$0xf0]  ;;  %v5578_v20 = vld [vmem:[#allocation2 + $0x26c] sm:$0xf0]  ;;  %v4148_v3 = vld [vmem:[#allocation2 + $0x358] sm:$0xf]  ;;  %v4185_v5 = vor.u32 %v5615_v59, %v4182_v60 }
  0x59   :  { %1001 = vmatpush.bf16.msra.mxu0 %v3949_v15  ;;  %1027 = vmatpush.bf16.msra.mxu2 %v3953_v17  ;;  %v3793_v15 = vor.u32 %v5518_v9, %v3790_v10  ;;  %v5514_v17 = vld [vmem:[#allocation2 + $0x6c] sm:$0xf0]  ;;  %v4049_v19 = vor.u32 %v5582_v11, %v4046_v12  ;;  %v3758_v22 = vld [vmem:[#allocation2 + $0x70] sm:$0xf0]  ;;  %v5611_v6 = vld [vmem:[#allocation2 + $0x374] sm:$0xf0] }
  0x5a   :  { %970 = vmatmul.bf16.vlgmr.msrb.gmra.mxu1 %v6240_v4  ;;  %996 = vmatmul.bf16.vlgmr.msrb.gmra.mxu3 %v6240_v4  ;;  %v5574_v23 = vld [vmem:[#allocation2 + $0x254] sm:$0xf]  ;;  %v3724_v26 = vld [vmem:[#allocation2 + $0x10] sm:$0xf]  ;;  %v3894_v8 = vld [vmem:[#allocation2 + $0x178] sm:$0xf0]  ;;  %v4149_v12 = vor.u32 %v5611_v6, %v4148_v3 }
  0x5b   :  { %1014 = vmatpush.bf16.msra.mxu1 %v4205_v16  ;;  %1040 = vmatpush.bf16.msra.mxu3 %v4209_v21  ;;  %v3756_v16 = vld [vmem:[#allocation2 + $0x50] sm:$0xf]  ;;  %v5510_v21 = vld [vmem:[#allocation2 + $0x54] sm:$0xf]  ;;  %v5607_v9 = vld [vmem:[#allocation2 + $0x35c] sm:$0xf] }
  0x5c   :  { %v4014_v24 = vld [vmem:[#allocation2 + $0x270] sm:$0xf0]  ;;  %v3757_v25 = vor.u32 %v5514_v17, %v3756_v16  ;;  %v3980_v30 = vld [vmem:[#allocation2 + $0x210] sm:$0xf]  ;;  %v4150_v10 = vld [vmem:[#allocation2 + $0x378] sm:$0xf0] }
  0x5d   :  { %1002 = vmatpush.bf16.msra.mxu0 %v3917_v27  ;;  %1028 = vmatpush.bf16.msra.mxu2 %v3921_v29  ;;  %v5506_v27 = vld [vmem:[#allocation2 + $0x2c] sm:$0xf0]  ;;  %v3761_v29 = vor.u32 %v5510_v21, %v3758_v22  ;;  %v5502_v32 = vld [vmem:[#allocation2 + $0x14] sm:$0xf]  ;;  %v4116_v16 = vld [vmem:[#allocation2 + $0x318] sm:$0xf]  ;;  %v4153_v17 = vor.u32 %v5607_v9, %v4150_v10 }
  0x5e   :  { %v5570_v31 = vld [vmem:[#allocation2 + $0x22c] sm:$0xf0]  ;;  %v3726_v34 = vld [vmem:[#allocation2 + $0x30] sm:$0xf0]  ;;  %v5599_v21 = vld [vmem:[#allocation2 + $0x31c] sm:$0xf] }
  0x5f   :  { %1015 = vmatpush.bf16.msra.mxu1 %v4173_v28  ;;  %1041 = vmatpush.bf16.msra.mxu3 %v4177_v33  ;;  %v4013_v28 = vor.u32 %v5578_v20, %v4012_v18  ;;  %v4017_v33 = vor.u32 %v5574_v23, %v4014_v24  ;;  %v5566_v35 = vld [vmem:[#allocation2 + $0x214] sm:$0xf]  ;;  %v3981_v44 = vor.u32 %v5570_v31, %v3980_v30  ;;  %v5603_v18 = vld [vmem:[#allocation2 + $0x334] sm:$0xf0]  ;;  %v3862_v20 = vld [vmem:[#allocation2 + $0x138] sm:$0xf0] }
  0x60   :  { %v3982_v36 = vld [vmem:[#allocation2 + $0x230] sm:$0xf0]  ;;  %v4118_v22 = vld [vmem:[#allocation2 + $0x338] sm:$0xf0]  ;;  %v4117_v24 = vor.u32 %v5603_v18, %v4116_v16  ;;  %v5595_v30 = vld [vmem:[#allocation2 + $0x2f4] sm:$0xf0] }
  0x61   :  { %1003 = vmatpush.bf16.msra.mxu0 %v3885_v39  ;;  %1029 = vmatpush.bf16.msra.mxu2 %v3889_v41  ;;  %v4212_v39 = vld [vmem:[#allocation2 + $0x3d8] sm:$0xf]  ;;  %v3985_v48 = vor.u32 %v5566_v35, %v3982_v36  ;;  %v5527_v31 = vld [vmem:[#allocation2 + $0xdc] sm:$0xf]  ;;  %v4276_v9 = vld [vmem:[#allocation5 + $0x70] sm:$0xf] }
  0x62   :  { %v5627_v41 = vld [vmem:[#allocation2 + $0x3f4] sm:$0xf0]  ;;  %v4054_v46 = vld [vmem:[#allocation2 + $0x2b8] sm:$0xf0]  ;;  %v4404_v18 = vld [vmem:[#allocation5 + $0x170] sm:$0xf] }
  0x63   :  { %1016 = vmatpush.bf16.msra.mxu1 %v4141_v40  ;;  %1042 = vmatpush.bf16.msra.mxu3 %v4145_v45  ;;  %v3725_v40 = vor.u32 %v5506_v27, %v3724_v26  ;;  %v3729_v45 = vor.u32 %v5502_v32, %v3726_v34  ;;  %v4213_v50 = vor.u32 %v5627_v41, %v4212_v39  ;;  %v3828_v26 = vld [vmem:[#allocation2 + $0xd8] sm:$0xf]  ;;  %v3830_v32 = vld [vmem:[#allocation2 + $0xf8] sm:$0xf0] }
  0x64   :  { %v5531_v27 = vld [vmem:[#allocation2 + $0xf4] sm:$0xf0]  ;;  %v4086_v34 = vld [vmem:[#allocation2 + $0x2f8] sm:$0xf0]  ;;  %v3833_v37 = vor.u32 %v5527_v31, %v3830_v32  ;;  %v4324_v32 = vld [vmem:[#allocation5 + $0xd0] sm:$0xf] }
  0x65   :  { %1004 = vmatpush.bf16.msra.mxu0 %v3853_v51  ;;  %1030 = vmatpush.bf16.msra.mxu2 %v3857_v53  ;;  %v3961_v51 = vor.u32 %v5559_v42, %v3958_v43  ;;  %v5555_v53 = vld [vmem:[#allocation2 + $0x1b4] sm:$0xf0]  ;;  %v3829_v35 = vor.u32 %v5531_v27, %v3828_v26  ;;  %v5519_v43 = vld [vmem:[#allocation2 + $0x9c] sm:$0xf]  ;;  %v4396_v27 = vld [vmem:[#allocation5 + $0x160] sm:$0xf] }
  0x66   :  { %v3796_v38 = vld [vmem:[#allocation2 + $0x98] sm:$0xf]  ;;  %v3766_v56 = vld [vmem:[#allocation2 + $0x78] sm:$0xf0] }
  0x67   :  { %1017 = vmatpush.bf16.msra.mxu1 %v4109_v52  ;;  %1043 = vmatpush.bf16.msra.mxu3 %v4113_v57  ;;  %v3924_v52 = vld [vmem:[#allocation2 + $0x198] sm:$0xf]  ;;  %v5551_v57 = vld [vmem:[#allocation2 + $0x19c] sm:$0xf] }
  0x68   :  { %v3925_v61 = vor.u32 %v5555_v53, %v3924_v52  ;;  %v5523_v39 = vld [vmem:[#allocation2 + $0xb4] sm:$0xf0]  ;;  %v3734_v6 = vld [vmem:[#allocation2 + $0x38] sm:$0xf0] }
  0x69   :  { %1005 = vmatpush.bf16.msra.mxu0 %v3821_v63  ;;  %1031 = vmatpush.bf16.msra.mxu2 %v3825_v2  ;;  %v3929_v63 = vor.u32 %v5551_v57, %v3926_v58  ;;  %v5547_v2 = vld [vmem:[#allocation2 + $0x174] sm:$0xf0]  ;;  %v3797_v47 = vor.u32 %v5523_v39, %v3796_v38  ;;  %v5575_v57 = vld [vmem:[#allocation2 + $0x25c] sm:$0xf]  ;;  %v4316_v39 = vld [vmem:[#allocation5 + $0xc0] sm:$0xf] }
  0x6a   :  { %v5587_v42 = vld [vmem:[#allocation2 + $0x2b4] sm:$0xf0]  ;;  %v4022_v58 = vld [vmem:[#allocation2 + $0x278] sm:$0xf0] }
  0x6b   :  { %1018 = vmatpush.bf16.msra.mxu1 %v4077_v0  ;;  %1044 = vmatpush.bf16.msra.mxu3 %v4081_v7  ;;  %v3892_v0 = vld [vmem:[#allocation2 + $0x158] sm:$0xf]  ;;  %v5543_v7 = vld [vmem:[#allocation2 + $0x15c] sm:$0xf]  ;;  %v4025_v3 = vor.u32 %v5575_v57, %v4022_v58 }
  0x6c   :  { %v3893_v11 = vor.u32 %v5547_v2, %v3892_v0  ;;  %v4020_v52 = vld [vmem:[#allocation2 + $0x258] sm:$0xf] }
  0x6d   :  { %1006 = vmatpush.bf16.msra.mxu0 %v3789_v13  ;;  %1032 = vmatpush.bf16.msra.mxu2 %v3793_v15  ;;  %v3897_v13 = vor.u32 %v5543_v7, %v3894_v8  ;;  %v5539_v15 = vld [vmem:[#allocation2 + $0x134] sm:$0xf0]  ;;  %v5567_v7 = vld [vmem:[#allocation2 + $0x21c] sm:$0xf] }
  0x6e   :  { %v5579_v54 = vld [vmem:[#allocation2 + $0x274] sm:$0xf0]  ;;  %v3990_v8 = vld [vmem:[#allocation2 + $0x238] sm:$0xf0] }
  0x6f   :  { %1019 = vmatpush.bf16.msra.mxu1 %v4045_v14  ;;  %1045 = vmatpush.bf16.msra.mxu3 %v4049_v19  ;;  %v3860_v14 = vld [vmem:[#allocation2 + $0x118] sm:$0xf]  ;;  %v5535_v19 = vld [vmem:[#allocation2 + $0x11c] sm:$0xf]  ;;  %v3993_v16 = vor.u32 %v5567_v7, %v3990_v8  ;;  %v4532_v8 = vld [vmem:[#allocation5 + $0x270] sm:$0xf] }
  0x70   :  { %v3861_v23 = vor.u32 %v5539_v15, %v3860_v14  ;;  %v3732_v60 = vld [vmem:[#allocation2 + $0x18] sm:$0xf] }
  0x71   :  { %1007 = vmatpush.bf16.msra.mxu0 %v3757_v25  ;;  %1033 = vmatpush.bf16.msra.mxu2 %v3761_v29  ;;  %v3865_v25 = vor.u32 %v5535_v19, %v3862_v20  ;;  %v4121_v29 = vor.u32 %v5599_v21, %v4118_v22  ;;  %v3988_v0 = vld [vmem:[#allocation2 + $0x218] sm:$0xf]  ;;  %v4268_v20 = vld [vmem:[#allocation5 + $0x60] sm:$0xf]  ;;  %v5641_v21 = vld [vmem:[#allocation5 + $0x64] sm:$0xf0] }
  0x72   :  { %v5571_v2 = vld [vmem:[#allocation2 + $0x234] sm:$0xf0]  ;;  %v4269_v26 = vor.u32 %v5641_v21, %v4268_v20  ;;  %v4596_v20 = vld [vmem:[#allocation5 + $0x2f0] sm:$0xf] }
  0x73   :  { %1020 = vmatpush.bf16.msra.mxu1 %v4013_v28  ;;  %1046 = vmatpush.bf16.msra.mxu3 %v4017_v33  ;;  %v4084_v28 = vld [vmem:[#allocation2 + $0x2d8] sm:$0xf]  ;;  %v5591_v33 = vld [vmem:[#allocation2 + $0x2dc] sm:$0xf]  ;;  %v3989_v14 = vor.u32 %v5571_v2, %v3988_v0  ;;  %v5689_v0 = vld [vmem:[#allocation5 + $0x1e4] sm:$0xf0] }
  0x74   :  { %v4085_v36 = vor.u32 %v5595_v30, %v4084_v28  ;;  %v4089_v41 = vor.u32 %v5591_v33, %v4086_v34  ;;  %v5643_v10 = vld [vmem:[#allocation5 + $0x74] sm:$0xf0]  ;;  %v5673_v28 = vld [vmem:[#allocation5 + $0x164] sm:$0xf0]  ;;  %v4220_v2 = vld [vmem:[#allocation5] sm:$0xf] }
  0x75   :  { %1008 = vmatpush.bf16.msra.mxu0 %v3725_v40  ;;  %1034 = vmatpush.bf16.msra.mxu2 %v3729_v45  ;;  %v4052_v40 = vld [vmem:[#allocation2 + $0x298] sm:$0xf]  ;;  %v5583_v45 = vld [vmem:[#allocation2 + $0x29c] sm:$0xf]  ;;  %v4397_v34 = vor.u32 %v5673_v28, %v4396_v27  ;;  %v4364_v28 = vld [vmem:[#allocation5 + $0x120] sm:$0xf] }
  0x76   :  { %v4057_v53 = vor.u32 %v5583_v45, %v4054_v46  ;;  %v5675_v19 = vld [vmem:[#allocation5 + $0x174] sm:$0xf0] }
  0x77   :  { %1021 = vmatpush.bf16.msra.mxu1 %v3981_v44  ;;  %1047 = vmatpush.bf16.msra.mxu3 %v3985_v48  ;;  %v3798_v44 = vld [vmem:[#allocation2 + $0xb8] sm:$0xf0]  ;;  %v4053_v48 = vor.u32 %v5587_v42, %v4052_v40  ;;  %v5639_v30 = vld [vmem:[#allocation5 + $0x54] sm:$0xf0]  ;;  %v5653_v40 = vld [vmem:[#allocation5 + $0xc4] sm:$0xf0] }
  0x78   :  { %1009 = vmatmul.bf16.vlgmr.msra.gmra.mxu0 %v6238_v1  ;;  %1035 = vmatmul.bf16.vlgmr.msra.gmra.mxu2 %v6238_v1  ;;  %v5655_v33 = vld [vmem:[#allocation5 + $0xd4] sm:$0xf0]  ;;  %v4244_v42 = vld [vmem:[#allocation5 + $0x30] sm:$0xf] }
  0x79   :  { %1053 = vmatpush.bf16.msrb.mxu0 %v3957_v49  ;;  %1079 = vmatpush.bf16.msrb.mxu2 %v3961_v51  ;;  %v3801_v49 = vor.u32 %v5519_v43, %v3798_v44  ;;  %v5515_v51 = vld [vmem:[#allocation2 + $0x74] sm:$0xf0]  ;;  %v4325_v38 = vor.u32 %v5655_v33, %v4324_v32  ;;  %v4317_v43 = vor.u32 %v5653_v40, %v4316_v39  ;;  %v4308_v44 = vld [vmem:[#allocation5 + $0xb0] sm:$0xf] }
  0x7a   :  { %1022 = vmatmul.bf16.vlgmr.msra.gmra.mxu1 %v6240_v4  ;;  %1048 = vmatmul.bf16.vlgmr.msra.gmra.mxu3 %v6240_v4  ;;  %v5651_v45 = vld [vmem:[#allocation5 + $0xb4] sm:$0xf0] }
  0x7b   :  { %1066 = vmatpush.bf16.msrb.mxu1 %v4213_v50  ;;  %1092 = vmatpush.bf16.msrb.mxu3 %v4217_v55  ;;  %v3764_v50 = vld [vmem:[#allocation2 + $0x58] sm:$0xf]  ;;  %v5511_v55 = vld [vmem:[#allocation2 + $0x5c] sm:$0xf] }
  0x7c   :  { %v3765_v59 = vor.u32 %v5515_v51, %v3764_v50  ;;  %v5691_v46 = vld [vmem:[#allocation5 + $0x1f4] sm:$0xf0]  ;;  %v5633_v50 = vld [vmem:[#allocation5 + $0x24] sm:$0xf0]  ;;  %v4309_v51 = vor.u32 %v5651_v45, %v4308_v44  ;;  %v4508_v44 = vld [vmem:[#allocation5 + $0x240] sm:$0xf] }
  0x7d   :  { %1054 = vmatpush.bf16.msrb.mxu0 %v3925_v61  ;;  %1080 = vmatpush.bf16.msrb.mxu2 %v3929_v63  ;;  %v4021_v61 = vor.u32 %v5579_v54, %v4020_v52  ;;  %v5507_v63 = vld [vmem:[#allocation2 + $0x34] sm:$0xf0]  ;;  %v4300_v52 = vld [vmem:[#allocation5 + $0xa0] sm:$0xf]  ;;  %v5701_v45 = vld [vmem:[#allocation5 + $0x244] sm:$0xf0] }
  0x7e   :  { %v5631_v57 = vld [vmem:[#allocation5 + $0x14] sm:$0xf0] }
  0x7f   :  { %1067 = vmatpush.bf16.msrb.mxu1 %v4181_v62  ;;  %1093 = vmatpush.bf16.msrb.mxu3 %v4185_v5  ;;  %v3769_v62 = vor.u32 %v5511_v55, %v3766_v56  ;;  %v5503_v5 = vld [vmem:[#allocation2 + $0x1c] sm:$0xf]  ;;  %v4228_v55 = vld [vmem:[#allocation5 + $0x10] sm:$0xf]  ;;  %v5723_v21 = vld [vmem:[#allocation5 + $0x2f4] sm:$0xf0] }
  0x80   :  { %v3737_v15 = vor.u32 %v5503_v5, %v3734_v6  ;;  %v4388_v56 = vld [vmem:[#allocation5 + $0x150] sm:$0xf]  ;;  %v4380_v6 = vld [vmem:[#allocation5 + $0x140] sm:$0xf]  ;;  %v4229_v7 = vor.u32 %v5631_v57, %v4228_v55  ;;  %v4597_v32 = vor.u32 %v5723_v21, %v4596_v20  ;;  %v5703_v39 = vld [vmem:[#allocation5 + $0x254] sm:$0xf0] }
  0x81   :  { %1055 = vmatpush.bf16.msrb.mxu0 %v3893_v11  ;;  %1081 = vmatpush.bf16.msrb.mxu2 %v3897_v13  ;;  %v3733_v11 = vor.u32 %v5507_v63, %v3732_v60  ;;  %v5659_v13 = vld [vmem:[#allocation5 + $0xf4] sm:$0xf0]  ;;  %v4460_v63 = vld [vmem:[#allocation5 + $0x1e0] sm:$0xf]  ;;  %v4500_v55 = vld [vmem:[#allocation5 + $0x230] sm:$0xf] }
  0x82   :  { %v5671_v60 = vld [vmem:[#allocation5 + $0x154] sm:$0xf0]  ;;  %v4461_v5 = vor.u32 %v5689_v0, %v4460_v63  ;;  %v4484_v21 = vld [vmem:[#allocation5 + $0x210] sm:$0xf] }
  0x83   :  { %1068 = vmatpush.bf16.msrb.mxu1 %v4149_v12  ;;  %1094 = vmatpush.bf16.msrb.mxu3 %v4153_v17  ;;  %v4340_v12 = vld [vmem:[#allocation5 + $0xf0] sm:$0xf]  ;;  %v4277_v17 = vor.u32 %v5643_v10, %v4276_v9  ;;  %v5707_v9 = vld [vmem:[#allocation5 + $0x274] sm:$0xf0]  ;;  %v5669_v10 = vld [vmem:[#allocation5 + $0x144] sm:$0xf0] }
  0x84   :  { %v4341_v22 = vor.u32 %v5659_v13, %v4340_v12  ;;  %v4284_v12 = vld [vmem:[#allocation5 + $0x80] sm:$0xf]  ;;  %v4381_v13 = vor.u32 %v5669_v10, %v4380_v6  ;;  %v5661_v6 = vld [vmem:[#allocation5 + $0x104] sm:$0xf0] }
  0x85   :  { %1056 = vmatpush.bf16.msrb.mxu0 %v3861_v23  ;;  %1082 = vmatpush.bf16.msrb.mxu2 %v3865_v25  ;;  %v4332_v23 = vld [vmem:[#allocation5 + $0xe0] sm:$0xf]  ;;  %v4405_v25 = vor.u32 %v5675_v19, %v4404_v18  ;;  %v4372_v18 = vld [vmem:[#allocation5 + $0x130] sm:$0xf]  ;;  %v5667_v19 = vld [vmem:[#allocation5 + $0x134] sm:$0xf0] }
  0x86   :  { %v5697_v10 = vld [vmem:[#allocation5 + $0x224] sm:$0xf0] }
  0x87   :  { %1069 = vmatpush.bf16.msrb.mxu1 %v4117_v24  ;;  %1095 = vmatpush.bf16.msrb.mxu3 %v4121_v29  ;;  %v5657_v24 = vld [vmem:[#allocation5 + $0xe4] sm:$0xf0]  ;;  %v4260_v29 = vld [vmem:[#allocation5 + $0x50] sm:$0xf] }
  0x88   :  { %v4333_v31 = vor.u32 %v5657_v24, %v4332_v23  ;;  %v4373_v24 = vor.u32 %v5667_v19, %v4372_v18 }
  0x89   :  { %1057 = vmatpush.bf16.msrb.mxu0 %v3829_v35  ;;  %1083 = vmatpush.bf16.msrb.mxu2 %v3833_v37  ;;  %v4261_v35 = vor.u32 %v5639_v30, %v4260_v29  ;;  %v5637_v37 = vld [vmem:[#allocation5 + $0x44] sm:$0xf0]  ;;  %v4524_v30 = vld [vmem:[#allocation5 + $0x260] sm:$0xf] }
  0x8a   :  { %v5665_v29 = vld [vmem:[#allocation5 + $0x124] sm:$0xf0] }
  0x8b   :  { %1070 = vmatpush.bf16.msrb.mxu1 %v4085_v36  ;;  %1096 = vmatpush.bf16.msrb.mxu3 %v4089_v41  ;;  %v4252_v36 = vld [vmem:[#allocation5 + $0x40] sm:$0xf] }
  0x8c   :  { %v4253_v41 = vor.u32 %v5637_v37, %v4252_v36  ;;  %v4365_v36 = vor.u32 %v5665_v29, %v4364_v28  ;;  %v4548_v29 = vld [vmem:[#allocation5 + $0x290] sm:$0xf] }
  0x8d   :  { %1058 = vmatpush.bf16.msrb.mxu0 %v3797_v47  ;;  %1084 = vmatpush.bf16.msrb.mxu2 %v3801_v49  ;;  %v4236_v49 = vld [vmem:[#allocation5 + $0x20] sm:$0xf] }
  0x8e   :  { %v4237_v54 = vor.u32 %v5633_v50, %v4236_v49  ;;  %v5683_v49 = vld [vmem:[#allocation5 + $0x1b4] sm:$0xf0] }
  0x8f   :  { %1071 = vmatpush.bf16.msrb.mxu1 %v4053_v48  ;;  %1097 = vmatpush.bf16.msrb.mxu3 %v4057_v53  ;;  %v5649_v53 = vld [vmem:[#allocation5 + $0xa4] sm:$0xf0] }
  0x90   :  { %v4301_v58 = vor.u32 %v5649_v53, %v4300_v52  ;;  %v4509_v52 = vor.u32 %v5701_v45, %v4508_v44  ;;  %v4356_v53 = vld [vmem:[#allocation5 + $0x110] sm:$0xf]  ;;  %v4278_v45 = vld [vmem:[#allocation5 + $0x78] sm:$0xf0] }
  0x91   :  { %1059 = vmatpush.bf16.msrb.mxu0 %v3765_v59  ;;  %1085 = vmatpush.bf16.msrb.mxu2 %v3769_v62  ;;  %v4292_v59 = vld [vmem:[#allocation5 + $0x90] sm:$0xf]  ;;  %v4389_v62 = vor.u32 %v5671_v60, %v4388_v56  ;;  %v5699_v56 = vld [vmem:[#allocation5 + $0x234] sm:$0xf0] }
  0x92   :  { %v5715_v60 = vld [vmem:[#allocation5 + $0x2b4] sm:$0xf0] }
  0x93   :  { %1072 = vmatpush.bf16.msrb.mxu1 %v4021_v61  ;;  %1098 = vmatpush.bf16.msrb.mxu3 %v4025_v3  ;;  %v5647_v61 = vld [vmem:[#allocation5 + $0x94] sm:$0xf0]  ;;  %v5629_v3 = vld [vmem:[#allocation5 + $0x4] sm:$0xf0] }
  0x94   :  { %v4221_v23 = vor.u32 %v5629_v3, %v4220_v2  ;;  %v4501_v3 = vor.u32 %v5699_v56, %v4500_v55  ;;  %v4644_v55 = vld [vmem:[#allocation5 + $0x350] sm:$0xf] }
  0x95   :  { %1060 = vmatpush.bf16.msrb.mxu0 %v3733_v11  ;;  %1086 = vmatpush.bf16.msrb.mxu2 %v3737_v15  ;;  %v4293_v11 = vor.u32 %v5647_v61, %v4292_v59  ;;  %v5687_v15 = vld [vmem:[#allocation5 + $0x1d4] sm:$0xf0]  ;;  %v4564_v59 = vld [vmem:[#allocation5 + $0x2b0] sm:$0xf]  ;;  %v4428_v61 = vld [vmem:[#allocation5 + $0x1a0] sm:$0xf] }
  0x97   :  { %1073 = vmatpush.bf16.msrb.mxu1 %v3989_v14  ;;  %1099 = vmatpush.bf16.msrb.mxu3 %v3993_v16  ;;  %v4452_v14 = vld [vmem:[#allocation5 + $0x1d0] sm:$0xf]  ;;  %v5645_v16 = vld [vmem:[#allocation5 + $0x84] sm:$0xf0] }
  0x98   :  { %1061 = vmatmul.bf16.vlgmr.msrb.gmra.mxu0 %v6238_v1  ;;  %1087 = vmatmul.bf16.vlgmr.msrb.gmra.mxu2 %v6238_v1  ;;  %v5635_v1 = vld [vmem:[#allocation5 + $0x34] sm:$0xf0]  ;;  %v4285_v27 = vor.u32 %v5645_v16, %v4284_v12 }
  0x99   :  { %1895 = vmatpush.bf16.msra.mxu0 %v4277_v17  ;;  %1921 = vmatpush.bf16.msra.mxu2 %v4405_v25  ;;  %v4245_v48 = vor.u32 %v5635_v1, %v4244_v42  ;;  %v4453_v17 = vor.u32 %v5687_v15, %v4452_v14  ;;  %v5685_v25 = vld [vmem:[#allocation5 + $0x1c4] sm:$0xf0]  ;;  %v5719_v42 = vld [vmem:[#allocation5 + $0x2d4] sm:$0xf0]  ;;  %v6261_v1 = vld [vmem:[%s6410_s3] sm:$0xff] }
  0x9a   :  { %1074 = vmatmul.bf16.vlgmr.msrb.gmra.mxu1 %v6240_v4  ;;  %1100 = vmatmul.bf16.vlgmr.msrb.gmra.mxu3 %v6240_v4  ;;  %v4468_v4 = vld [vmem:[#allocation5 + $0x1f0] sm:$0xf]  ;;  %v235_v2 = vperm.slane %v6261_v1, 1  ;;  %v5713_v14 = vld [vmem:[#allocation5 + $0x2a4] sm:$0xf0] }
  0x9b   :  { %1908 = vmatpush.bf16.msra.mxu1 %v4341_v22  ;;  %v4469_v47 = vor.u32 %v5691_v46, %v4468_v4  ;;  %v4444_v22 = vld [vmem:[#allocation5 + $0x1c0] sm:$0xf]  ;;  %v4420_v15 = vld [vmem:[#allocation5 + $0x190] sm:$0xf]  ;;  %v5679_v16 = vld [vmem:[#allocation5 + $0x194] sm:$0xf0] }
  0x9c   :  { %v4445_v33 = vor.u32 %v5685_v25, %v4444_v22  ;;  %v4572_v46 = vld [vmem:[#allocation5 + $0x2c0] sm:$0xf]  ;;  %v4421_v18 = vor.u32 %v5679_v16, %v4420_v15  ;;  %v4660_v22 = vld [vmem:[#allocation5 + $0x370] sm:$0xf] }
  0x9d   :  { %1896 = vmatpush.bf16.msra.mxu0 %v4269_v26  ;;  %1922 = vmatpush.bf16.msra.mxu2 %v4397_v34  ;;  %v4533_v26 = vor.u32 %v5707_v9, %v4532_v8  ;;  %v4588_v34 = vld [vmem:[#allocation5 + $0x2e0] sm:$0xf]  ;;  %v4628_v16 = vld [vmem:[#allocation5 + $0x330] sm:$0xf] }
  0x9e   :  { %1934 = vmatpush.bf16.msra.mxu3 %v4469_v47  ;;  %v5717_v47 = vld [vmem:[#allocation5 + $0x2c4] sm:$0xf0]  ;;  %v4492_v9 = vld [vmem:[#allocation5 + $0x220] sm:$0xf] }
  0x9f   :  { %1909 = vmatpush.bf16.msra.mxu1 %v4333_v31  ;;  %v5705_v31 = vld [vmem:[#allocation5 + $0x264] sm:$0xf0]  ;;  %v4573_v57 = vor.u32 %v5717_v47, %v4572_v46  ;;  %v4493_v20 = vor.u32 %v5697_v10, %v4492_v9  ;;  %v4540_v47 = vld [vmem:[#allocation5 + $0x280] sm:$0xf]  ;;  %v5656_v10 = vld [vmem:[#allocation5 + $0xe4] sm:$0xf] }
  0xa0   :  { %v4525_v37 = vor.u32 %v5705_v31, %v4524_v30  ;;  %v5711_v30 = vld [vmem:[#allocation5 + $0x294] sm:$0xf0]  ;;  %v4412_v31 = vld [vmem:[#allocation5 + $0x180] sm:$0xf] }
  0xa1   :  { %1897 = vmatpush.bf16.msra.mxu0 %v4261_v35  ;;  %1923 = vmatpush.bf16.msra.mxu2 %v4389_v62  ;;  %v5721_v35 = vld [vmem:[#allocation5 + $0x2e4] sm:$0xf0] }
  0xa2   :  { %1935 = vmatpush.bf16.msra.mxu3 %v4461_v5  ;;  %v4589_v40 = vor.u32 %v5721_v35, %v4588_v34  ;;  %v5681_v62 = vld [vmem:[#allocation5 + $0x1a4] sm:$0xf0]  ;;  %v4348_v5 = vld [vmem:[#allocation5 + $0x100] sm:$0xf] }
  0xa3   :  { %1910 = vmatpush.bf16.msra.mxu1 %v4325_v38  ;;  %v4516_v38 = vld [vmem:[#allocation5 + $0x250] sm:$0xf]  ;;  %v4429_v63 = vor.u32 %v5681_v62, %v4428_v61  ;;  %v4349_v12 = vor.u32 %v5661_v6, %v4348_v5  ;;  %v4476_v35 = vld [vmem:[#allocation5 + $0x200] sm:$0xf]  ;;  %v5640_v61 = vld [vmem:[#allocation5 + $0x64] sm:$0xf] }
  0xa5   :  { %1898 = vmatpush.bf16.msra.mxu0 %v4253_v41  ;;  %1924 = vmatpush.bf16.msra.mxu2 %v4381_v13  ;;  %v4580_v41 = vld [vmem:[#allocation5 + $0x2d0] sm:$0xf]  ;;  %v4556_v13 = vld [vmem:[#allocation5 + $0x2a0] sm:$0xf] }
  0xa6   :  { %1936 = vmatpush.bf16.msra.mxu3 %v4453_v17  ;;  %v4581_v4 = vor.u32 %v5719_v42, %v4580_v41  ;;  %v5642_v41 = vld [vmem:[#allocation5 + $0x74] sm:$0xf]  ;;  %v4652_v42 = vld [vmem:[#allocation5 + $0x360] sm:$0xf] }
  0xa7   :  { %1911 = vmatpush.bf16.msra.mxu1 %v4317_v43  ;;  %v4517_v43 = vor.u32 %v5703_v39, %v4516_v38 }
  0xa9   :  { %1899 = vmatpush.bf16.msra.mxu0 %v4245_v48  ;;  %1925 = vmatpush.bf16.msra.mxu2 %v4373_v24  ;;  %v4436_v48 = vld [vmem:[#allocation5 + $0x1b0] sm:$0xf] }
  0xaa   :  { %1937 = vmatpush.bf16.msra.mxu3 %v4445_v33  ;;  %v4437_v50 = vor.u32 %v5683_v49, %v4436_v48  ;;  %v5709_v48 = vld [vmem:[#allocation5 + $0x284] sm:$0xf0] }
  0xab   :  { %1912 = vmatpush.bf16.msra.mxu1 %v4309_v51  ;;  %v234_v51 = vperm.slane %v6261_v1, 0  ;;  %v4541_v62 = vor.u32 %v5709_v48, %v4540_v47  ;;  %v5650_v48 = vld [vmem:[#allocation5 + $0xb4] sm:$0xf] }
  0xad   :  { %1900 = vmatpush.bf16.msra.mxu0 %v4237_v54  ;;  %1926 = vmatpush.bf16.msra.mxu2 %v4365_v36  ;;  %v5663_v54 = vld [vmem:[#allocation5 + $0x114] sm:$0xf0]  ;;  %v5693_v36 = vld [vmem:[#allocation5 + $0x204] sm:$0xf0] }
  0xae   :  { %1938 = vmatpush.bf16.msra.mxu3 %v4437_v50  ;;  %v4724_v50 = vld [vmem:[#allocation5 + $0x3f0] sm:$0xf] }
  0xaf   :  { %1913 = vmatpush.bf16.msra.mxu1 %v4301_v58  ;;  %v4357_v58 = vor.u32 %v5663_v54, %v4356_v53  ;;  %v5658_v53 = vld [vmem:[#allocation5 + $0xf4] sm:$0xf]  ;;  %v4342_v54 = vld [vmem:[#allocation5 + $0xf8] sm:$0xf0] }
  0xb0   :  { %v4345_v5 = vor.u32 %v5658_v53, %v4342_v54  ;;  %v237_v53 = vperm.slane %v6261_v1, 3 }
  0xb1   :  { %1901 = vmatpush.bf16.msra.mxu0 %v4229_v7  ;;  %1927 = vmatpush.bf16.msra.mxu2 %v4357_v58  ;;  %v4477_v58 = vor.u32 %v5693_v36, %v4476_v35  ;;  %v4318_v35 = vld [vmem:[#allocation5 + $0xc8] sm:$0xf0]  ;;  %v4620_v36 = vld [vmem:[#allocation5 + $0x320] sm:$0xf] }
  0xb2   :  { %1939 = vmatpush.bf16.msra.mxu3 %v4429_v63 }
  0xb3   :  { %1914 = vmatpush.bf16.msra.mxu1 %v4293_v11  ;;  %v4565_v11 = vor.u32 %v5715_v60, %v4564_v59  ;;  %v5735_v59 = vld [vmem:[#allocation5 + $0x354] sm:$0xf0]  ;;  %v4281_v60 = vor.u32 %v5642_v41, %v4278_v45 }
  0xb4   :  { %v4645_v63 = vor.u32 %v5735_v59, %v4644_v55  ;;  %v5747_v45 = vld [vmem:[#allocation5 + $0x3b4] sm:$0xf0]  ;;  %v5632_v55 = vld [vmem:[#allocation5 + $0x24] sm:$0xf] }
  0xb5   :  { %1902 = vmatpush.bf16.msra.mxu0 %v4221_v23  ;;  %1928 = vmatpush.bf16.msra.mxu2 %v4349_v12  ;;  %v5739_v23 = vld [vmem:[#allocation5 + $0x374] sm:$0xf0] }
  0xb6   :  { %1940 = vmatpush.bf16.msra.mxu3 %v4421_v18  ;;  %v4661_v28 = vor.u32 %v5739_v23, %v4660_v22  ;;  %v5638_v18 = vld [vmem:[#allocation5 + $0x54] sm:$0xf]  ;;  %v4326_v23 = vld [vmem:[#allocation5 + $0xd8] sm:$0xf0] }
  0xb7   :  { %1915 = vmatpush.bf16.msra.mxu1 %v4285_v27  ;;  %v906_v0 = vpop.f32.mrf.mxu0  ;;  %v4557_v27 = vor.u32 %v5713_v14, %v4556_v13  ;;  %v4708_v13 = vld [vmem:[#allocation5 + $0x3d0] sm:$0xf]  ;;  %v5751_v14 = vld [vmem:[#allocation5 + $0x3d4] sm:$0xf0]  ;;  %v5654_v22 = vld [vmem:[#allocation5 + $0xd4] sm:$0xf] }
  0xb8   :  { %v907_v7 = vadd.f32 %v906_v0, %v234_v51  ;;  %v5755_v51 = vld [vmem:[#allocation5 + $0x3f4] sm:$0xf0]  ;;  %v4716_v0 = vld [vmem:[#allocation5 + $0x3e0] sm:$0xf] }
  0xb9   :  { %1947 = vmatpush.bf16.msrb.mxu0 %v4533_v26  ;;  %v919_v8 = vpop.f32.mrf.mxu1  ;;  %v5695_v26 = vld [vmem:[#allocation5 + $0x214] sm:$0xf0]  ;;  %1973 = vmatpush.bf16.msrb.mxu2 %v4661_v28  ;;  %v5636_v28 = vld [vmem:[#allocation5 + $0x44] sm:$0xf] }
  0xba   :  { %v920_v17 = vadd.f32 %v919_v8, %v907_v7  ;;  %v4636_v7 = vld [vmem:[#allocation5 + $0x340] sm:$0xf]  ;;  %v5733_v8 = vld [vmem:[#allocation5 + $0x344] sm:$0xf0] }
  0xbb   :  { %1960 = vmatpush.bf16.msrb.mxu1 %v4597_v32  ;;  %v5677_v32 = vld [vmem:[#allocation5 + $0x184] sm:$0xf0]  ;;  %v4637_v12 = vor.u32 %v5733_v8, %v4636_v7 }
  0xbc   :  { %v1105_v24 = vmax.f32 %v920_v17, 0.0  ;;  %v5731_v17 = vld [vmem:[#allocation5 + $0x334] sm:$0xf0] }
  0xbd   :  { %1948 = vmatpush.bf16.msrb.mxu0 %v4525_v37  ;;  %v932_v19 = vpop.f32.mrf.mxu2  ;;  %v4413_v37 = vor.u32 %v5677_v32, %v4412_v31  ;;  %v236_v32 = vperm.slane %v6261_v1, 2 }
  0xbe   :  { %v933_v25 = vadd.f32 %v932_v19, %v235_v2  ;;  %v6265_v33 = vpack.c.bf16 %v1105_v24, %v1105_v24  ;;  %v5753_v2 = vld [vmem:[#allocation5 + $0x3e4] sm:$0xf0]  ;;  %v4262_v19 = vld [vmem:[#allocation5 + $0x58] sm:$0xf0]  ;;  %v4629_v24 = vor.u32 %v5731_v17, %v4628_v16 }
  0xbf   :  { %1961 = vmatpush.bf16.msrb.mxu1 %v4589_v40  ;;  %v945_v34 = vpop.f32.mrf.mxu3  ;;  %v908_v38 = vpop.f32.mrf.mxu0  ;;  %v4485_v40 = vor.u32 %v5695_v26, %v4484_v21  ;;  %1941 = vmatpush.bf16.msra.mxu3 %v4413_v37  ;;  %v4717_v6 = vor.u32 %v5753_v2, %v4716_v0  ;;  %v4709_v21 = vor.u32 %v5751_v14, %v4708_v13  ;;  %v5749_v26 = vld [vmem:[#allocation5 + $0x3c4] sm:$0xf0]  ;;  %v5648_v0 = vld [vmem:[#allocation5 + $0xa4] sm:$0xf]  ;;  %v4302_v2 = vld [vmem:[#allocation5 + $0xa8] sm:$0xf0] }
  0xc0   :  { %v946_v39 = vadd.f32 %v945_v34, %v933_v25  ;;  %1903 = vmatmul.bf16.vlgmr.msra.gmra.mxu0 %v6265_v33  ;;  %v4700_v25 = vld [vmem:[#allocation5 + $0x3c0] sm:$0xf]  ;;  %v5652_v34 = vld [vmem:[#allocation5 + $0xc4] sm:$0xf]  ;;  %v5729_v37 = vld [vmem:[#allocation5 + $0x324] sm:$0xf0]  ;;  %v4305_v17 = vor.u32 %v5648_v0, %v4302_v2 }
  0xc1   :  { %1949 = vmatpush.bf16.msrb.mxu0 %v4517_v43  ;;  %v5737_v43 = vld [vmem:[#allocation5 + $0x364] sm:$0xf0]  ;;  %v921_v44 = vpop.f32.mrf.mxu1  ;;  %v4701_v31 = vor.u32 %v5749_v26, %v4700_v25  ;;  %v4230_v16 = vld [vmem:[#allocation5 + $0x18] sm:$0xf0]  ;;  %v4446_v0 = vld [vmem:[#allocation5 + $0x1c8] sm:$0xf0] }
  0xc2   :  { %v4653_v46 = vor.u32 %v5737_v43, %v4652_v42  ;;  %v1106_v49 = vmax.f32 %v946_v39, 0.0  ;;  %v5634_v39 = vld [vmem:[#allocation5 + $0x34] sm:$0xf]  ;;  %v4246_v42 = vld [vmem:[#allocation5 + $0x38] sm:$0xf0]  ;;  %v4321_v43 = vor.u32 %v5652_v34, %v4318_v35 }
  0xc3   :  { %1962 = vmatpush.bf16.msrb.mxu1 %v4581_v4  ;;  %v4549_v4 = vor.u32 %v5711_v30, %v4548_v29  ;;  %v4254_v29 = vld [vmem:[#allocation5 + $0x48] sm:$0xf0]  ;;  %v4329_v30 = vor.u32 %v5654_v22, %v4326_v23  ;;  %v4692_v44 = vld [vmem:[#allocation5 + $0x3b0] sm:$0xf]  ;;  %v4249_v54 = vor.u32 %v5634_v39, %v4246_v42  ;;  %v5646_v22 = vld [vmem:[#allocation5 + $0x94] sm:$0xf] }
  0xc4   :  { %1974 = vmatpush.bf16.msrb.mxu2 %v4653_v46  ;;  %v6268_v56 = vpack.c.bf16 %v1106_v49, %v1106_v49  ;;  %v4257_v38 = vor.u32 %v5636_v28, %v4254_v29  ;;  %v4693_v47 = vor.u32 %v5747_v45, %v4692_v44  ;;  %v4310_v49 = vld [vmem:[#allocation5 + $0xb8] sm:$0xf0]  ;;  %v5672_v28 = vld [vmem:[#allocation5 + $0x164] sm:$0xf]  ;;  %v4398_v29 = vld [vmem:[#allocation5 + $0x168] sm:$0xf0] }
  0xc5   :  { %1950 = vmatpush.bf16.msrb.mxu0 %v4509_v52  ;;  %v4725_v52 = vor.u32 %v5755_v51, %v4724_v50  ;;  %v4612_v50 = vld [vmem:[#allocation5 + $0x310] sm:$0xf]  ;;  %v5727_v51 = vld [vmem:[#allocation5 + $0x314] sm:$0xf0]  ;;  %v4313_v59 = vor.u32 %v5650_v48, %v4310_v49  ;;  %v4294_v23 = vld [vmem:[#allocation5 + $0x98] sm:$0xf0]  ;;  %v4401_v34 = vor.u32 %v5672_v28, %v4398_v29 }
  0xc6   :  { %1916 = vmatmul.bf16.vlgmr.msra.gmra.mxu1 %v6268_v56  ;;  %v4668_v35 = vld [vmem:[#allocation5 + $0x380] sm:$0xf]  ;;  %v4470_v42 = vld [vmem:[#allocation5 + $0x1f8] sm:$0xf0]  ;;  %v5704_v29 = vld [vmem:[#allocation5 + $0x264] sm:$0xf] }
  0xc7   :  { %1963 = vmatpush.bf16.msrb.mxu1 %v4573_v57  ;;  %v934_v57 = vpop.f32.mrf.mxu2  ;;  %1986 = vmatpush.bf16.msrb.mxu3 %v4725_v52  ;;  %v947_v9 = vpop.f32.mrf.mxu3 }
  0xc8   :  { %1975 = vmatpush.bf16.msrb.mxu2 %v4645_v63  ;;  %v4613_v57 = vor.u32 %v5727_v51, %v4612_v50  ;;  %v5688_v50 = vld [vmem:[#allocation5 + $0x1e4] sm:$0xf]  ;;  %v4462_v51 = vld [vmem:[#allocation5 + $0x1e8] sm:$0xf0] }
  0xc9   :  { %1951 = vmatpush.bf16.msrb.mxu0 %v4501_v3  ;;  %v4270_v3 = vld [vmem:[#allocation5 + $0x68] sm:$0xf0] }
  0xca   :  { %v4273_v15 = vor.u32 %v5640_v61, %v4270_v3  ;;  %v5745_v61 = vld [vmem:[#allocation5 + $0x3a4] sm:$0xf0]  ;;  %v4604_v3 = vld [vmem:[#allocation5 + $0x300] sm:$0xf] }
  0xcb   :  { %1964 = vmatpush.bf16.msrb.mxu1 %v4565_v11  ;;  %v4334_v11 = vld [vmem:[#allocation5 + $0xe8] sm:$0xf0]  ;;  %1987 = vmatpush.bf16.msrb.mxu3 %v4717_v6 }
  0xcc   :  { %1976 = vmatpush.bf16.msrb.mxu2 %v4637_v12 }
  0xcd   :  { %1952 = vmatpush.bf16.msrb.mxu0 %v4493_v20  ;;  %v4337_v20 = vor.u32 %v5656_v10, %v4334_v11  ;;  %v5674_v10 = vld [vmem:[#allocation5 + $0x174] sm:$0xf]  ;;  %v4406_v11 = vld [vmem:[#allocation5 + $0x178] sm:$0xf0] }
  0xcf   :  { %1965 = vmatpush.bf16.msrb.mxu1 %v4557_v27  ;;  %v4265_v27 = vor.u32 %v5638_v18, %v4262_v19  ;;  %1988 = vmatpush.bf16.msrb.mxu3 %v4709_v21  ;;  %v4409_v18 = vor.u32 %v5674_v10, %v4406_v11  ;;  %v4676_v19 = vld [vmem:[#allocation5 + $0x390] sm:$0xf]  ;;  %v5743_v21 = vld [vmem:[#allocation5 + $0x394] sm:$0xf0]  ;;  %v4438_v10 = vld [vmem:[#allocation5 + $0x1b8] sm:$0xf0] }
  0xd0   :  { %1977 = vmatpush.bf16.msrb.mxu2 %v4629_v24  ;;  %v4677_v25 = vor.u32 %v5743_v21, %v4676_v19  ;;  %v5680_v21 = vld [vmem:[#allocation5 + $0x1a4] sm:$0xf] }
  0xd1   :  { %1953 = vmatpush.bf16.msrb.mxu0 %v4485_v40  ;;  %v4621_v40 = vor.u32 %v5729_v37, %v4620_v36  ;;  %v5741_v36 = vld [vmem:[#allocation5 + $0x384] sm:$0xf0]  ;;  %v5644_v37 = vld [vmem:[#allocation5 + $0x84] sm:$0xf] }
  0xd3   :  { %1966 = vmatpush.bf16.msrb.mxu1 %v4549_v4  ;;  %1989 = vmatpush.bf16.msrb.mxu3 %v4701_v31  ;;  %v4222_v31 = vld [vmem:[#allocation5 + $0x8] sm:$0xf0] }
  0xd4   :  { %1978 = vmatpush.bf16.msrb.mxu2 %v4621_v40  ;;  %v4669_v40 = vor.u32 %v5741_v36, %v4668_v35  ;;  %v5678_v35 = vld [vmem:[#allocation5 + $0x194] sm:$0xf]  ;;  %v4422_v36 = vld [vmem:[#allocation5 + $0x198] sm:$0xf0] }
  0xd5   :  { %1954 = vmatpush.bf16.msrb.mxu0 %v4477_v58  ;;  %v958_v41 = vpop.f32.mrf.mxu0  ;;  %v4238_v58 = vld [vmem:[#allocation5 + $0x28] sm:$0xf0] }
  0xd6   :  { %v959_v4 = vadd.f32 %v958_v41, %v236_v32  ;;  %v4241_v8 = vor.u32 %v5632_v55, %v4238_v58  ;;  %v4297_v32 = vor.u32 %v5646_v22, %v4294_v23  ;;  %v5690_v41 = vld [vmem:[#allocation5 + $0x1f4] sm:$0xf]  ;;  %v4454_v58 = vld [vmem:[#allocation5 + $0x1d8] sm:$0xf0]  ;;  %v4430_v22 = vld [vmem:[#allocation5 + $0x1a8] sm:$0xf0] }
  0xd7   :  { %1967 = vmatpush.bf16.msrb.mxu1 %v4541_v62  ;;  %v971_v46 = vpop.f32.mrf.mxu1  ;;  %1990 = vmatpush.bf16.msrb.mxu3 %v4693_v47  ;;  %v4473_v45 = vor.u32 %v5690_v41, %v4470_v42  ;;  %v239_v23 = vperm.slane %v6261_v1, 5  ;;  %v4425_v41 = vor.u32 %v5678_v35, %v4422_v36 }
  0xd8   :  { %v972_v52 = vadd.f32 %v971_v46, %v959_v4  ;;  %1979 = vmatpush.bf16.msrb.mxu2 %v4613_v57  ;;  %v5670_v4 = vld [vmem:[#allocation5 + $0x154] sm:$0xf]  ;;  %v4390_v46 = vld [vmem:[#allocation5 + $0x158] sm:$0xf0] }
  0xd9   :  { %1999 = vmatpush.bf16.msra.mxu0 %v4281_v60  ;;  %v4684_v60 = vld [vmem:[#allocation5 + $0x3a0] sm:$0xf]  ;;  %v4393_v49 = vor.u32 %v5670_v4, %v4390_v46  ;;  %v5686_v57 = vld [vmem:[#allocation5 + $0x1d4] sm:$0xf]  ;;  %v4598_v4 = vld [vmem:[#allocation5 + $0x2f8] sm:$0xf0] }
  0xda   :  { %v1107_v62 = vmax.f32 %v972_v52, 0.0  ;;  %v4685_v63 = vor.u32 %v5745_v61, %v4684_v60  ;;  %v4465_v52 = vor.u32 %v5688_v50, %v4462_v51  ;;  %v5666_v60 = vld [vmem:[#allocation5 + $0x134] sm:$0xf]  ;;  %v4374_v61 = vld [vmem:[#allocation5 + $0x138] sm:$0xf0] }
  0xdb   :  { %2012 = vmatpush.bf16.msra.mxu1 %v4345_v5  ;;  %v5725_v5 = vld [vmem:[#allocation5 + $0x304] sm:$0xf0]  ;;  %v984_v7 = vpop.f32.mrf.mxu2  ;;  %v5702_v46 = vld [vmem:[#allocation5 + $0x254] sm:$0xf] }
  0xdc   :  { %v6273_v6 = vpack.c.bf16 %v1107_v62, %v1107_v62  ;;  %v4605_v9 = vor.u32 %v5725_v5, %v4604_v3  ;;  %v985_v12 = vadd.f32 %v984_v7, %v237_v53  ;;  %1991 = vmatpush.bf16.msrb.mxu3 %v4685_v63  ;;  %v5668_v53 = vld [vmem:[#allocation5 + $0x144] sm:$0xf]  ;;  %v4377_v62 = vor.u32 %v5666_v60, %v4374_v61  ;;  %v4366_v7 = vld [vmem:[#allocation5 + $0x128] sm:$0xf0] }
  0xdd   :  { %2000 = vmatpush.bf16.msra.mxu0 %v4273_v15  ;;  %v997_v13 = vpop.f32.mrf.mxu3  ;;  %v960_v14 = vpop.f32.mrf.mxu0  ;;  %v5630_v15 = vld [vmem:[#allocation5 + $0x14] sm:$0xf]  ;;  %v5684_v63 = vld [vmem:[#allocation5 + $0x1c4] sm:$0xf]  ;;  %v238_v3 = vperm.slane %v6261_v1, 4 }
  0xde   :  { %1929 = vmatmul.bf16.vlgmr.msra.gmra.mxu2 %v6273_v6  ;;  %v998_v24 = vadd.f32 %v997_v13, %v985_v12  ;;  %v4233_v26 = vor.u32 %v5630_v15, %v4230_v16  ;;  %v4449_v2 = vor.u32 %v5684_v63, %v4446_v0  ;;  %v5664_v5 = vld [vmem:[#allocation5 + $0x124] sm:$0xf]  ;;  %v5662_v15 = vld [vmem:[#allocation5 + $0x114] sm:$0xf]  ;;  %v4358_v16 = vld [vmem:[#allocation5 + $0x118] sm:$0xf0] }
  0xdf   :  { %2013 = vmatpush.bf16.msra.mxu1 %v4337_v20  ;;  %v973_v20 = vpop.f32.mrf.mxu1  ;;  %1980 = vmatpush.bf16.msrb.mxu2 %v4605_v9  ;;  %v5682_v9 = vld [vmem:[#allocation5 + $0x1b4] sm:$0xf]  ;;  %v4510_v60 = vld [vmem:[#allocation5 + $0x248] sm:$0xf0] }
  0xe0   :  { %1992 = vmatpush.bf16.msrb.mxu3 %v4677_v25  ;;  %v4441_v12 = vor.u32 %v5682_v9, %v4438_v10  ;;  %v4534_v20 = vld [vmem:[#allocation5 + $0x278] sm:$0xf0]  ;;  %v5718_v0 = vld [vmem:[#allocation5 + $0x2d4] sm:$0xf]  ;;  %v5716_v9 = vld [vmem:[#allocation5 + $0x2c4] sm:$0xf] }
  0xe1   :  { %2001 = vmatpush.bf16.msra.mxu0 %v4265_v27  ;;  %v5628_v27 = vld [vmem:[#allocation5 + $0x4] sm:$0xf]  ;;  %v4574_v10 = vld [vmem:[#allocation5 + $0x2c8] sm:$0xf0] }
  0xe2   :  { %v4225_v44 = vor.u32 %v5628_v27, %v4222_v31  ;;  %v4350_v27 = vld [vmem:[#allocation5 + $0x108] sm:$0xf0] }
  0xe3   :  { %2014 = vmatpush.bf16.msra.mxu1 %v4329_v30  ;;  %2025 = vmatpush.bf16.msra.mxu2 %v4409_v18  ;;  %v1108_v30 = vmax.f32 %v998_v24, 0.0  ;;  %v4361_v18 = vor.u32 %v5662_v15, %v4358_v16  ;;  %v4433_v24 = vor.u32 %v5680_v21, %v4430_v22  ;;  %v5714_v16 = vld [vmem:[#allocation5 + $0x2b4] sm:$0xf] }
  0xe4   :  { %1993 = vmatpush.bf16.msrb.mxu3 %v4669_v40 }
  0xe5   :  { %2002 = vmatpush.bf16.msra.mxu0 %v4257_v38  ;;  %v4286_v38 = vld [vmem:[#allocation5 + $0x88] sm:$0xf0]  ;;  %v6276_v39 = vpack.c.bf16 %v1108_v30, %v1108_v30  ;;  %v999_v47 = vpop.f32.mrf.mxu3 }
  0xe6   :  { %v4289_v48 = vor.u32 %v5644_v37, %v4286_v38  ;;  %v4518_v47 = vld [vmem:[#allocation5 + $0x258] sm:$0xf0] }
  0xe7   :  { %2015 = vmatpush.bf16.msra.mxu1 %v4321_v43  ;;  %v986_v43 = vpop.f32.mrf.mxu2  ;;  %2026 = vmatpush.bf16.msra.mxu2 %v4401_v34  ;;  %v4526_v34 = vld [vmem:[#allocation5 + $0x268] sm:$0xf0] }
  0xe8   :  { %1942 = vmatmul.bf16.vlgmr.msra.gmra.mxu3 %v6276_v39 }
  0xe9   :  { %2003 = vmatpush.bf16.msra.mxu0 %v4249_v54  ;;  %2038 = vmatpush.bf16.msra.mxu3 %v4473_v45  ;;  %v4382_v54 = vld [vmem:[#allocation5 + $0x148] sm:$0xf0]  ;;  %v5722_v45 = vld [vmem:[#allocation5 + $0x2f4] sm:$0xf] }
  0xea   :  { %v4385_v55 = vor.u32 %v5668_v53, %v4382_v54  ;;  %v4521_v54 = vor.u32 %v5702_v46, %v4518_v47 }
  0xeb   :  { %2016 = vmatpush.bf16.msra.mxu1 %v4313_v59  ;;  %2027 = vmatpush.bf16.msra.mxu2 %v4393_v49  ;;  %v4457_v59 = vor.u32 %v5686_v57, %v4454_v58  ;;  %v4414_v49 = vld [vmem:[#allocation5 + $0x188] sm:$0xf0] }
  0xec   :  { %v4590_v57 = vld [vmem:[#allocation5 + $0x2e8] sm:$0xf0] }
  0xed   :  { %2004 = vmatpush.bf16.msra.mxu0 %v4241_v8  ;;  %2039 = vmatpush.bf16.msra.mxu3 %v4465_v52  ;;  %v4369_v8 = vor.u32 %v5664_v5, %v4366_v7  ;;  %v4601_v52 = vor.u32 %v5722_v45, %v4598_v4  ;;  %v4502_v5 = vld [vmem:[#allocation5 + $0x238] sm:$0xf0] }
  0xef   :  { %2017 = vmatpush.bf16.msra.mxu1 %v4305_v17  ;;  %2028 = vmatpush.bf16.msra.mxu2 %v4385_v55  ;;  %v5706_v17 = vld [vmem:[#allocation5 + $0x274] sm:$0xf]  ;;  %v5720_v55 = vld [vmem:[#allocation5 + $0x2e4] sm:$0xf] }
  0xf0   :  { %v4537_v28 = vor.u32 %v5706_v17, %v4534_v20  ;;  %v4566_v17 = vld [vmem:[#allocation5 + $0x2b8] sm:$0xf0] }
  0xf1   :  { %2005 = vmatpush.bf16.msra.mxu0 %v4233_v26  ;;  %2040 = vmatpush.bf16.msra.mxu3 %v4457_v59  ;;  %v5660_v26 = vld [vmem:[#allocation5 + $0x104] sm:$0xf]  ;;  %v4569_v21 = vor.u32 %v5714_v16, %v4566_v17  ;;  %v4622_v17 = vld [vmem:[#allocation5 + $0x328] sm:$0xf0] }
  0xf2   :  { %v4353_v30 = vor.u32 %v5660_v26, %v4350_v27  ;;  %v5700_v59 = vld [vmem:[#allocation5 + $0x244] sm:$0xf]  ;;  %v4558_v26 = vld [vmem:[#allocation5 + $0x2a8] sm:$0xf0] }
  0xf3   :  { %2018 = vmatpush.bf16.msra.mxu1 %v4297_v32  ;;  %2029 = vmatpush.bf16.msra.mxu2 %v4377_v62  ;;  %v4593_v62 = vor.u32 %v5720_v55, %v4590_v57  ;;  %v4513_v63 = vor.u32 %v5700_v59, %v4510_v60  ;;  %v5692_v27 = vld [vmem:[#allocation5 + $0x204] sm:$0xf]  ;;  %v4646_v55 = vld [vmem:[#allocation5 + $0x358] sm:$0xf0] }
  0xf4   :  { %v5728_v16 = vld [vmem:[#allocation5 + $0x324] sm:$0xf] }
  0xf5   :  { %2006 = vmatpush.bf16.msra.mxu0 %v4225_v44  ;;  %v1010_v11 = vpop.f32.mrf.mxu0  ;;  %2041 = vmatpush.bf16.msra.mxu3 %v4449_v2  ;;  %v4529_v44 = vor.u32 %v5704_v29, %v4526_v34  ;;  %v4582_v2 = vld [vmem:[#allocation5 + $0x2d8] sm:$0xf0]  ;;  %v5738_v29 = vld [vmem:[#allocation5 + $0x374] sm:$0xf] }
  0xf6   :  { %v1011_v13 = vadd.f32 %v1010_v11, %v238_v3  ;;  %v5698_v3 = vld [vmem:[#allocation5 + $0x234] sm:$0xf]  ;;  %v4585_v7 = vor.u32 %v5718_v0, %v4582_v2  ;;  %v5696_v11 = vld [vmem:[#allocation5 + $0x224] sm:$0xf] }
  0xf7   :  { %2019 = vmatpush.bf16.msra.mxu1 %v4289_v48  ;;  %v1023_v14 = vpop.f32.mrf.mxu1  ;;  %2030 = vmatpush.bf16.msra.mxu2 %v4369_v8  ;;  %v5676_v48 = vld [vmem:[#allocation5 + $0x184] sm:$0xf]  ;;  %v4505_v8 = vor.u32 %v5698_v3, %v4502_v5  ;;  %v4638_v3 = vld [vmem:[#allocation5 + $0x348] sm:$0xf0] }
  0xf8   :  { %v1024_v19 = vadd.f32 %v1023_v14, %v1011_v13  ;;  %v4417_v51 = vor.u32 %v5676_v48, %v4414_v49  ;;  %v4577_v13 = vor.u32 %v5716_v9, %v4574_v10  ;;  %v240_v14 = vperm.slane %v6261_v1, 6  ;;  %v4542_v48 = vld [vmem:[#allocation5 + $0x288] sm:$0xf0]  ;;  %v5732_v2 = vld [vmem:[#allocation5 + $0x344] sm:$0xf] }
  0xf9   :  { %2042 = vmatpush.bf16.msra.mxu3 %v4441_v12  ;;  %v4494_v12 = vld [vmem:[#allocation5 + $0x228] sm:$0xf0]  ;;  %v5750_v9 = vld [vmem:[#allocation5 + $0x3d4] sm:$0xf]  ;;  %v4710_v10 = vld [vmem:[#allocation5 + $0x3d8] sm:$0xf0] }
  0xfa   :  { %v1109_v25 = vmax.f32 %v1024_v19, 0.0  ;;  %v4497_v15 = vor.u32 %v5696_v11, %v4494_v12  ;;  %v4486_v19 = vld [vmem:[#allocation5 + $0x218] sm:$0xf0]  ;;  %v4713_v12 = vor.u32 %v5750_v9, %v4710_v10  ;;  %v4932_v9 = vld [vmem:[#allocation7 + $0x188] sm:$0xf] }
  0xfb   :  { %2031 = vmatpush.bf16.msra.mxu2 %v4361_v18  ;;  %v1036_v32 = vpop.f32.mrf.mxu2  ;;  %v5694_v18 = vld [vmem:[#allocation5 + $0x214] sm:$0xf]  ;;  %v4630_v11 = vld [vmem:[#allocation5 + $0x338] sm:$0xf0]  ;;  %v5809_v10 = vld [vmem:[#allocation7 + $0x1a4] sm:$0xf0] }
  0xfc   :  { %v6281_v31 = vpack.c.bf16 %v1109_v25, %v1109_v25  ;;  %v1037_v37 = vadd.f32 %v1036_v32, %v239_v23  ;;  %v5712_v25 = vld [vmem:[#allocation5 + $0x2a4] sm:$0xf]  ;;  %v241_v32 = vperm.slane %v6261_v1, 7 }
  0xfd   :  { %v1049_v38 = vpop.f32.mrf.mxu3  ;;  %v1012_v40 = vpop.f32.mrf.mxu0  ;;  %2043 = vmatpush.bf16.msra.mxu3 %v4433_v24  ;;  %v4489_v24 = vor.u32 %v5694_v18, %v4486_v19  ;;  %v4561_v34 = vor.u32 %v5712_v25, %v4558_v26  ;;  %v5708_v1 = vld [vmem:[#allocation5 + $0x284] sm:$0xf]  ;;  %v4625_v19 = vor.u32 %v5728_v16, %v4622_v17  ;;  %v4686_v26 = vld [vmem:[#allocation5 + $0x3a8] sm:$0xf0]  ;;  %v4892_v17 = vld [vmem:[#allocation7 + $0x140] sm:$0xf] }
  0xfe   :  { %1955 = vmatmul.bf16.vlgmr.msrb.gmra.mxu0 %v6281_v31  ;;  %v1050_v43 = vadd.f32 %v1049_v38, %v1037_v37  ;;  %v5710_v37 = vld [vmem:[#allocation5 + $0x294] sm:$0xf]  ;;  %v4550_v38 = vld [vmem:[#allocation5 + $0x298] sm:$0xf0]  ;;  %v5744_v25 = vld [vmem:[#allocation5 + $0x3a4] sm:$0xf] }
  0xff   :  { %v1025_v42 = vpop.f32.mrf.mxu1  ;;  %2032 = vmatpush.bf16.msra.mxu2 %v4353_v30  ;;  %2051 = vmatpush.bf16.msrb.mxu0 %v4537_v28  ;;  %v4662_v30 = vld [vmem:[#allocation5 + $0x378] sm:$0xf0]  ;;  %v4553_v46 = vor.u32 %v5710_v37, %v4550_v38  ;;  %v6302_v37 = vld [vmem:[%s6412_s5] sm:$0x3] }
 0x100   :  { %v1110_v50 = vmax.f32 %v1050_v43, 0.0  ;;  %v4665_v40 = vor.u32 %v5738_v29, %v4662_v30  ;;  %v5736_v43 = vld [vmem:[#allocation5 + $0x364] sm:$0xf]  ;;  %v5742_v29 = vld [vmem:[#allocation5 + $0x394] sm:$0xf] }
 0x101   :  { %2044 = vmatpush.bf16.msra.mxu3 %v4425_v41  ;;  %v4678_v30 = vld [vmem:[#allocation5 + $0x398] sm:$0xf0] }
 0x102   :  { %v6284_v53 = vpack.c.bf16 %v1110_v50, %v1110_v50 }
 0x103   :  { %2052 = vmatpush.bf16.msrb.mxu0 %v4529_v44  ;;  %v1038_v58 = vpop.f32.mrf.mxu2  ;;  %v4654_v44 = vld [vmem:[#allocation5 + $0x368] sm:$0xf0] }
 0x104   :  { %1968 = vmatmul.bf16.vlgmr.msrb.gmra.mxu1 %v6284_v53  ;;  %v4657_v50 = vor.u32 %v5736_v43, %v4654_v44  ;;  %v4545_v58 = vor.u32 %v5708_v1, %v4542_v48 }
 0x105   :  { %v1051_v61 = vpop.f32.mrf.mxu3  ;;  %2045 = vmatpush.bf16.msra.mxu3 %v4417_v51  ;;  %2064 = vmatpush.bf16.msrb.mxu1 %v4601_v52  ;;  %v5754_v51 = vld [vmem:[#allocation5 + $0x3f4] sm:$0xf]  ;;  %v4726_v52 = vld [vmem:[#allocation5 + $0x3f8] sm:$0xf0] }
 0x106   :  { %v4729_v59 = vor.u32 %v5754_v51, %v4726_v52  ;;  %v4956_v51 = vld [vmem:[#allocation7 + $0x1c0] sm:$0xf] }
 0x107   :  { %2053 = vmatpush.bf16.msrb.mxu0 %v4521_v54  ;;  %v5734_v54 = vld [vmem:[#allocation5 + $0x354] sm:$0xf]  ;;  %v5816_v52 = vld [vmem:[#allocation7 + $0x1dc] sm:$0xf0] }
 0x108   :  { %v4649_v61 = vor.u32 %v5734_v54, %v4646_v55  ;;  %v5812_v54 = vld [vmem:[#allocation7 + $0x1c4] sm:$0xf]  ;;  %v4957_v55 = vor.u32 %v5816_v52, %v4956_v51  ;;  %v4836_v52 = vld [vmem:[#allocation7 + $0xc8] sm:$0xf] }
 0x109   :  { %2065 = vmatpush.bf16.msrb.mxu1 %v4593_v62  ;;  %v5752_v62 = vld [vmem:[#allocation5 + $0x3e4] sm:$0xf] }
 0x10a   :  { %v4830_v51 = vld [vmem:[#allocation7 + $0xe0] sm:$0xf0] }
 0x10b   :  { %2054 = vmatpush.bf16.msrb.mxu0 %v4513_v63  ;;  %v4718_v63 = vld [vmem:[#allocation5 + $0x3e8] sm:$0xf0] }
 0x10d   :  { %2066 = vmatpush.bf16.msrb.mxu1 %v4585_v7  ;;  %v4721_v7 = vor.u32 %v5752_v62, %v4718_v63  ;;  %v5813_v62 = vld [vmem:[#allocation7 + $0x1cc] sm:$0xf] }
 0x10e   :  { %2007 = vmatmul.bf16.vlgmr.msra.gmra.mxu0 %v6265_v33  ;;  %v4478_v33 = vld [vmem:[#allocation5 + $0x208] sm:$0xf0] }
 0x10f   :  { %2055 = vmatpush.bf16.msrb.mxu0 %v4505_v8  ;;  %v4481_v36 = vor.u32 %v5692_v27, %v4478_v33  ;;  %v4641_v8 = vor.u32 %v5732_v2, %v4638_v3  ;;  %v5724_v27 = vld [vmem:[#allocation5 + $0x304] sm:$0xf]  ;;  %v4606_v33 = vld [vmem:[#allocation5 + $0x308] sm:$0xf0]  ;;  %v4924_v2 = vld [vmem:[#allocation7 + $0x180] sm:$0xf] }
 0x110   :  { %v4966_v63 = vld [vmem:[#allocation7 + $0x1e8] sm:$0xf0]  ;;  %v5808_v3 = vld [vmem:[#allocation7 + $0x19c] sm:$0xf0] }
 0x111   :  { %2067 = vmatpush.bf16.msrb.mxu1 %v4577_v13 }
 0x113   :  { %2056 = vmatpush.bf16.msrb.mxu0 %v4497_v15  ;;  %v4702_v15 = vld [vmem:[#allocation5 + $0x3c8] sm:$0xf0] }
 0x114   :  { %2020 = vmatmul.bf16.vlgmr.msra.gmra.mxu1 %v6268_v56 }
 0x115   :  { %v1062_v20 = vpop.f32.mrf.mxu0  ;;  %2068 = vmatpush.bf16.msrb.mxu1 %v4569_v21  ;;  %v4694_v21 = vld [vmem:[#allocation5 + $0x3b8] sm:$0xf0] }
 0x116   :  { %v1063_v22 = vadd.f32 %v1062_v20, %v240_v14  ;;  %v5748_v14 = vld [vmem:[#allocation5 + $0x3c4] sm:$0xf]  ;;  %v5746_v20 = vld [vmem:[#allocation5 + $0x3b4] sm:$0xf] }
 0x117   :  { %v1075_v23 = vpop.f32.mrf.mxu1  ;;  %2057 = vmatpush.bf16.msrb.mxu0 %v4489_v24  ;;  %v4705_v18 = vor.u32 %v5748_v14, %v4702_v15 }
 0x118   :  { %v1076_v28 = vadd.f32 %v1075_v23, %v1063_v22  ;;  %v5726_v22 = vld [vmem:[#allocation5 + $0x314] sm:$0xf]  ;;  %v4697_v23 = vor.u32 %v5746_v20, %v4694_v21  ;;  %v4894_v21 = vld [vmem:[#allocation7 + $0x160] sm:$0xf0] }
 0x119   :  { %2069 = vmatpush.bf16.msrb.mxu1 %v4561_v34  ;;  %v5740_v34 = vld [vmem:[#allocation5 + $0x384] sm:$0xf] }
 0x11a   :  { %v1111_v35 = vmax.f32 %v1076_v28, 0.0  ;;  %v4689_v28 = vor.u32 %v5744_v25, %v4686_v26  ;;  %v5797_v25 = vld [vmem:[#allocation7 + $0x14c] sm:$0xf] }
 0x11b   :  { %v1088_v42 = vpop.f32.mrf.mxu2  ;;  %2058 = vmatpush.bf16.msrb.mxu0 %v4481_v36  ;;  %v4902_v26 = vld [vmem:[#allocation7 + $0x168] sm:$0xf0] }
 0x11c   :  { %v6291_v41 = vpack.c.bf16 %v1111_v35, %v1111_v35  ;;  %v1089_v45 = vadd.f32 %v1088_v42, %v241_v32  ;;  %v4681_v32 = vor.u32 %v5742_v29, %v4678_v30  ;;  %v4670_v35 = vld [vmem:[#allocation5 + $0x388] sm:$0xf0]  ;;  %v4862_v30 = vld [vmem:[#allocation7 + $0x120] sm:$0xf0] }
 0x11d   :  { %v1101_v4 = vpop.f32.mrf.mxu3  ;;  %v1064_v56 = vpop.f32.mrf.mxu0  ;;  %2070 = vmatpush.bf16.msrb.mxu1 %v4553_v46  ;;  %v4673_v36 = vor.u32 %v5740_v34, %v4670_v35  ;;  %v5793_v34 = vld [vmem:[#allocation7 + $0x124] sm:$0xf0] }
 0x11e   :  { %1981 = vmatmul.bf16.vlgmr.msrb.gmra.mxu2 %v6291_v41  ;;  %v1102_v49 = vadd.f32 %v1101_v4, %v1089_v45  ;;  %2059 = vmatmul.bf16.vlgmr.msrb.gmra.mxu0 %v6281_v31  ;;  %v5730_v31 = vld [vmem:[#allocation5 + $0x334] sm:$0xf] }
 0x11f   :  { %v1077_v47 = vpop.f32.mrf.mxu1  ;;  %2077 = vmatpush.bf16.msrb.mxu2 %v4665_v40  ;;  %v4633_v13 = vor.u32 %v5730_v31, %v4630_v11  ;;  %2514 = vmatpush.bf16.msra.mxu0 %v4957_v55  ;;  %v4933_v11 = vor.u32 %v5809_v10, %v4932_v9  ;;  %v5773_v10 = vld [vmem:[#allocation7 + $0x8c] sm:$0xf] }
 0x120   :  { %v1112_v57 = vmax.f32 %v1102_v49, 0.0 }
 0x121   :  { %2071 = vmatpush.bf16.msrb.mxu1 %v4545_v58  ;;  %v4964_v58 = vld [vmem:[#allocation7 + $0x1c8] sm:$0xf] }
 0x122   :  { %v1120_v60 = vpack.c.bf16 %v1112_v57, %v1112_v57  ;;  %v4958_v57 = vld [vmem:[#allocation7 + $0x1e0] sm:$0xf0] }
 0x123   :  { %2078 = vmatpush.bf16.msrb.mxu2 %v4657_v50  ;;  %v1090_v0 = vpop.f32.mrf.mxu2 }
 0x124   :  { %1994 = vmatmul.bf16.vlgmr.msrb.gmra.mxu3 %v1120_v60  ;;  %2072 = vmatmul.bf16.vlgmr.msrb.gmra.mxu1 %v6284_v53  ;;  %v4614_v53 = vld [vmem:[#allocation5 + $0x318] sm:$0xf0]  ;;  %v4969_v0 = vor.u32 %v5813_v62, %v4966_v63  ;;  %v4796_v63 = vld [vmem:[#allocation7 + $0x80] sm:$0xf] }
 0x125   :  { %v1103_v5 = vpop.f32.mrf.mxu3  ;;  %2090 = vmatpush.bf16.msrb.mxu3 %v4729_v59  ;;  %v4617_v24 = vor.u32 %v5726_v22, %v4614_v53  ;;  %v5817_v59 = vld [vmem:[#allocation7 + $0x1e4] sm:$0xf0] }
 0x126   :  { %v5804_v5 = vld [vmem:[#allocation7 + $0x184] sm:$0xf]  ;;  %v4900_v22 = vld [vmem:[#allocation7 + $0x148] sm:$0xf] }
 0x127   :  { %2079 = vmatpush.bf16.msrb.mxu2 %v4649_v61  ;;  %v4965_v61 = vor.u32 %v5817_v59, %v4964_v58  ;;  %v5801_v53 = vld [vmem:[#allocation7 + $0x164] sm:$0xf0]  ;;  %v5781_v58 = vld [vmem:[#allocation7 + $0xcc] sm:$0xf] }
 0x128   :  { %v4838_v59 = vld [vmem:[#allocation7 + $0xe8] sm:$0xf0] }
 0x129   :  { %2091 = vmatpush.bf16.msrb.mxu3 %v4721_v7  ;;  %v4925_v7 = vor.u32 %v5808_v3, %v4924_v2  ;;  %v4841_v62 = vor.u32 %v5781_v58, %v4838_v59  ;;  %v5772_v2 = vld [vmem:[#allocation7 + $0x84] sm:$0xf]  ;;  %v4982_v58 = vld [vmem:[#allocation7 + $0x1f8] sm:$0xf0]  ;;  %v4940_v59 = vld [vmem:[#allocation7 + $0x190] sm:$0xf] }
 0x12a   :  { %v4798_v3 = vld [vmem:[#allocation7 + $0xa0] sm:$0xf0] }
 0x12b   :  { %2080 = vmatpush.bf16.msrb.mxu2 %v4641_v8  ;;  %v4926_v8 = vld [vmem:[#allocation7 + $0x1a0] sm:$0xf0]  ;;  %2515 = vmatpush.bf16.msra.mxu0 %v4925_v7  ;;  %v5777_v7 = vld [vmem:[#allocation7 + $0xa4] sm:$0xf0] }
 0x12c   :  { %v4929_v31 = vor.u32 %v5804_v5, %v4926_v8  ;;  %v4804_v5 = vld [vmem:[#allocation7 + $0x88] sm:$0xf]  ;;  %v4801_v8 = vor.u32 %v5772_v2, %v4798_v3  ;;  %v4948_v3 = vld [vmem:[#allocation7 + $0x198] sm:$0xf] }
 0x12d   :  { %2092 = vmatpush.bf16.msrb.mxu3 %v4713_v12  ;;  %v5805_v12 = vld [vmem:[#allocation7 + $0x18c] sm:$0xf]  ;;  %v4805_v9 = vor.u32 %v5777_v7, %v4804_v5  ;;  %v5811_v5 = vld [vmem:[#allocation7 + $0x1b4] sm:$0xf0]  ;;  %v5807_v7 = vld [vmem:[#allocation7 + $0x19c] sm:$0xf] }
 0x12e   :  { %2033 = vmatmul.bf16.vlgmr.msra.gmra.mxu2 %v6273_v6  ;;  %v4609_v6 = vor.u32 %v5724_v27, %v4606_v33  ;;  %v4905_v27 = vor.u32 %v5797_v25, %v4902_v26  ;;  %v4860_v33 = vld [vmem:[#allocation7 + $0x100] sm:$0xf] }
 0x12f   :  { %2081 = vmatpush.bf16.msrb.mxu2 %v4633_v13  ;;  %v4934_v13 = vld [vmem:[#allocation7 + $0x1a8] sm:$0xf0] }
 0x130   :  { %v4937_v15 = vor.u32 %v5805_v12, %v4934_v13 }
 0x131   :  { %2093 = vmatpush.bf16.msrb.mxu3 %v4705_v18  ;;  %v5800_v18 = vld [vmem:[#allocation7 + $0x15c] sm:$0xf0] }
 0x132   :  { %v4893_v20 = vor.u32 %v5800_v18, %v4892_v17 }
 0x133   :  { %2082 = vmatpush.bf16.msrb.mxu2 %v4625_v19  ;;  %v5796_v19 = vld [vmem:[#allocation7 + $0x144] sm:$0xf] }
 0x134   :  { %2046 = vmatmul.bf16.vlgmr.msra.gmra.mxu3 %v6276_v39  ;;  %v1251_v39 = vperm.slane %v6302_v37, 0  ;;  %2516 = vmatpush.bf16.msra.mxu0 %v4893_v20  ;;  %v4772_v20 = vld [vmem:[#allocation7 + $0x48] sm:$0xf] }
 0x135   :  { %2094 = vmatpush.bf16.msrb.mxu3 %v4697_v23  ;;  %v4897_v23 = vor.u32 %v5796_v19, %v4894_v21  ;;  %v4766_v19 = vld [vmem:[#allocation7 + $0x60] sm:$0xf0]  ;;  %v5769_v21 = vld [vmem:[#allocation7 + $0x64] sm:$0xf0] }
 0x137   :  { %2083 = vmatpush.bf16.msrb.mxu2 %v4617_v24  ;;  %v4901_v24 = vor.u32 %v5801_v53, %v4900_v22 }
 0x139   :  { %2095 = vmatpush.bf16.msrb.mxu3 %v4689_v28  ;;  %v5792_v28 = vld [vmem:[#allocation7 + $0x11c] sm:$0xf0] }
 0x13a   :  { %v4861_v29 = vor.u32 %v5792_v28, %v4860_v33  ;;  %v4732_v33 = vld [vmem:[#allocation7] sm:$0xf] }
 0x13b   :  { %2084 = vmatpush.bf16.msrb.mxu2 %v4609_v6  ;;  %v5788_v6 = vld [vmem:[#allocation7 + $0x104] sm:$0xf]  ;;  %v5760_v28 = vld [vmem:[#allocation7 + $0x1c] sm:$0xf0] }
 0x13c   :  { %v4865_v35 = vor.u32 %v5788_v6, %v4862_v30  ;;  %2517 = vmatpush.bf16.msra.mxu0 %v4861_v29  ;;  %v5756_v6 = vld [vmem:[#allocation7 + $0x4] sm:$0xf]  ;;  %v4733_v29 = vor.u32 %v5760_v28, %v4732_v33  ;;  %v4884_v33 = vld [vmem:[#allocation7 + $0x118] sm:$0xf] }
 0x13d   :  { %2096 = vmatpush.bf16.msrb.mxu3 %v4681_v32  ;;  %v1904_v38 = vpop.f32.mrf.mxu0  ;;  %v4868_v32 = vld [vmem:[#allocation7 + $0x108] sm:$0xf]  ;;  %v4734_v30 = vld [vmem:[#allocation7 + $0x20] sm:$0xf0]  ;;  %v5795_v28 = vld [vmem:[#allocation7 + $0x134] sm:$0xf0] }
 0x13e   :  { %2085 = vmatmul.bf16.vlgmr.msrb.gmra.mxu2 %v6291_v41  ;;  %v1905_v40 = vadd.f32 %v1904_v38, %v1251_v39  ;;  %v5789_v39 = vld [vmem:[#allocation7 + $0x10c] sm:$0xf] }
 0x13f   :  { %2540 = vmatpush.bf16.msra.mxu2 %v4965_v61  ;;  %v4870_v38 = vld [vmem:[#allocation7 + $0x128] sm:$0xf0] }
 0x141   :  { %2097 = vmatpush.bf16.msrb.mxu3 %v4673_v36  ;;  %v4869_v36 = vor.u32 %v5793_v34, %v4868_v32  ;;  %v4740_v32 = vld [vmem:[#allocation7 + $0x8] sm:$0xf]  ;;  %v4737_v34 = vor.u32 %v5756_v6, %v4734_v30 }
 0x143   :  { %v1917_v42 = vpop.f32.mrf.mxu1  ;;  %2541 = vmatpush.bf16.msra.mxu2 %v4933_v11 }
 0x144   :  { %2098 = vmatmul.bf16.vlgmr.msrb.gmra.mxu3 %v1120_v60  ;;  %v6305_v43 = vadd.f32 %v1917_v42, %v1905_v40  ;;  %v4961_v60 = vor.u32 %v5812_v54, %v4958_v57  ;;  %v4873_v42 = vor.u32 %v5789_v39, %v4870_v38  ;;  %v5785_v54 = vld [vmem:[#allocation7 + $0xe4] sm:$0xf0]  ;;  %v4742_v39 = vld [vmem:[#allocation7 + $0x28] sm:$0xf0] }
 0x145   :  { %v1906_v44 = vpop.f32.mrf.mxu0  ;;  %2553 = vmatpush.bf16.msra.mxu3 %v4969_v0  ;;  %v4837_v57 = vor.u32 %v5785_v54, %v4836_v52  ;;  %v5776_v0 = vld [vmem:[#allocation7 + $0x9c] sm:$0xf0]  ;;  %v5819_v52 = vld [vmem:[#allocation7 + $0x1f4] sm:$0xf0] }
 0x146   :  { %2527 = vmatpush.bf16.msra.mxu1 %v4961_v60 }
 0x147   :  { %2542 = vmatpush.bf16.msra.mxu2 %v4901_v24  ;;  %v4774_v24 = vld [vmem:[#allocation7 + $0x68] sm:$0xf0] }
 0x149   :  { %2554 = vmatpush.bf16.msra.mxu3 %v4937_v15  ;;  %v4764_v15 = vld [vmem:[#allocation7 + $0x40] sm:$0xf] }
 0x14a   :  { %2528 = vmatpush.bf16.msra.mxu1 %v4929_v31  ;;  %v4806_v31 = vld [vmem:[#allocation7 + $0xa8] sm:$0xf0] }
 0x14b   :  { %v1919_v45 = vpop.f32.mrf.mxu1  ;;  %2543 = vmatpush.bf16.msra.mxu2 %v4869_v36  ;;  %v4809_v12 = vor.u32 %v5773_v10, %v4806_v31  ;;  %v5757_v36 = vld [vmem:[#allocation7 + $0xc] sm:$0xf]  ;;  %v4950_v10 = vld [vmem:[#allocation7 + $0x1b8] sm:$0xf0] }
 0x14c   :  { %v4828_v45 = vld [vmem:[#allocation7 + $0xc0] sm:$0xf]  ;;  %v4953_v31 = vor.u32 %v5807_v7, %v4950_v10  ;;  %v4780_v7 = vld [vmem:[#allocation7 + $0x50] sm:$0xf] }
 0x14d   :  { %2555 = vmatpush.bf16.msra.mxu3 %v4905_v27 }
 0x14e   :  { %2529 = vmatpush.bf16.msra.mxu1 %v4897_v23  ;;  %v4773_v23 = vor.u32 %v5769_v21, %v4772_v20  ;;  %v5799_v20 = vld [vmem:[#allocation7 + $0x15c] sm:$0xf] }
 0x14f   :  { %2544 = vmatpush.bf16.msra.mxu2 %v4837_v57  ;;  %v5815_v57 = vld [vmem:[#allocation7 + $0x1dc] sm:$0xf] }
 0x150   :  { %v4918_v21 = vld [vmem:[#allocation7 + $0x178] sm:$0xf0] }
 0x151   :  { %2556 = vmatpush.bf16.msra.mxu3 %v4873_v42  ;;  %v4745_v42 = vor.u32 %v5757_v36, %v4742_v39  ;;  %v4844_v39 = vld [vmem:[#allocation7 + $0xd0] sm:$0xf] }
 0x152   :  { %2530 = vmatpush.bf16.msra.mxu1 %v4865_v35  ;;  %v5761_v35 = vld [vmem:[#allocation7 + $0x24] sm:$0xf0] }
 0x153   :  { %2545 = vmatpush.bf16.msra.mxu2 %v4805_v9  ;;  %v4949_v9 = vor.u32 %v5811_v5, %v4948_v3 }
 0x155   :  { %2557 = vmatpush.bf16.msra.mxu3 %v4841_v62  ;;  %v5810_v62 = vld [vmem:[#allocation7 + $0x1ac] sm:$0xf0] }
 0x157   :  { %2546 = vmatpush.bf16.msra.mxu2 %v4773_v23  ;;  %v5794_v23 = vld [vmem:[#allocation7 + $0x12c] sm:$0xf0] }
 0x159   :  { %2558 = vmatpush.bf16.msra.mxu3 %v4809_v12  ;;  %v5802_v12 = vld [vmem:[#allocation7 + $0x16c] sm:$0xf0] }
 0x161   :  { %v6307_v4 = vpop.f32.mrf.mxu2 }
 0x169   :  { %v1932_v56 = vpop.f32.mrf.mxu2 }
 0x16a   :  { %v5784_v56 = vld [vmem:[#allocation7 + $0xdc] sm:$0xf0] }
 0x16b   :  { %v6309_v41 = vpop.f32.mrf.mxu3 }
 0x173   :  { %v1945_v46 = vpop.f32.mrf.mxu3 }
 0x174   :  { %v5780_v46 = vld [vmem:[#allocation7 + $0xc4] sm:$0xf] }
 0x175   :  { %v4833_v55 = vor.u32 %v5780_v46, %v4830_v51  ;;  %v5814_v46 = vld [vmem:[#allocation7 + $0x1d4] sm:$0xf]  ;;  %v4980_v51 = vld [vmem:[#allocation7 + $0x1d8] sm:$0xf] }
 0x177   :  { %2531 = vmatpush.bf16.msra.mxu1 %v4833_v55  ;;  %v4981_v55 = vor.u32 %v5819_v52, %v4980_v51  ;;  %v5783_v51 = vld [vmem:[#allocation7 + $0xdc] sm:$0xf] }
 0x178   :  { %v4854_v52 = vld [vmem:[#allocation7 + $0xf8] sm:$0xf0] }
 0x17b   :  { %v6311_v47 = vpop.f32.mrf.mxu0  ;;  %2532 = vmatpush.bf16.msra.mxu1 %v4801_v8  ;;  %v1252_v8 = vperm.slane %v6302_v37, 1  ;;  %v4921_v37 = vor.u32 %v5799_v20, %v4918_v21  ;;  %v5758_v20 = vld [vmem:[#allocation7 + $0x14] sm:$0xf] }
 0x181   :  { %v6313_v1 = vpop.f32.mrf.mxu1 }
 0x183   :  { %v1958_v48 = vpop.f32.mrf.mxu0 }
 0x184   :  { %v1931_v48 = vadd.f32 %v6307_v4, %v6305_v43  ;;  %v4797_v4 = vor.u32 %v5776_v0, %v4796_v63  ;;  %v5806_v63 = vld [vmem:[#allocation7 + $0x194] sm:$0xf] }
 0x185   :  { %v4942_v0 = vld [vmem:[#allocation7 + $0x1b0] sm:$0xf0] }
 0x186   :  { %v1944_v60 = vadd.f32 %v6309_v41, %v1931_v48 }
 0x188   :  { %v1957_v43 = vadd.f32 %v6311_v47, %v1944_v60  ;;  %v5768_v47 = vld [vmem:[#allocation7 + $0x5c] sm:$0xf0] }
 0x189   :  { %v1971_v49 = vpop.f32.mrf.mxu1  ;;  %v4765_v18 = vor.u32 %v5768_v47, %v4764_v15  ;;  %v4910_v47 = vld [vmem:[#allocation7 + $0x170] sm:$0xf0] }
 0x18a   :  { %v4829_v49 = vor.u32 %v5784_v56, %v4828_v45  ;;  %v1970_v41 = vadd.f32 %v6313_v1, %v1957_v43  ;;  %v5765_v1 = vld [vmem:[#allocation7 + $0x4c] sm:$0xf]  ;;  %v4972_v45 = vld [vmem:[#allocation7 + $0x1d0] sm:$0xf]  ;;  %v4941_v43 = vor.u32 %v5810_v62, %v4940_v59  ;;  %v4814_v59 = vld [vmem:[#allocation7 + $0xb0] sm:$0xf0] }
 0x18b   :  { %v6315_v50 = vpop.f32.mrf.mxu0  ;;  %v4777_v27 = vor.u32 %v5765_v1, %v4774_v24  ;;  %v5818_v56 = vld [vmem:[#allocation7 + $0x1ec] sm:$0xf0]  ;;  %v5790_v1 = vld [vmem:[#allocation7 + $0x114] sm:$0xf]  ;;  %v5775_v62 = vld [vmem:[#allocation7 + $0x9c] sm:$0xf] }
 0x18c   :  { %2518 = vmatpush.bf16.msra.mxu0 %v4829_v49  ;;  %v4973_v48 = vor.u32 %v5818_v56, %v4972_v45  ;;  %v4974_v49 = vld [vmem:[#allocation7 + $0x1f0] sm:$0xf0]  ;;  %v4852_v56 = vld [vmem:[#allocation7 + $0xd8] sm:$0xf] }
 0x18d   :  { %2559 = vmatpush.bf16.msra.mxu3 %v4777_v27  ;;  %v4977_v54 = vor.u32 %v5814_v46, %v4974_v49  ;;  %v4878_v27 = vld [vmem:[#allocation7 + $0x130] sm:$0xf0]  ;;  %v5787_v46 = vld [vmem:[#allocation7 + $0xf4] sm:$0xf0] }
 0x18e   :  { %v4881_v30 = vor.u32 %v5790_v1, %v4878_v27  ;;  %v4846_v45 = vld [vmem:[#allocation7 + $0xf0] sm:$0xf0]  ;;  %v4853_v49 = vor.u32 %v5787_v46, %v4852_v56  ;;  %v5759_v1 = vld [vmem:[#allocation7 + $0x1c] sm:$0xf]  ;;  %v5867_v46 = vld [vmem:[#allocation8 + $0x174] sm:$0xf0] }
 0x190   :  { %2519 = vmatpush.bf16.msra.mxu0 %v4797_v4  ;;  %v4945_v4 = vor.u32 %v5806_v63, %v4942_v0 }
 0x191   :  { %v6317_v14 = vpop.f32.mrf.mxu1  ;;  %2560 = vmatpush.bf16.msra.mxu3 %v4745_v42 }
 0x193   :  { %v2010_v16 = vpop.f32.mrf.mxu0 }
 0x194   :  { %v5764_v16 = vld [vmem:[#allocation7 + $0x44] sm:$0xf]  ;;  %2520 = vmatpush.bf16.msra.mxu0 %v4765_v18 }
 0x195   :  { %v4769_v53 = vor.u32 %v5764_v16, %v4766_v19  ;;  %v4916_v16 = vld [vmem:[#allocation7 + $0x158] sm:$0xf] }
 0x197   :  { %2533 = vmatpush.bf16.msra.mxu1 %v4769_v53  ;;  %v4876_v53 = vld [vmem:[#allocation7 + $0x110] sm:$0xf] }
 0x198   :  { %2521 = vmatpush.bf16.msra.mxu0 %v4733_v29 }
 0x199   :  { %v2023_v40 = vpop.f32.mrf.mxu1 }
 0x19a   :  { %v4741_v40 = vor.u32 %v5761_v35, %v4740_v32  ;;  %v4885_v32 = vor.u32 %v5795_v28, %v4884_v33  ;;  %v4886_v35 = vld [vmem:[#allocation7 + $0x138] sm:$0xf0] }
 0x19b   :  { %v6319_v44 = vpop.f32.mrf.mxu0  ;;  %2534 = vmatpush.bf16.msra.mxu1 %v4737_v34  ;;  %v5791_v34 = vld [vmem:[#allocation7 + $0x11c] sm:$0xf] }
 0x19c   :  { %2547 = vmatpush.bf16.msra.mxu2 %v4741_v40  ;;  %2566 = vmatpush.bf16.msrb.mxu0 %v4973_v48  ;;  %v5782_v40 = vld [vmem:[#allocation7 + $0xd4] sm:$0xf] }
 0x19f   :  { %2579 = vmatpush.bf16.msrb.mxu1 %v4977_v54  ;;  %v4812_v54 = vld [vmem:[#allocation7 + $0x90] sm:$0xf] }
 0x1a0   :  { %2592 = vmatpush.bf16.msrb.mxu2 %v4981_v55  ;;  %2567 = vmatpush.bf16.msrb.mxu0 %v4941_v43  ;;  %v4857_v55 = vor.u32 %v5783_v51, %v4854_v52 }
 0x1a1   :  { %v1982_v61 = vpop.f32.mrf.mxu2  ;;  %v6326_v11 = vpop.f32.mrf.mxu1 }
 0x1a2   :  { %v1983_v17 = vadd.f32 %v1982_v61, %v1970_v41  ;;  %v4985_v61 = vor.u32 %v5815_v57, %v4982_v58  ;;  %v4908_v41 = vld [vmem:[#allocation7 + $0x150] sm:$0xf]  ;;  %v5774_v58 = vld [vmem:[#allocation7 + $0x94] sm:$0xf] }
 0x1a3   :  { %v2062_v13 = vpop.f32.mrf.mxu0  ;;  %v4909_v15 = vor.u32 %v5802_v12, %v4908_v41  ;;  %2580 = vmatpush.bf16.msrb.mxu1 %v4945_v4  ;;  %v5778_v57 = vld [vmem:[#allocation7 + $0xac] sm:$0xf0]  ;;  %v4817_v3 = vor.u32 %v5774_v58, %v4814_v59  ;;  %v4788_v41 = vld [vmem:[#allocation7 + $0x58] sm:$0xf]  ;;  %v5849_v58 = vld [vmem:[#allocation8 + $0xe4] sm:$0xf0] }
 0x1a4   :  { %2605 = vmatpush.bf16.msrb.mxu3 %v4985_v61  ;;  %v5798_v13 = vld [vmem:[#allocation7 + $0x154] sm:$0xf]  ;;  %2593 = vmatpush.bf16.msrb.mxu2 %v4949_v9  ;;  %v5779_v61 = vld [vmem:[#allocation7 + $0xb4] sm:$0xf0]  ;;  %v4813_v0 = vor.u32 %v5778_v57, %v4812_v54  ;;  %v5036_v54 = vld [vmem:[#allocation8 + $0x60] sm:$0xf] }
 0x1a5   :  { %v4913_v18 = vor.u32 %v5798_v13, %v4910_v47  ;;  %2568 = vmatpush.bf16.msrb.mxu0 %v4909_v15  ;;  %v5766_v9 = vld [vmem:[#allocation7 + $0x54] sm:$0xf]  ;;  %v5771_v12 = vld [vmem:[#allocation7 + $0x74] sm:$0xf0]  ;;  %v5767_v13 = vld [vmem:[#allocation7 + $0x5c] sm:$0xf] }
 0x1a6   :  { %v4790_v15 = vld [vmem:[#allocation7 + $0x78] sm:$0xf0]  ;;  %v5100_v57 = vld [vmem:[#allocation8 + $0xe0] sm:$0xf] }
 0x1a7   :  { %v1995_v22 = vpop.f32.mrf.mxu3  ;;  %2581 = vmatpush.bf16.msrb.mxu1 %v4913_v18  ;;  %v4748_v18 = vld [vmem:[#allocation7 + $0x10] sm:$0xf]  ;;  %v4793_v21 = vor.u32 %v5767_v13, %v4790_v15  ;;  %v5020_v15 = vld [vmem:[#allocation8 + $0x40] sm:$0xf] }
 0x1a8   :  { %v6328_v25 = vadd.f32 %v1995_v22, %v1983_v17  ;;  %v5803_v17 = vld [vmem:[#allocation7 + $0x174] sm:$0xf0]  ;;  %2606 = vmatpush.bf16.msrb.mxu3 %v4953_v31  ;;  %v2009_v22 = vadd.f32 %v6315_v50, %v1252_v8  ;;  %v4889_v50 = vor.u32 %v5791_v34, %v4886_v35  ;;  %v5770_v8 = vld [vmem:[#allocation7 + $0x6c] sm:$0xf0]  ;;  %v4782_v31 = vld [vmem:[#allocation7 + $0x70] sm:$0xf0] }
 0x1a9   :  { %v1984_v26 = vpop.f32.mrf.mxu2  ;;  %v2075_v38 = vpop.f32.mrf.mxu1  ;;  %v4917_v19 = vor.u32 %v5803_v17, %v4916_v16  ;;  %v4781_v47 = vor.u32 %v5770_v8, %v4780_v7  ;;  %v4789_v17 = vor.u32 %v5771_v12, %v4788_v41  ;;  %v2105_v35 = vld [vmem:[%s6408_s1] sm:$0xff]  ;;  %v5879_v41 = vld [vmem:[#allocation8 + $0x1d4] sm:$0xf0] }
 0x1aa   :  { %2103 = vst [vmem:[#allocation11] sm:$0xff] %v6328_v25  ;;  %v4877_v26 = vor.u32 %v5794_v23, %v4876_v53  ;;  %v2022_v6 = vadd.f32 %v6317_v14, %v2009_v22  ;;  %v5786_v38 = vld [vmem:[#allocation7 + $0xec] sm:$0xf0]  ;;  %v4849_v14 = vor.u32 %v5782_v40, %v4846_v45  ;;  %v4756_v22 = vld [vmem:[#allocation7 + $0x18] sm:$0xf] }
 0x1ab   :  { %2594 = vmatpush.bf16.msrb.mxu2 %v4917_v19  ;;  %v4845_v42 = vor.u32 %v5786_v38, %v4844_v39  ;;  %2582 = vmatpush.bf16.msrb.mxu1 %v4881_v30  ;;  %v5762_v19 = vld [vmem:[#allocation7 + $0x2c] sm:$0xf0]  ;;  %v5763_v53 = vld [vmem:[#allocation7 + $0x34] sm:$0xf0]  ;;  %3677 = dma.vmem_to_hbm [thread:$0]  %s3673_s14, 128, %s3675_s30, [#allocation12]  }
 0x1ac   :  { %2607 = vmatpush.bf16.msrb.mxu3 %v4921_v37  ;;  %2569 = vmatpush.bf16.msrb.mxu0 %v4877_v26  ;;  %v4750_v37 = vld [vmem:[#allocation7 + $0x30] sm:$0xf0]  ;;  %v4749_v27 = vor.u32 %v5762_v19, %v4748_v18  ;;  %v5044_v39 = vld [vmem:[#allocation8 + $0x70] sm:$0xf]  ;;  %v5835_v38 = vld [vmem:[#allocation8 + $0x74] sm:$0xf0] }
 0x1ad   :  { %v4753_v28 = vor.u32 %v5758_v20, %v4750_v37  ;;  %v5108_v40 = vld [vmem:[#allocation8 + $0xf0] sm:$0xf]  ;;  %v5045_v51 = vor.u32 %v5835_v38, %v5044_v39  ;;  %v5148_v19 = vld [vmem:[#allocation8 + $0x140] sm:$0xf]  ;;  %v5861_v20 = vld [vmem:[#allocation8 + $0x144] sm:$0xf0] }
 0x1ae   :  { %v5172_v45 = vld [vmem:[#allocation8 + $0x170] sm:$0xf]  ;;  %v5877_v37 = vld [vmem:[#allocation8 + $0x1c4] sm:$0xf0] }
 0x1af   :  { %v1997_v60 = vpop.f32.mrf.mxu3  ;;  %2595 = vmatpush.bf16.msrb.mxu2 %v4885_v32  ;;  %2583 = vmatpush.bf16.msrb.mxu1 %v4849_v14  ;;  %v5883_v14 = vld [vmem:[#allocation8 + $0x1f4] sm:$0xf0]  ;;  %v5173_v59 = vor.u32 %v5867_v46, %v5172_v45  ;;  %v5196_v45 = vld [vmem:[#allocation8 + $0x1a0] sm:$0xf] }
 0x1b0   :  { %2608 = vmatpush.bf16.msrb.mxu3 %v4889_v50  ;;  %v4820_v60 = vld [vmem:[#allocation7 + $0x98] sm:$0xf]  ;;  %2570 = vmatpush.bf16.msrb.mxu0 %v4845_v42 }
 0x1b1   :  { %v2034_v2 = vpop.f32.mrf.mxu2  ;;  %v4821_v5 = vor.u32 %v5779_v61, %v4820_v60  ;;  %v5851_v42 = vld [vmem:[#allocation8 + $0xf4] sm:$0xf0]  ;;  %v5164_v61 = vld [vmem:[#allocation8 + $0x160] sm:$0xf] }
 0x1b2   :  { %v2035_v36 = vadd.f32 %v2034_v2, %v2022_v6  ;;  %v4822_v2 = vld [vmem:[#allocation7 + $0xb8] sm:$0xf0]  ;;  %v4757_v6 = vor.u32 %v5763_v53, %v4756_v22  ;;  %v5109_v52 = vor.u32 %v5851_v42, %v5108_v40  ;;  %v5132_v40 = vld [vmem:[#allocation8 + $0x120] sm:$0xf]  ;;  %v5857_v42 = vld [vmem:[#allocation8 + $0x124] sm:$0xf0] }
 0x1b3   :  { %2596 = vmatpush.bf16.msrb.mxu2 %v4853_v49  ;;  %v4825_v10 = vor.u32 %v5775_v62, %v4822_v2  ;;  %2584 = vmatpush.bf16.msrb.mxu1 %v4817_v3  ;;  %v5865_v62 = vld [vmem:[#allocation8 + $0x164] sm:$0xf0]  ;;  %v5101_v2 = vor.u32 %v5849_v58, %v5100_v57  ;;  %v5092_v3 = vld [vmem:[#allocation8 + $0xd0] sm:$0xf] }
 0x1b4   :  { %2609 = vmatpush.bf16.msrb.mxu3 %v4857_v55  ;;  %2571 = vmatpush.bf16.msrb.mxu0 %v4813_v0  ;;  %v5833_v55 = vld [vmem:[#allocation8 + $0x64] sm:$0xf0]  ;;  %v5165_v7 = vor.u32 %v5865_v62, %v5164_v61  ;;  %v5124_v58 = vld [vmem:[#allocation8 + $0x110] sm:$0xf]  ;;  %v5871_v61 = vld [vmem:[#allocation8 + $0x194] sm:$0xf0] }
 0x1b5   :  { %v5037_v0 = vor.u32 %v5833_v55, %v5036_v54  ;;  %v5839_v54 = vld [vmem:[#allocation8 + $0x94] sm:$0xf0]  ;;  %v5133_v55 = vor.u32 %v5857_v42, %v5132_v40  ;;  %v4988_v62 = vld [vmem:[#allocation8] sm:$0xf] }
 0x1b7   :  { %v2047_v24 = vpop.f32.mrf.mxu3  ;;  %2597 = vmatpush.bf16.msrb.mxu2 %v4821_v5  ;;  %v5847_v5 = vld [vmem:[#allocation8 + $0xd4] sm:$0xf0] }
 0x1b8   :  { %v2048_v48 = vadd.f32 %v2047_v24, %v2035_v36  ;;  %2610 = vmatpush.bf16.msrb.mxu3 %v4825_v10  ;;  %v4758_v24 = vld [vmem:[#allocation7 + $0x38] sm:$0xf0]  ;;  %2572 = vmatpush.bf16.msrb.mxu0 %v4781_v47  ;;  %v5863_v10 = vld [vmem:[#allocation8 + $0x154] sm:$0xf0]  ;;  %v5093_v13 = vor.u32 %v5847_v5, %v5092_v3  ;;  %v5829_v47 = vld [vmem:[#allocation8 + $0x44] sm:$0xf0] }
 0x1b9   :  { %v2036_v29 = vpop.f32.mrf.mxu2  ;;  %v5021_v22 = vor.u32 %v5829_v47, %v5020_v15  ;;  %v5364_v3 = vld [vmem:[#allocation8 + $0x2f0] sm:$0xf]  ;;  %v5931_v47 = vld [vmem:[#allocation8 + $0x374] sm:$0xf0] }
 0x1ba   :  { %v2061_v43 = vadd.f32 %v6319_v44, %v2048_v48  ;;  %v4785_v44 = vor.u32 %v5766_v9, %v4782_v31  ;;  %v4761_v29 = vor.u32 %v5759_v1, %v4758_v24  ;;  %v5236_v48 = vld [vmem:[#allocation8 + $0x1f0] sm:$0xf]  ;;  %v5827_v1 = vld [vmem:[#allocation8 + $0x34] sm:$0xf0] }
 0x1bb   :  { %2598 = vmatpush.bf16.msrb.mxu2 %v4789_v17  ;;  %v5237_v60 = vor.u32 %v5883_v14, %v5236_v48  ;;  %v5156_v9 = vld [vmem:[#allocation8 + $0x150] sm:$0xf] }
 0x1bc   :  { %v2074_v16 = vadd.f32 %v6326_v11, %v2061_v43  ;;  %2585 = vmatpush.bf16.msrb.mxu1 %v4785_v44  ;;  %2611 = vmatpush.bf16.msrb.mxu3 %v4793_v21  ;;  %v5028_v43 = vld [vmem:[#allocation8 + $0x50] sm:$0xf]  ;;  %v5845_v44 = vld [vmem:[#allocation8 + $0xc4] sm:$0xf0]  ;;  %v5157_v17 = vor.u32 %v5863_v10, %v5156_v9  ;;  %v5212_v21 = vld [vmem:[#allocation8 + $0x1c0] sm:$0xf] }
 0x1bd   :  { %2573 = vmatpush.bf16.msrb.mxu0 %v4749_v27  ;;  %v5220_v31 = vld [vmem:[#allocation8 + $0x1d0] sm:$0xf]  ;;  %v5149_v27 = vor.u32 %v5861_v20, %v5148_v19  ;;  %v5116_v9 = vld [vmem:[#allocation8 + $0x100] sm:$0xf]  ;;  %v5853_v10 = vld [vmem:[#allocation8 + $0x104] sm:$0xf0] }
 0x1be   :  { %v5221_v18 = vor.u32 %v5879_v41, %v5220_v31  ;;  %v5076_v24 = vld [vmem:[#allocation8 + $0xb0] sm:$0xf]  ;;  %v5180_v31 = vld [vmem:[#allocation8 + $0x180] sm:$0xf]  ;;  %v5869_v41 = vld [vmem:[#allocation8 + $0x184] sm:$0xf0] }
 0x1bf   :  { %v2049_v63 = vpop.f32.mrf.mxu3  ;;  %2599 = vmatpush.bf16.msrb.mxu2 %v4757_v6  ;;  %v5204_v6 = vld [vmem:[#allocation8 + $0x1b0] sm:$0xf]  ;;  %v5292_v19 = vld [vmem:[#allocation8 + $0x260] sm:$0xf]  ;;  %v5897_v20 = vld [vmem:[#allocation8 + $0x264] sm:$0xf0] }
 0x1c0   :  { %2586 = vmatpush.bf16.msrb.mxu1 %v4753_v28  ;;  %2612 = vmatpush.bf16.msrb.mxu3 %v4761_v29  ;;  %v5881_v63 = vld [vmem:[#allocation8 + $0x1e4] sm:$0xf0]  ;;  %v5859_v28 = vld [vmem:[#allocation8 + $0x134] sm:$0xf0]  ;;  %v4996_v14 = vld [vmem:[#allocation8 + $0x10] sm:$0xf] }
 0x1c1   :  { %v2086_v4 = vpop.f32.mrf.mxu2  ;;  %v5875_v29 = vld [vmem:[#allocation8 + $0x1b4] sm:$0xf0] }
 0x1c2   :  { %v2087_v23 = vadd.f32 %v2086_v4, %v2074_v16  ;;  %v5831_v4 = vld [vmem:[#allocation8 + $0x54] sm:$0xf0]  ;;  %v5084_v16 = vld [vmem:[#allocation8 + $0xc0] sm:$0xf]  ;;  %v5205_v38 = vor.u32 %v5875_v29, %v5204_v6  ;;  %v5284_v6 = vld [vmem:[#allocation8 + $0x250] sm:$0xf] }
 0x1c3   :  { %v5029_v12 = vor.u32 %v5831_v4, %v5028_v43  ;;  %v5085_v53 = vor.u32 %v5845_v44, %v5084_v16  ;;  %v5300_v43 = vld [vmem:[#allocation8 + $0x270] sm:$0xf]  ;;  %v5899_v4 = vld [vmem:[#allocation8 + $0x274] sm:$0xf0] }
 0x1c4   :  { %v5492_v16 = vld [vmem:[#allocation8 + $0x3f0] sm:$0xf]  ;;  %v5947_v44 = vld [vmem:[#allocation8 + $0x3f4] sm:$0xf0] }
 0x1c5   :  { %v5895_v29 = vld [vmem:[#allocation8 + $0x254] sm:$0xf0] }
 0x1c6   :  { %v5285_v40 = vor.u32 %v5895_v29, %v5284_v6  ;;  %v5444_v29 = vld [vmem:[#allocation8 + $0x390] sm:$0xf] }
 0x1c7   :  { %v2099_v26 = vpop.f32.mrf.mxu3 }
 0x1c8   :  { %v2100_v33 = vadd.f32 %v2099_v26, %v2087_v23  ;;  %v5012_v23 = vld [vmem:[#allocation8 + $0x30] sm:$0xf]  ;;  %v5843_v26 = vld [vmem:[#allocation8 + $0xb4] sm:$0xf0] }
 0x1c9   :  { %v2088_v11 = vpop.f32.mrf.mxu2 }
 0x1ca   :  { %2104 = vst [vmem:[#allocation13] sm:$0xff] %v2100_v33  ;;  %v2106_v30 = vmul.f32 0.5, %v2100_v33  ;;  %v5213_v33 = vor.u32 %v5877_v37, %v5212_v21  ;;  %v5140_v11 = vld [vmem:[#allocation8 + $0x130] sm:$0xf]  ;;  %v5356_v21 = vld [vmem:[#allocation8 + $0x2e0] sm:$0xf] }
 0x1cb   :  { %v5141_v39 = vor.u32 %v5859_v28, %v5140_v11  ;;  %v5913_v37 = vld [vmem:[#allocation8 + $0x2e4] sm:$0xf0]  ;;  %v5293_v11 = vor.u32 %v5897_v20, %v5292_v19  ;;  %v5388_v19 = vld [vmem:[#allocation8 + $0x320] sm:$0xf]  ;;  %3688 = dma.vmem_to_hbm [thread:$0]  %s3684_s16, 128, %s3686_s18, [#allocation12]  }
 0x1cc   :  { %v2107_v32 = vmul.f32 1.442695, %v2106_v30  ;;  %v5013_v30 = vor.u32 %v5827_v1, %v5012_v23  ;;  %v5493_v1 = vor.u32 %v5947_v44, %v5492_v16  ;;  %v5357_v28 = vor.u32 %v5913_v37, %v5356_v21  ;;  %v5316_v44 = vld [vmem:[#allocation8 + $0x290] sm:$0xf]  ;;  %v5921_v20 = vld [vmem:[#allocation8 + $0x324] sm:$0xf0] }
 0x1cd   :  { %v5452_v21 = vld [vmem:[#allocation8 + $0x3a0] sm:$0xf]  ;;  %v5389_v37 = vor.u32 %v5921_v20, %v5388_v19 }
 0x1ce   :  { %5959 = vpow2.f32 %v2107_v32  ;;  %v5077_v32 = vor.u32 %v5843_v26, %v5076_v24  ;;  %v5420_v24 = vld [vmem:[#allocation8 + $0x360] sm:$0xf]  ;;  %v5929_v26 = vld [vmem:[#allocation8 + $0x364] sm:$0xf0] }
 0x1cf   :  { %v2101_v34 = vpop.f32.mrf.mxu3 }
 0x1d0   :  { %v5004_v34 = vld [vmem:[#allocation8 + $0x20] sm:$0xf] }
 0x1d4   :  { %v5960_v50 = vpop.eup %5959 }
 0x1d5   :  { %v2109_v36 = vmul.f32 %v5960_v50, %v2105_v35  ;;  %v5825_v35 = vld [vmem:[#allocation8 + $0x24] sm:$0xf0]  ;;  %v5068_v50 = vld [vmem:[#allocation8 + $0xa0] sm:$0xf] }
 0x1d6   :  { %v5005_v46 = vor.u32 %v5825_v35, %v5004_v34  ;;  %v5421_v34 = vor.u32 %v5929_v26, %v5420_v24  ;;  %v5308_v24 = vld [vmem:[#allocation8 + $0x280] sm:$0xf] }
 0x1d7   :  { %v2110_v56 = vadd.f32 %v2109_v36, %v6328_v25  ;;  %v5228_v25 = vld [vmem:[#allocation8 + $0x1e0] sm:$0xf]  ;;  %v5841_v36 = vld [vmem:[#allocation8 + $0xa4] sm:$0xf0] }
 0x1d8   :  { %v5229_v8 = vor.u32 %v5881_v63, %v5228_v25  ;;  %v5069_v48 = vor.u32 %v5841_v36, %v5068_v50  ;;  %v5821_v63 = vld [vmem:[#allocation8 + $0x4] sm:$0xf0]  ;;  %v5412_v50 = vld [vmem:[#allocation8 + $0x350] sm:$0xf]  ;;  %v5927_v36 = vld [vmem:[#allocation8 + $0x354] sm:$0xf0] }
 0x1d9   :  { %v6340_v49 = vpack.c.bf16 %v2110_v56, %v2110_v56  ;;  %v5873_v56 = vld [vmem:[#allocation8 + $0x1a4] sm:$0xf0] }
 0x1da   :  { %v5197_v57 = vor.u32 %v5873_v56, %v5196_v45  ;;  %v5276_v45 = vld [vmem:[#allocation8 + $0x240] sm:$0xf]  ;;  %v5893_v56 = vld [vmem:[#allocation8 + $0x244] sm:$0xf0] }
 0x1db   :  { %2522 = vmatmul.bf16.vlgmr.msra.gmra.mxu0 %v6340_v49  ;;  %2535 = vmatmul.bf16.vlgmr.msra.gmra.mxu1 %v6340_v49 }
 0x1dc   :  { %2548 = vmatmul.bf16.vlgmr.msra.gmra.mxu2 %v6340_v49  ;;  %2561 = vmatmul.bf16.vlgmr.msra.gmra.mxu3 %v6340_v49 }
 0x1dd   :  { %3408 = vmatpush.bf16.msra.mxu0 %v5045_v51  ;;  %3421 = vmatpush.bf16.msra.mxu1 %v5109_v52  ;;  %v5823_v51 = vld [vmem:[#allocation8 + $0x14] sm:$0xf0]  ;;  %v5060_v52 = vld [vmem:[#allocation8 + $0x90] sm:$0xf] }
 0x1de   :  { %3434 = vmatpush.bf16.msra.mxu2 %v5173_v59  ;;  %3447 = vmatpush.bf16.msra.mxu3 %v5237_v60  ;;  %v5855_v59 = vld [vmem:[#allocation8 + $0x114] sm:$0xf0]  ;;  %v5188_v60 = vld [vmem:[#allocation8 + $0x190] sm:$0xf]  ;;  %v5061_v25 = vor.u32 %v5839_v54, %v5060_v52  ;;  %v5404_v52 = vld [vmem:[#allocation8 + $0x340] sm:$0xf] }
 0x1df   :  { %v5125_v5 = vor.u32 %v5855_v59, %v5124_v58  ;;  %v5925_v54 = vld [vmem:[#allocation8 + $0x344] sm:$0xf0]  ;;  %v5277_v58 = vor.u32 %v5893_v56, %v5276_v45 }
 0x1e1   :  { %3409 = vmatpush.bf16.msra.mxu0 %v5037_v0  ;;  %3422 = vmatpush.bf16.msra.mxu1 %v5101_v2  ;;  %v5052_v0 = vld [vmem:[#allocation8 + $0x80] sm:$0xf]  ;;  %v5837_v2 = vld [vmem:[#allocation8 + $0x84] sm:$0xf0] }
 0x1e2   :  { %3435 = vmatpush.bf16.msra.mxu2 %v5165_v7  ;;  %3448 = vmatpush.bf16.msra.mxu3 %v5229_v8  ;;  %v5189_v7 = vor.u32 %v5871_v61, %v5188_v60  ;;  %v5915_v8 = vld [vmem:[#allocation8 + $0x2f4] sm:$0xf0]  ;;  %v5053_v15 = vor.u32 %v5837_v2, %v5052_v0  ;;  %v5268_v60 = vld [vmem:[#allocation8 + $0x230] sm:$0xf] }
 0x1e3   :  { %v5891_v61 = vld [vmem:[#allocation8 + $0x234] sm:$0xf0] }
 0x1e4   :  { %v5269_v0 = vor.u32 %v5891_v61, %v5268_v60 }
 0x1e5   :  { %3410 = vmatpush.bf16.msra.mxu0 %v5029_v12  ;;  %3423 = vmatpush.bf16.msra.mxu1 %v5093_v13  ;;  %v5428_v12 = vld [vmem:[#allocation8 + $0x370] sm:$0xf]  ;;  %v4989_v13 = vor.u32 %v5821_v63, %v4988_v62 }
 0x1e6   :  { %3436 = vmatpush.bf16.msra.mxu2 %v5157_v17  ;;  %3449 = vmatpush.bf16.msra.mxu3 %v5221_v18  ;;  %v5301_v17 = vor.u32 %v5899_v4, %v5300_v43  ;;  %v5365_v18 = vor.u32 %v5915_v8, %v5364_v3  ;;  %v5429_v23 = vor.u32 %v5931_v47, %v5428_v12  ;;  %v5332_v62 = vld [vmem:[#allocation8 + $0x2b0] sm:$0xf]  ;;  %v5260_v43 = vld [vmem:[#allocation8 + $0x220] sm:$0xf]  ;;  %v5889_v4 = vld [vmem:[#allocation8 + $0x224] sm:$0xf0] }
 0x1e7   :  { %v5324_v3 = vld [vmem:[#allocation8 + $0x2a0] sm:$0xf]  ;;  %v5939_v12 = vld [vmem:[#allocation8 + $0x3b4] sm:$0xf0] }
 0x1e8   :  { %v5887_v47 = vld [vmem:[#allocation8 + $0x214] sm:$0xf0] }
 0x1e9   :  { %3411 = vmatpush.bf16.msra.mxu0 %v5021_v22  ;;  %3424 = vmatpush.bf16.msra.mxu1 %v5085_v53  ;;  %v5117_v22 = vor.u32 %v5853_v10, %v5116_v9  ;;  %v5181_v53 = vor.u32 %v5869_v41, %v5180_v31  ;;  %v5396_v9 = vld [vmem:[#allocation8 + $0x330] sm:$0xf]  ;;  %v5923_v10 = vld [vmem:[#allocation8 + $0x334] sm:$0xf0] }
 0x1ea   :  { %3437 = vmatpush.bf16.msra.mxu2 %v5149_v27  ;;  %3450 = vmatpush.bf16.msra.mxu3 %v5213_v33  ;;  %v5484_v27 = vld [vmem:[#allocation8 + $0x3e0] sm:$0xf]  ;;  %v5945_v33 = vld [vmem:[#allocation8 + $0x3e4] sm:$0xf0]  ;;  %v5460_v31 = vld [vmem:[#allocation8 + $0x3b0] sm:$0xf]  ;;  %v5397_v41 = vor.u32 %v5923_v10, %v5396_v9 }
 0x1eb   :  { %2574 = vmatmul.bf16.vlgmr.msrb.gmra.mxu0 %v6340_v49  ;;  %2587 = vmatmul.bf16.vlgmr.msrb.gmra.mxu1 %v6340_v49  ;;  %v5485_v35 = vor.u32 %v5945_v33, %v5484_v27  ;;  %v5901_v27 = vld [vmem:[#allocation8 + $0x284] sm:$0xf0]  ;;  %v5882_v9 = vld [vmem:[#allocation8 + $0x1f4] sm:$0xf] }
 0x1ec   :  { %2600 = vmatmul.bf16.vlgmr.msrb.gmra.mxu2 %v6340_v49  ;;  %2613 = vmatmul.bf16.vlgmr.msrb.gmra.mxu3 %v6340_v49  ;;  %v4997_v49 = vor.u32 %v5823_v51, %v4996_v14  ;;  %v5413_v14 = vor.u32 %v5927_v36, %v5412_v50  ;;  %v5309_v33 = vor.u32 %v5901_v27, %v5308_v24  ;;  %v5436_v36 = vld [vmem:[#allocation8 + $0x380] sm:$0xf] }
 0x1ed   :  { %3412 = vmatpush.bf16.msra.mxu0 %v5013_v30  ;;  %3425 = vmatpush.bf16.msra.mxu1 %v5077_v32  ;;  %v5348_v30 = vld [vmem:[#allocation8 + $0x2d0] sm:$0xf]  ;;  %v5911_v32 = vld [vmem:[#allocation8 + $0x2d4] sm:$0xf0] }
 0x1ee   :  { %3438 = vmatpush.bf16.msra.mxu2 %v5141_v39  ;;  %3451 = vmatpush.bf16.msra.mxu3 %v5205_v38  ;;  %v5476_v39 = vld [vmem:[#allocation8 + $0x3d0] sm:$0xf]  ;;  %v5943_v38 = vld [vmem:[#allocation8 + $0x3d4] sm:$0xf0]  ;;  %v5349_v42 = vor.u32 %v5911_v32, %v5348_v30 }
 0x1ef   :  { %v5477_v51 = vor.u32 %v5943_v38, %v5476_v39  ;;  %v5935_v30 = vld [vmem:[#allocation8 + $0x394] sm:$0xf0]  ;;  %v5933_v39 = vld [vmem:[#allocation8 + $0x384] sm:$0xf0] }
 0x1f0   :  { %v5445_v32 = vor.u32 %v5935_v30, %v5444_v29  ;;  %v5437_v38 = vor.u32 %v5933_v39, %v5436_v36  ;;  %v5844_v29 = vld [vmem:[#allocation8 + $0xc4] sm:$0xf]  ;;  %v5086_v30 = vld [vmem:[#allocation8 + $0xc8] sm:$0xf0]  ;;  %v5158_v39 = vld [vmem:[#allocation8 + $0x158] sm:$0xf0] }
 0x1f1   :  { %3413 = vmatpush.bf16.msra.mxu0 %v5005_v46  ;;  %3426 = vmatpush.bf16.msra.mxu1 %v5069_v48  ;;  %v5340_v46 = vld [vmem:[#allocation8 + $0x2c0] sm:$0xf]  ;;  %v5909_v48 = vld [vmem:[#allocation8 + $0x2c4] sm:$0xf0] }
 0x1f2   :  { %3439 = vmatpush.bf16.msra.mxu2 %v5133_v55  ;;  %3452 = vmatpush.bf16.msra.mxu3 %v5197_v57  ;;  %v5468_v55 = vld [vmem:[#allocation8 + $0x3c0] sm:$0xf]  ;;  %v5941_v57 = vld [vmem:[#allocation8 + $0x3c4] sm:$0xf0]  ;;  %v5341_v59 = vor.u32 %v5909_v48, %v5340_v46  ;;  %v5834_v48 = vld [vmem:[#allocation8 + $0x74] sm:$0xf] }
 0x1f3   :  { %v5469_v63 = vor.u32 %v5941_v57, %v5468_v55  ;;  %v5110_v55 = vld [vmem:[#allocation8 + $0xf8] sm:$0xf0] }
 0x1f5   :  { %3414 = vmatpush.bf16.msra.mxu0 %v4997_v49  ;;  %3427 = vmatpush.bf16.msra.mxu1 %v5061_v25  ;;  %v5907_v49 = vld [vmem:[#allocation8 + $0x2b4] sm:$0xf0]  ;;  %v5405_v25 = vor.u32 %v5925_v54, %v5404_v52  ;;  %v5046_v52 = vld [vmem:[#allocation8 + $0x78] sm:$0xf0]  ;;  %v5850_v54 = vld [vmem:[#allocation8 + $0xf4] sm:$0xf] }
 0x1f6   :  { %3440 = vmatpush.bf16.msra.mxu2 %v5125_v5  ;;  %3453 = vmatpush.bf16.msra.mxu3 %v5189_v7  ;;  %v5333_v2 = vor.u32 %v5907_v49, %v5332_v62  ;;  %v5905_v5 = vld [vmem:[#allocation8 + $0x2a4] sm:$0xf0]  ;;  %v5261_v7 = vor.u32 %v5889_v4, %v5260_v43  ;;  %v5049_v61 = vor.u32 %v5834_v48, %v5046_v52  ;;  %v5832_v49 = vld [vmem:[#allocation8 + $0x64] sm:$0xf]  ;;  %v5102_v43 = vld [vmem:[#allocation8 + $0xe8] sm:$0xf0] }
 0x1f7   :  { %v5325_v8 = vor.u32 %v5905_v5, %v5324_v3  ;;  %v5113_v62 = vor.u32 %v5850_v54, %v5110_v55  ;;  %v5089_v48 = vor.u32 %v5844_v29, %v5086_v30  ;;  %v5826_v52 = vld [vmem:[#allocation8 + $0x34] sm:$0xf]  ;;  %v5856_v29 = vld [vmem:[#allocation8 + $0x124] sm:$0xf] }
 0x1f9   :  { %3415 = vmatpush.bf16.msra.mxu0 %v4989_v13  ;;  %3428 = vmatpush.bf16.msra.mxu1 %v5053_v15  ;;  %v5461_v13 = vor.u32 %v5939_v12, %v5460_v31  ;;  %v5252_v15 = vld [vmem:[#allocation8 + $0x210] sm:$0xf] }
 0x1fa   :  { %3441 = vmatpush.bf16.msra.mxu2 %v5117_v22  ;;  %3454 = vmatpush.bf16.msra.mxu3 %v5181_v53  ;;  %v5253_v16 = vor.u32 %v5887_v47, %v5252_v15  ;;  %v5937_v22 = vld [vmem:[#allocation8 + $0x3a4] sm:$0xf0]  ;;  %v5238_v15 = vld [vmem:[#allocation8 + $0x1f8] sm:$0xf0]  ;;  %v5830_v47 = vld [vmem:[#allocation8 + $0x54] sm:$0xf] }
 0x1fb   :  { %v5453_v53 = vor.u32 %v5937_v22, %v5452_v21  ;;  %v5241_v21 = vor.u32 %v5882_v9, %v5238_v15  ;;  %v5824_v9 = vld [vmem:[#allocation8 + $0x24] sm:$0xf] }
 0x1fd   :  { %3460 = vmatpush.bf16.msrb.mxu0 %v5301_v17  ;;  %3473 = vmatpush.bf16.msrb.mxu1 %v5365_v18  ;;  %v5903_v17 = vld [vmem:[#allocation8 + $0x294] sm:$0xf0] }
 0x1fe   :  { %3486 = vmatpush.bf16.msrb.mxu2 %v5429_v23  ;;  %3499 = vmatpush.bf16.msrb.mxu3 %v5493_v1  ;;  %v5317_v18 = vor.u32 %v5903_v17, %v5316_v44  ;;  %v5244_v23 = vld [vmem:[#allocation8 + $0x200] sm:$0xf]  ;;  %v5885_v1 = vld [vmem:[#allocation8 + $0x204] sm:$0xf0]  ;;  %v5846_v44 = vld [vmem:[#allocation8 + $0xd4] sm:$0xf] }
 0x1ff   :  { %v5245_v26 = vor.u32 %v5885_v1, %v5244_v23  ;;  %v5094_v17 = vld [vmem:[#allocation8 + $0xd8] sm:$0xf0]  ;;  %v5864_v23 = vld [vmem:[#allocation8 + $0x164] sm:$0xf]  ;;  %v5166_v1 = vld [vmem:[#allocation8 + $0x168] sm:$0xf0] }
 0x200   :  { %v5097_v27 = vor.u32 %v5846_v44, %v5094_v17 }
 0x201   :  { %3461 = vmatpush.bf16.msrb.mxu0 %v5293_v11  ;;  %3474 = vmatpush.bf16.msrb.mxu1 %v5357_v28  ;;  %v5380_v11 = vld [vmem:[#allocation8 + $0x310] sm:$0xf]  ;;  %v5919_v28 = vld [vmem:[#allocation8 + $0x314] sm:$0xf0] }
 0x202   :  { %3487 = vmatpush.bf16.msrb.mxu2 %v5421_v34  ;;  %3500 = vmatpush.bf16.msrb.mxu3 %v5485_v35  ;;  %v5381_v6 = vor.u32 %v5919_v28, %v5380_v11  ;;  %v5372_v34 = vld [vmem:[#allocation8 + $0x300] sm:$0xf]  ;;  %v5917_v35 = vld [vmem:[#allocation8 + $0x304] sm:$0xf0]  ;;  %v5230_v11 = vld [vmem:[#allocation8 + $0x1e8] sm:$0xf0] }
 0x203   :  { %v5373_v50 = vor.u32 %v5917_v35, %v5372_v34  ;;  %v5828_v28 = vld [vmem:[#allocation8 + $0x44] sm:$0xf] }
 0x205   :  { %3462 = vmatpush.bf16.msrb.mxu0 %v5285_v40  ;;  %3475 = vmatpush.bf16.msrb.mxu1 %v5349_v42  ;;  %v6353_v40 = vld [vmem:[%s6414_s7] sm:$0xff] }
 0x206   :  { %3488 = vmatpush.bf16.msrb.mxu2 %v5413_v14  ;;  %3501 = vmatpush.bf16.msrb.mxu3 %v5477_v51  ;;  %v2178_v42 = vperm.slane %v6353_v40, 0  ;;  %v2179_v45 = vperm.slane %v6353_v40, 1  ;;  %v2181_v60 = vperm.slane %v6353_v40, 3  ;;  %v2182_v22 = vperm.slane %v6353_v40, 4 }
 0x209   :  { %3463 = vmatpush.bf16.msrb.mxu0 %v5277_v58  ;;  %3476 = vmatpush.bf16.msrb.mxu1 %v5341_v59  ;;  %v2180_v59 = vperm.slane %v6353_v40, 2 }
 0x20a   :  { %3489 = vmatpush.bf16.msrb.mxu2 %v5405_v25  ;;  %3502 = vmatpush.bf16.msrb.mxu3 %v5469_v63  ;;  %v5038_v25 = vld [vmem:[#allocation8 + $0x68] sm:$0xf0] }
 0x20b   :  { %v5041_v5 = vor.u32 %v5832_v49, %v5038_v25  ;;  %v2185_v49 = vperm.slane %v6353_v40, 7  ;;  %v5860_v25 = vld [vmem:[#allocation8 + $0x144] sm:$0xf] }
 0x20d   :  { %3464 = vmatpush.bf16.msrb.mxu0 %v5269_v0  ;;  %3477 = vmatpush.bf16.msrb.mxu1 %v5333_v2  ;;  %v5848_v2 = vld [vmem:[#allocation8 + $0xe4] sm:$0xf] }
 0x20e   :  { %3490 = vmatpush.bf16.msrb.mxu2 %v5397_v41  ;;  %3503 = vmatpush.bf16.msrb.mxu3 %v5461_v13  ;;  %v5105_v13 = vor.u32 %v5848_v2, %v5102_v43  ;;  %v5150_v2 = vld [vmem:[#allocation8 + $0x148] sm:$0xf0]  ;;  %v5876_v43 = vld [vmem:[#allocation8 + $0x1c4] sm:$0xf] }
 0x211   :  { %3465 = vmatpush.bf16.msrb.mxu0 %v5261_v7  ;;  %3478 = vmatpush.bf16.msrb.mxu1 %v5325_v8  ;;  %v5866_v7 = vld [vmem:[#allocation8 + $0x174] sm:$0xf]  ;;  %v5174_v8 = vld [vmem:[#allocation8 + $0x178] sm:$0xf0] }
 0x212   :  { %3491 = vmatpush.bf16.msrb.mxu2 %v5389_v37  ;;  %3504 = vmatpush.bf16.msrb.mxu3 %v5453_v53  ;;  %v5177_v20 = vor.u32 %v5866_v7, %v5174_v8  ;;  %v2183_v53 = vperm.slane %v6353_v40, 5 }
 0x215   :  { %3466 = vmatpush.bf16.msrb.mxu0 %v5253_v16  ;;  %3479 = vmatpush.bf16.msrb.mxu1 %v5317_v18  ;;  %v5030_v16 = vld [vmem:[#allocation8 + $0x58] sm:$0xf0] }
 0x216   :  { %3492 = vmatpush.bf16.msrb.mxu2 %v5381_v6  ;;  %3505 = vmatpush.bf16.msrb.mxu3 %v5445_v32  ;;  %v5033_v37 = vor.u32 %v5830_v47, %v5030_v16  ;;  %v5022_v6 = vld [vmem:[#allocation8 + $0x48] sm:$0xf0]  ;;  %v5862_v32 = vld [vmem:[#allocation8 + $0x154] sm:$0xf] }
 0x217   :  { %v5161_v54 = vor.u32 %v5862_v32, %v5158_v39  ;;  %v5858_v47 = vld [vmem:[#allocation8 + $0x134] sm:$0xf] }
 0x219   :  { %3467 = vmatpush.bf16.msrb.mxu0 %v5245_v26  ;;  %3480 = vmatpush.bf16.msrb.mxu1 %v5309_v33  ;;  %v5880_v33 = vld [vmem:[#allocation8 + $0x1e4] sm:$0xf] }
 0x21a   :  { %3493 = vmatpush.bf16.msrb.mxu2 %v5373_v50  ;;  %3506 = vmatpush.bf16.msrb.mxu3 %v5437_v38  ;;  %v5169_v50 = vor.u32 %v5864_v23, %v5166_v1  ;;  %v5233_v36 = vor.u32 %v5880_v33, %v5230_v11  ;;  %v5878_v38 = vld [vmem:[#allocation8 + $0x1d4] sm:$0xf]  ;;  %v4998_v23 = vld [vmem:[#allocation8 + $0x18] sm:$0xf0] }
 0x21b   :  { %v5838_v33 = vld [vmem:[#allocation8 + $0x94] sm:$0xf]  ;;  %v5062_v11 = vld [vmem:[#allocation8 + $0x98] sm:$0xf0] }
 0x21c   :  { %v5065_v39 = vor.u32 %v5838_v33, %v5062_v11  ;;  %v5944_v33 = vld [vmem:[#allocation8 + $0x3e4] sm:$0xf]  ;;  %v5486_v11 = vld [vmem:[#allocation8 + $0x3e8] sm:$0xf0] }
 0x258   :  { %v2523_v56 = vpop.f32.mrf.mxu0  ;;  %v2536_v46 = vpop.f32.mrf.mxu1 }
 0x259   :  { %v2524_v14 = vadd.f32 %v2523_v56, %v2178_v42  ;;  %v2537_v51 = vadd.f32 %v2536_v46, %v2179_v45  ;;  %v5222_v42 = vld [vmem:[#allocation8 + $0x1d8] sm:$0xf0]  ;;  %v5025_v46 = vor.u32 %v5828_v28, %v5022_v6 }
 0x25a   :  { %v5225_v55 = vor.u32 %v5878_v38, %v5222_v42  ;;  %v5820_v38 = vld [vmem:[#allocation8 + $0x4] sm:$0xf]  ;;  %v4990_v42 = vld [vmem:[#allocation8 + $0x8] sm:$0xf0] }
 0x25b   :  { %v2618_v57 = vmax.f32 %v2524_v14, 0.0  ;;  %v2619_v58 = vmax.f32 %v2537_v51, 0.0 }
 0x25d   :  { %v6359_v63 = vpack.c.bf16 %v2618_v57, %v2618_v57  ;;  %v6361_v0 = vpack.c.bf16 %v2619_v58, %v2619_v58  ;;  %v5014_v57 = vld [vmem:[#allocation8 + $0x38] sm:$0xf0]  ;;  %v5842_v58 = vld [vmem:[#allocation8 + $0xb4] sm:$0xf] }
 0x25e   :  { %v5017_v7 = vor.u32 %v5826_v52, %v5014_v57  ;;  %v5366_v57 = vld [vmem:[#allocation8 + $0x2f8] sm:$0xf0] }
 0x25f   :  { %v2549_v4 = vpop.f32.mrf.mxu2  ;;  %v2562_v3 = vpop.f32.mrf.mxu3  ;;  %3416 = vmatmul.bf16.vlgmr.msra.gmra.mxu0 %v6359_v63  ;;  %3429 = vmatmul.bf16.vlgmr.msra.gmra.mxu1 %v6361_v0 }
 0x260   :  { %v2550_v10 = vadd.f32 %v2549_v4, %v2180_v59  ;;  %v2563_v31 = vadd.f32 %v2562_v3, %v2181_v60  ;;  %3512 = vmatpush.bf16.msra.mxu0 %v5049_v61  ;;  %3525 = vmatpush.bf16.msra.mxu1 %v5113_v62  ;;  %v2525_v41 = vpop.f32.mrf.mxu0  ;;  %v2538_v12 = vpop.f32.mrf.mxu1  ;;  %v5078_v59 = vld [vmem:[#allocation8 + $0xb8] sm:$0xf0]  ;;  %v2184_v62 = vperm.slane %v6353_v40, 6  ;;  %v5214_v4 = vld [vmem:[#allocation8 + $0x1c8] sm:$0xf0] }
 0x261   :  { %v5081_v8 = vor.u32 %v5842_v58, %v5078_v59  ;;  %v5070_v41 = vld [vmem:[#allocation8 + $0xa8] sm:$0xf0]  ;;  %v5217_v15 = vor.u32 %v5876_v43, %v5214_v4  ;;  %v5854_v58 = vld [vmem:[#allocation8 + $0x114] sm:$0xf]  ;;  %v5126_v59 = vld [vmem:[#allocation8 + $0x118] sm:$0xf0] }
 0x262   :  { %v2620_v18 = vmax.f32 %v2550_v10, 0.0  ;;  %v2621_v19 = vmax.f32 %v2563_v31, 0.0  ;;  %v5006_v10 = vld [vmem:[#allocation8 + $0x28] sm:$0xf0]  ;;  %v5840_v31 = vld [vmem:[#allocation8 + $0xa4] sm:$0xf] }
 0x263   :  { %v5896_v43 = vld [vmem:[#allocation8 + $0x264] sm:$0xf]  ;;  %v5294_v4 = vld [vmem:[#allocation8 + $0x268] sm:$0xf0] }
 0x264   :  { %v6367_v24 = vpack.c.bf16 %v2620_v18, %v2620_v18  ;;  %v6369_v26 = vpack.c.bf16 %v2621_v19, %v2621_v19  ;;  %3513 = vmatpush.bf16.msra.mxu0 %v5041_v5  ;;  %3526 = vmatpush.bf16.msra.mxu1 %v5105_v13  ;;  %v5153_v13 = vor.u32 %v5860_v25, %v5150_v2  ;;  %v5142_v19 = vld [vmem:[#allocation8 + $0x138] sm:$0xf0] }
 0x265   :  { %v5145_v28 = vor.u32 %v5858_v47, %v5142_v19  ;;  %v5946_v47 = vld [vmem:[#allocation8 + $0x3f4] sm:$0xf] }
 0x266   :  { %3442 = vmatmul.bf16.vlgmr.msra.gmra.mxu2 %v6367_v24  ;;  %3455 = vmatmul.bf16.vlgmr.msra.gmra.mxu3 %v6369_v26 }
 0x267   :  { %3538 = vmatpush.bf16.msra.mxu2 %v5177_v20  ;;  %3551 = vmatpush.bf16.msra.mxu3 %v5241_v21  ;;  %v2551_v34 = vpop.f32.mrf.mxu2  ;;  %v2564_v35 = vpop.f32.mrf.mxu3  ;;  %v5874_v20 = vld [vmem:[#allocation8 + $0x1b4] sm:$0xf]  ;;  %v5206_v21 = vld [vmem:[#allocation8 + $0x1b8] sm:$0xf0] }
 0x268   :  { %3514 = vmatpush.bf16.msra.mxu0 %v5033_v37  ;;  %3527 = vmatpush.bf16.msra.mxu1 %v5097_v27  ;;  %v2575_v45 = vpop.f32.mrf.mxu0  ;;  %v2588_v56 = vpop.f32.mrf.mxu1  ;;  %v5009_v37 = vor.u32 %v5824_v9, %v5006_v10  ;;  %v5209_v6 = vor.u32 %v5874_v20, %v5206_v21  ;;  %v5134_v34 = vld [vmem:[#allocation8 + $0x128] sm:$0xf0]  ;;  %v5872_v35 = vld [vmem:[#allocation8 + $0x1a4] sm:$0xf]  ;;  %v5286_v21 = vld [vmem:[#allocation8 + $0x258] sm:$0xf0] }
 0x269   :  { %v2576_v14 = vadd.f32 %v2575_v45, %v2182_v22  ;;  %v2589_v51 = vadd.f32 %v2588_v56, %v2183_v53  ;;  %v5073_v22 = vor.u32 %v5840_v31, %v5070_v41  ;;  %v5822_v53 = vld [vmem:[#allocation8 + $0x14] sm:$0xf]  ;;  %v5836_v45 = vld [vmem:[#allocation8 + $0x84] sm:$0xf]  ;;  %v5054_v56 = vld [vmem:[#allocation8 + $0x88] sm:$0xf0]  ;;  %v5137_v52 = vor.u32 %v5856_v29, %v5134_v34 }
 0x26a   :  { %v5358_v10 = vld [vmem:[#allocation8 + $0x2e8] sm:$0xf0]  ;;  %v5852_v31 = vld [vmem:[#allocation8 + $0x104] sm:$0xf] }
 0x26b   :  { %v2622_v60 = vmax.f32 %v2576_v14, 0.0  ;;  %v2623_v61 = vmax.f32 %v2589_v51, 0.0  ;;  %3539 = vmatpush.bf16.msra.mxu2 %v5169_v50  ;;  %3552 = vmatpush.bf16.msra.mxu3 %v5233_v36  ;;  %v5198_v50 = vld [vmem:[#allocation8 + $0x1a8] sm:$0xf0]  ;;  %v5001_v36 = vor.u32 %v5822_v53, %v4998_v23  ;;  %v5892_v29 = vld [vmem:[#allocation8 + $0x244] sm:$0xf] }
 0x26c   :  { %3515 = vmatpush.bf16.msra.mxu0 %v5025_v46  ;;  %3528 = vmatpush.bf16.msra.mxu1 %v5089_v48  ;;  %v5898_v46 = vld [vmem:[#allocation8 + $0x274] sm:$0xf]  ;;  %v5302_v48 = vld [vmem:[#allocation8 + $0x278] sm:$0xf0]  ;;  %v5118_v41 = vld [vmem:[#allocation8 + $0x108] sm:$0xf0] }
 0x26d   :  { %v6375_v3 = vpack.c.bf16 %v2622_v60, %v2622_v60  ;;  %v6377_v5 = vpack.c.bf16 %v2623_v61, %v2623_v61  ;;  %v5870_v60 = vld [vmem:[#allocation8 + $0x194] sm:$0xf]  ;;  %v5190_v61 = vld [vmem:[#allocation8 + $0x198] sm:$0xf0]  ;;  %v5305_v25 = vor.u32 %v5898_v46, %v5302_v48  ;;  %v5121_v19 = vor.u32 %v5852_v31, %v5118_v41  ;;  %v5278_v34 = vld [vmem:[#allocation8 + $0x248] sm:$0xf0] }
 0x26e   :  { %v5193_v9 = vor.u32 %v5870_v60, %v5190_v61  ;;  %v5890_v46 = vld [vmem:[#allocation8 + $0x234] sm:$0xf]  ;;  %v5270_v48 = vld [vmem:[#allocation8 + $0x238] sm:$0xf0] }
 0x26f   :  { %3540 = vmatpush.bf16.msra.mxu2 %v5161_v54  ;;  %3553 = vmatpush.bf16.msra.mxu3 %v5225_v55  ;;  %v2601_v12 = vpop.f32.mrf.mxu2  ;;  %v2614_v40 = vpop.f32.mrf.mxu3  ;;  %v5201_v54 = vor.u32 %v5872_v35, %v5198_v50  ;;  %v5914_v55 = vld [vmem:[#allocation8 + $0x2f4] sm:$0xf]  ;;  %v5908_v35 = vld [vmem:[#allocation8 + $0x2c4] sm:$0xf]  ;;  %v5342_v50 = vld [vmem:[#allocation8 + $0x2c8] sm:$0xf0]  ;;  %v5273_v60 = vor.u32 %v5890_v46, %v5270_v48 }
 0x270   :  { %v2602_v16 = vadd.f32 %v2601_v12, %v2184_v62  ;;  %v2615_v44 = vadd.f32 %v2614_v40, %v2185_v49  ;;  %3468 = vmatmul.bf16.vlgmr.msrb.gmra.mxu0 %v6375_v3  ;;  %3481 = vmatmul.bf16.vlgmr.msrb.gmra.mxu1 %v6377_v5  ;;  %v2577_v17 = vpop.f32.mrf.mxu0  ;;  %v2590_v18 = vpop.f32.mrf.mxu1  ;;  %v4993_v62 = vor.u32 %v5820_v38, %v4990_v42  ;;  %v5868_v12 = vld [vmem:[#allocation8 + $0x184] sm:$0xf]  ;;  %v5182_v40 = vld [vmem:[#allocation8 + $0x188] sm:$0xf0]  ;;  %v5942_v38 = vld [vmem:[#allocation8 + $0x3d4] sm:$0xf] }
 0x271   :  { %3516 = vmatpush.bf16.msra.mxu0 %v5017_v7  ;;  %3529 = vmatpush.bf16.msra.mxu1 %v5081_v8  ;;  %v5057_v49 = vor.u32 %v5836_v45, %v5054_v56  ;;  %v5369_v2 = vor.u32 %v5914_v55, %v5366_v57  ;;  %v5912_v7 = vld [vmem:[#allocation8 + $0x2e4] sm:$0xf]  ;;  %v5129_v8 = vor.u32 %v5854_v58, %v5126_v59  ;;  %v5894_v18 = vld [vmem:[#allocation8 + $0x254] sm:$0xf]  ;;  %v5478_v42 = vld [vmem:[#allocation8 + $0x3d8] sm:$0xf0] }
 0x272   :  { %v2624_v1 = vmax.f32 %v2602_v16, 0.0  ;;  %v2625_v27 = vmax.f32 %v2615_v44, 0.0  ;;  %v5494_v16 = vld [vmem:[#allocation8 + $0x3f8] sm:$0xf0]  ;;  %v5297_v44 = vor.u32 %v5896_v43, %v5294_v4  ;;  %v5361_v17 = vor.u32 %v5912_v7, %v5358_v10  ;;  %v5924_v55 = vld [vmem:[#allocation8 + $0x344] sm:$0xf] }
 0x273   :  { %3541 = vmatpush.bf16.msra.mxu2 %v5153_v13  ;;  %3554 = vmatpush.bf16.msra.mxu3 %v5217_v15  ;;  %v5930_v13 = vld [vmem:[#allocation8 + $0x374] sm:$0xf]  ;;  %v5430_v15 = vld [vmem:[#allocation8 + $0x378] sm:$0xf0]  ;;  %v5185_v20 = vor.u32 %v5868_v12, %v5182_v40  ;;  %v5497_v23 = vor.u32 %v5946_v47, %v5494_v16  ;;  %v5281_v45 = vor.u32 %v5892_v29, %v5278_v34  ;;  %v5406_v57 = vld [vmem:[#allocation8 + $0x348] sm:$0xf0] }
 0x274   :  { %v6381_v30 = vpack.c.bf16 %v2624_v1, %v2624_v1  ;;  %v6383_v32 = vpack.c.bf16 %v2625_v27, %v2625_v27  ;;  %v5433_v53 = vor.u32 %v5930_v13, %v5430_v15  ;;  %v5928_v1 = vld [vmem:[#allocation8 + $0x364] sm:$0xf]  ;;  %v5422_v27 = vld [vmem:[#allocation8 + $0x368] sm:$0xf0]  ;;  %v5345_v56 = vor.u32 %v5908_v35, %v5342_v50  ;;  %v5922_v43 = vld [vmem:[#allocation8 + $0x334] sm:$0xf] }
 0x275   :  { %3517 = vmatpush.bf16.msra.mxu0 %v5009_v37  ;;  %3530 = vmatpush.bf16.msra.mxu1 %v5073_v22  ;;  %v5910_v37 = vld [vmem:[#allocation8 + $0x2d4] sm:$0xf]  ;;  %v5350_v22 = vld [vmem:[#allocation8 + $0x2d8] sm:$0xf0]  ;;  %v5940_v58 = vld [vmem:[#allocation8 + $0x3c4] sm:$0xf] }
 0x276   :  { %3494 = vmatmul.bf16.vlgmr.msrb.gmra.mxu2 %v6381_v30  ;;  %3507 = vmatmul.bf16.vlgmr.msrb.gmra.mxu3 %v6383_v32  ;;  %v5470_v59 = vld [vmem:[#allocation8 + $0x3c8] sm:$0xf0]  ;;  %v5398_v4 = vld [vmem:[#allocation8 + $0x338] sm:$0xf0]  ;;  %v5938_v7 = vld [vmem:[#allocation8 + $0x3b4] sm:$0xf] }
 0x277   :  { %3542 = vmatpush.bf16.msra.mxu2 %v5145_v28  ;;  %3555 = vmatpush.bf16.msra.mxu3 %v5209_v6  ;;  %v2603_v14 = vpop.f32.mrf.mxu2  ;;  %v2616_v51 = vpop.f32.mrf.mxu3  ;;  %v5289_v28 = vor.u32 %v5894_v18, %v5286_v21  ;;  %v5353_v6 = vor.u32 %v5910_v37, %v5350_v22  ;;  %v5886_v31 = vld [vmem:[#allocation8 + $0x214] sm:$0xf]  ;;  %v5254_v41 = vld [vmem:[#allocation8 + $0x218] sm:$0xf0]  ;;  %v5401_v13 = vor.u32 %v5922_v43, %v5398_v4  ;;  %v5920_v47 = vld [vmem:[#allocation8 + $0x324] sm:$0xf] }
 0x278   :  { %v5906_v14 = vld [vmem:[#allocation8 + $0x2b4] sm:$0xf]  ;;  %v5334_v51 = vld [vmem:[#allocation8 + $0x2b8] sm:$0xf0]  ;;  %v5390_v16 = vld [vmem:[#allocation8 + $0x328] sm:$0xf0]  ;;  %v5257_v18 = vor.u32 %v5886_v31, %v5254_v41 }
 0x279   :  { %3518 = vmatpush.bf16.msra.mxu0 %v5001_v36  ;;  %3531 = vmatpush.bf16.msra.mxu1 %v5065_v39  ;;  %v5926_v36 = vld [vmem:[#allocation8 + $0x354] sm:$0xf]  ;;  %v5414_v39 = vld [vmem:[#allocation8 + $0x358] sm:$0xf0]  ;;  %v5337_v61 = vor.u32 %v5906_v14, %v5334_v51  ;;  %v5246_v21 = vld [vmem:[#allocation8 + $0x208] sm:$0xf0] }
 0x27a   :  { %v5902_v12 = vld [vmem:[#allocation8 + $0x294] sm:$0xf]  ;;  %v5318_v40 = vld [vmem:[#allocation8 + $0x298] sm:$0xf0]  ;;  %v5900_v37 = vld [vmem:[#allocation8 + $0x284] sm:$0xf] }
 0x27b   :  { %3543 = vmatpush.bf16.msra.mxu2 %v5137_v52  ;;  %3556 = vmatpush.bf16.msra.mxu3 %v5201_v54  ;;  %v5417_v52 = vor.u32 %v5926_v36, %v5414_v39  ;;  %v5481_v54 = vor.u32 %v5942_v38, %v5478_v42  ;;  %v5310_v22 = vld [vmem:[#allocation8 + $0x288] sm:$0xf0]  ;;  %v5916_v35 = vld [vmem:[#allocation8 + $0x304] sm:$0xf] }
 0x27c   :  { %v5374_v50 = vld [vmem:[#allocation8 + $0x308] sm:$0xf0] }
 0x27d   :  { %3519 = vmatpush.bf16.msra.mxu0 %v4993_v62  ;;  %3532 = vmatpush.bf16.msra.mxu1 %v5057_v49  ;;  %v5888_v62 = vld [vmem:[#allocation8 + $0x224] sm:$0xf]  ;;  %v5262_v49 = vld [vmem:[#allocation8 + $0x228] sm:$0xf0]  ;;  %v5377_v36 = vor.u32 %v5916_v35, %v5374_v50 }
 0x27f   :  { %3544 = vmatpush.bf16.msra.mxu2 %v5129_v8  ;;  %3557 = vmatpush.bf16.msra.mxu3 %v5193_v9  ;;  %v5462_v8 = vld [vmem:[#allocation8 + $0x3b8] sm:$0xf0]  ;;  %v5265_v9 = vor.u32 %v5888_v62, %v5262_v49 }
 0x280   :  { %3520 = vmatmul.bf16.vlgmr.msra.gmra.mxu0 %v6359_v63  ;;  %3533 = vmatmul.bf16.vlgmr.msra.gmra.mxu1 %v6361_v0  ;;  %v5425_v63 = vor.u32 %v5928_v1, %v5422_v27  ;;  %v5489_v0 = vor.u32 %v5944_v33, %v5486_v11  ;;  %v5465_v15 = vor.u32 %v5938_v7, %v5462_v8  ;;  %v5918_v1 = vld [vmem:[#allocation8 + $0x314] sm:$0xf]  ;;  %v5382_v27 = vld [vmem:[#allocation8 + $0x318] sm:$0xf0] }
 0x281   :  { %3564 = vmatpush.bf16.msrb.mxu0 %v5305_v25  ;;  %3577 = vmatpush.bf16.msrb.mxu1 %v5369_v2  ;;  %v5326_v25 = vld [vmem:[#allocation8 + $0x2a8] sm:$0xf0]  ;;  %v5473_v2 = vor.u32 %v5940_v58, %v5470_v59  ;;  %v5934_v33 = vld [vmem:[#allocation8 + $0x394] sm:$0xf]  ;;  %v5446_v11 = vld [vmem:[#allocation8 + $0x398] sm:$0xf0]  ;;  %v5385_v29 = vor.u32 %v5918_v1, %v5382_v27 }
 0x282   :  { %v5449_v34 = vor.u32 %v5934_v33, %v5446_v11 }
 0x283   :  { %3545 = vmatpush.bf16.msra.mxu2 %v5121_v19  ;;  %3558 = vmatpush.bf16.msra.mxu3 %v5185_v20  ;;  %v5321_v19 = vor.u32 %v5902_v12, %v5318_v40  ;;  %v5884_v20 = vld [vmem:[#allocation8 + $0x204] sm:$0xf] }
 0x285   :  { %3565 = vmatpush.bf16.msrb.mxu0 %v5297_v44  ;;  %3578 = vmatpush.bf16.msrb.mxu1 %v5361_v17  ;;  %v5936_v44 = vld [vmem:[#allocation8 + $0x3a4] sm:$0xf]  ;;  %v5454_v17 = vld [vmem:[#allocation8 + $0x3a8] sm:$0xf0] }
 0x286   :  { %3546 = vmatmul.bf16.vlgmr.msra.gmra.mxu2 %v6367_v24  ;;  %3559 = vmatmul.bf16.vlgmr.msra.gmra.mxu3 %v6369_v26  ;;  %v5904_v24 = vld [vmem:[#allocation8 + $0x2a4] sm:$0xf]  ;;  %v5409_v26 = vor.u32 %v5924_v55, %v5406_v57 }
 0x287   :  { %3590 = vmatpush.bf16.msrb.mxu2 %v5433_v53  ;;  %3603 = vmatpush.bf16.msrb.mxu3 %v5497_v23  ;;  %v5329_v10 = vor.u32 %v5904_v24, %v5326_v25  ;;  %v5393_v53 = vor.u32 %v5920_v47, %v5390_v16  ;;  %v5457_v23 = vor.u32 %v5936_v44, %v5454_v17 }
 0x289   :  { %3566 = vmatpush.bf16.msrb.mxu0 %v5289_v28  ;;  %3579 = vmatpush.bf16.msrb.mxu1 %v5353_v6  ;;  %v5249_v28 = vor.u32 %v5884_v20, %v5246_v21  ;;  %v5313_v6 = vor.u32 %v5900_v37, %v5310_v22 }
 0x28b   :  { %3591 = vmatpush.bf16.msrb.mxu2 %v5425_v63  ;;  %3604 = vmatpush.bf16.msrb.mxu3 %v5489_v0  ;;  %v5932_v63 = vld [vmem:[#allocation8 + $0x384] sm:$0xf]  ;;  %v5438_v0 = vld [vmem:[#allocation8 + $0x388] sm:$0xf0] }
 0x28c   :  { %v5441_v39 = vor.u32 %v5932_v63, %v5438_v0 }
 0x28d   :  { %3567 = vmatpush.bf16.msrb.mxu0 %v5281_v45  ;;  %3580 = vmatpush.bf16.msrb.mxu1 %v5345_v56 }
 0x28f   :  { %3592 = vmatpush.bf16.msrb.mxu2 %v5417_v52  ;;  %3605 = vmatpush.bf16.msrb.mxu3 %v5481_v54  ;;  %v2762_v52 = vld [vmem:[%s6416_s9] sm:$0x3]  ;;  %s6157_s9 = smov [#allocation10]  }
 0x290   :  { %v2764_v54 = vperm.slane %v2762_v52, 0  ;;  %s3661_s12 = sshll.u32 %s6157_s9, 4  ;;  %s3662_s12 = int_to_ptr.vmem [resolvable:$true] %s3661_s12 }
 0x291   :  { %3568 = vmatpush.bf16.msrb.mxu0 %v5273_v60  ;;  %3581 = vmatpush.bf16.msrb.mxu1 %v5337_v61 }
 0x293   :  { %3593 = vmatpush.bf16.msrb.mxu2 %v5409_v26  ;;  %3606 = vmatpush.bf16.msrb.mxu3 %v5473_v2 }
 0x295   :  { %3569 = vmatpush.bf16.msrb.mxu0 %v5265_v9  ;;  %3582 = vmatpush.bf16.msrb.mxu1 %v5329_v10  ;;  %v2765_v10 = vperm.slane %v2762_v52, 1 }
 0x297   :  { %3594 = vmatpush.bf16.msrb.mxu2 %v5401_v13  ;;  %3607 = vmatpush.bf16.msrb.mxu3 %v5465_v15 }
 0x299   :  { %3570 = vmatpush.bf16.msrb.mxu0 %v5257_v18  ;;  %3583 = vmatpush.bf16.msrb.mxu1 %v5321_v19 }
 0x29b   :  { %3595 = vmatpush.bf16.msrb.mxu2 %v5393_v53  ;;  %3608 = vmatpush.bf16.msrb.mxu3 %v5457_v23 }
 0x29d   :  { %3571 = vmatpush.bf16.msrb.mxu0 %v5249_v28  ;;  %3584 = vmatpush.bf16.msrb.mxu1 %v5313_v6 }
 0x29f   :  { %3596 = vmatpush.bf16.msrb.mxu2 %v5385_v29  ;;  %3609 = vmatpush.bf16.msrb.mxu3 %v5449_v34 }
 0x2a0   :  { %3572 = vmatmul.bf16.vlgmr.msrb.gmra.mxu0 %v6375_v3  ;;  %3585 = vmatmul.bf16.vlgmr.msrb.gmra.mxu1 %v6377_v5 }
 0x2a3   :  { %3597 = vmatpush.bf16.msrb.mxu2 %v5377_v36  ;;  %3610 = vmatpush.bf16.msrb.mxu3 %v5441_v39 }
 0x2a6   :  { %3598 = vmatmul.bf16.vlgmr.msrb.gmra.mxu2 %v6381_v30  ;;  %3611 = vmatmul.bf16.vlgmr.msrb.gmra.mxu3 %v6383_v32 }
 0x2dc   :  { %v3417_v3 = vpop.f32.mrf.mxu0  ;;  %v3430_v5 = vpop.f32.mrf.mxu1 }
 0x2dd   :  { %v3418_v58 = vadd.f32 %v3417_v3, %v2764_v54 }
 0x2df   :  { %v3431_v61 = vadd.f32 %v3430_v5, %v3418_v58 }
 0x2e4   :  { %v3419_v30 = vpop.f32.mrf.mxu0  ;;  %v3432_v32 = vpop.f32.mrf.mxu1 }
 0x2e9   :  { %v3443_v38 = vpop.f32.mrf.mxu2  ;;  %v3456_v42 = vpop.f32.mrf.mxu3 }
 0x2ea   :  { %v3444_v24 = vadd.f32 %v3443_v38, %v3431_v61 }
 0x2ec   :  { %v3457_v2 = vadd.f32 %v3456_v42, %v3444_v24 }
 0x2ed   :  { %v3469_v45 = vpop.f32.mrf.mxu0  ;;  %v3482_v56 = vpop.f32.mrf.mxu1 }
 0x2ee   :  { %v3470_v7 = vadd.f32 %v3469_v45, %v3457_v2 }
 0x2f0   :  { %v3483_v8 = vadd.f32 %v3482_v56, %v3470_v7 }
 0x2f1   :  { %v3445_v46 = vpop.f32.mrf.mxu2  ;;  %v3458_v48 = vpop.f32.mrf.mxu3 }
 0x2f5   :  { %v3471_v14 = vpop.f32.mrf.mxu0  ;;  %v3484_v51 = vpop.f32.mrf.mxu1 }
 0x2f9   :  { %v3495_v55 = vpop.f32.mrf.mxu2  ;;  %v3508_v57 = vpop.f32.mrf.mxu3 }
 0x2fa   :  { %v3496_v9 = vadd.f32 %v3495_v55, %v3483_v8 }
 0x2fc   :  { %v3509_v12 = vadd.f32 %v3508_v57, %v3496_v9 }
 0x2fd   :  { %v3521_v59 = vpop.f32.mrf.mxu0  ;;  %v3534_v60 = vpop.f32.mrf.mxu1 }
 0x2fe   :  { %v3522_v40 = vadd.f32 %v3521_v59, %v2765_v10  ;;  %v5498_v13 = vmul.f32 -1.442695, %v3509_v12 }
 0x300   :  { %v3535_v15 = vadd.f32 %v3534_v60, %v3522_v40  ;;  %5961 = vpow2.f32 %v5498_v13 }
 0x301   :  { %v3497_v62 = vpop.f32.mrf.mxu2  ;;  %v3510_v49 = vpop.f32.mrf.mxu3 }
 0x305   :  { %v3523_v25 = vpop.f32.mrf.mxu0  ;;  %v3536_v26 = vpop.f32.mrf.mxu1 }
 0x306   :  { %v5962_v21 = vpop.eup %5961 }
 0x307   :  { %v3622_v22 = vadd.f32 1.0, %v5962_v21 }
 0x309   :  { %v3547_v43 = vpop.f32.mrf.mxu2  ;;  %v3560_v4 = vpop.f32.mrf.mxu3  ;;  %5963 = vrcp.f32 %v3622_v22  ;;  %vm3629_vm1 = vweird.f32 %v3622_v22  ;;  %v3635_v5 = vand.u32 2147483648, %v3622_v22  ;;  %v3633_v32 = vand.u32 2147483647, %v3622_v22 }
 0x30a   :  { %v3548_v44 = vadd.f32 %v3547_v43, %v3535_v15 }
 0x30b   :  { %v3636_v46 = vor.u32 1.1754944e-38, %v3635_v5  ;;  %vm3634_vm6 = vcmp.eq.f32.partialorder %v3633_v32, 8.507059e+37 }
 0x30c   :  { %v3561_v17 = vadd.f32 %v3560_v4, %v3548_v44 }
 0x30f   :  { %v5964_v6 = vpop.eup %5963 }
 0x310   :  { %v3625_v34 = vmul.f32 %v5964_v6, %v3622_v22  ;;  %vm3630_vm0 = vweird.f32 %v5964_v6 }
 0x311   :  { %v3549_v31 = vpop.f32.mrf.mxu2  ;;  %v3562_v41 = vpop.f32.mrf.mxu3  ;;  %vm3631_vm3 = vmor %vm3629_vm1, %vm3630_vm0 }
 0x312   :  { %v3626_v50 = vsub.f32 1.0, %v3625_v34 }
 0x314   :  { %v3627_v63 = vmul.f32 %v5964_v6, %v3626_v50 }
 0x316   :  { %v3628_v3 = vadd.f32 %v5964_v6, %v3627_v63 }
 0x318   :  { %v3632_v45 = vsel %vm3631_vm3, %v5964_v6, %v3628_v3 }
 0x319   :  { %v3637_v51 = vsel %vm3634_vm6, %v3636_v46, %v3632_v45 }
 0x31d   :  { %v3573_v47 = vpop.f32.mrf.mxu0  ;;  %v3586_v16 = vpop.f32.mrf.mxu1 }
 0x31e   :  { %v3574_v18 = vadd.f32 %v3573_v47, %v3561_v17 }
 0x320   :  { %v3587_v37 = vadd.f32 %v3586_v16, %v3574_v18 }
 0x325   :  { %v3575_v19 = vpop.f32.mrf.mxu0  ;;  %v3588_v20 = vpop.f32.mrf.mxu1 }
 0x329   :  { %v3599_v53 = vpop.f32.mrf.mxu2  ;;  %v3612_v23 = vpop.f32.mrf.mxu3 }
 0x32a   :  { %v3600_v1 = vadd.f32 %v3599_v53, %v3587_v37 }
 0x32c   :  { %v3613_v27 = vadd.f32 %v3612_v23, %v3600_v1 }
 0x32e   :  { %v5499_v33 = vmul.f32 -1.442695, %v3613_v27 }
 0x330   :  { %5965 = vpow2.f32 %v5499_v33 }
 0x331   :  { %v3601_v11 = vpop.f32.mrf.mxu2  ;;  %v3614_v28 = vpop.f32.mrf.mxu3 }
 0x336   :  { %v5966_v29 = vpop.eup %5965 }
 0x337   :  { %v3623_v35 = vadd.f32 1.0, %v5966_v29 }
 0x339   :  { %5967 = vrcp.f32 %v3623_v35  ;;  %v3650_v30 = vand.u32 2147483648, %v3623_v35  ;;  %v3648_v42 = vand.u32 2147483647, %v3623_v35  ;;  %vm3644_vm4 = vweird.f32 %v3623_v35 }
 0x33b   :  { %v3651_v48 = vor.u32 1.1754944e-38, %v3650_v30  ;;  %vm3649_vm7 = vcmp.eq.f32.partialorder %v3648_v42, 8.507059e+37 }
 0x33f   :  { %v5968_v0 = vpop.eup %5967 }
 0x340   :  { %v3640_v36 = vmul.f32 %v5968_v0, %v3623_v35  ;;  %vm3645_vm2 = vweird.f32 %v5968_v0 }
 0x341   :  { %vm3646_vm5 = vmor %vm3644_vm4, %vm3645_vm2 }
 0x342   :  { %v3641_v39 = vsub.f32 1.0, %v3640_v36 }
 0x344   :  { %v3642_v38 = vmul.f32 %v5968_v0, %v3641_v39 }
 0x346   :  { %v3643_v56 = vadd.f32 %v5968_v0, %v3642_v38 }
 0x348   :  { %v3647_v14 = vsel %vm3646_vm5, %v5968_v0, %v3643_v56 }
 0x349   :  { %v3652_v52 = vsel %vm3649_vm7, %v3651_v48, %v3647_v14 }
 0x34a   :  { %v3654_v54 = vpack.c.bf16 %v3652_v52, %v3637_v51 }
 0x34c   :  { %3655 = vst [vmem:[#allocation10] sm:$0xff] %v3654_v54 }
 0x34d   :  { %3666 = dma.vmem_to_hbm [thread:$0]  %s3662_s12, 128, %s3664_s2, [#allocation4]  }
 0x34e   :  { %6143 = dma.done.wait [#allocation4], 128  }
 0x34f   :  { %6144 = vsyncadd [#allocation4], 4294967168 }
 0x350   :  { %6145 = dma.done.wait [#allocation12], 256  }
 0x351   :  { %6146 = vsyncadd [#allocation12], 4294967040 }
 0x352   :  { %3701 = vsyncpa [#allocation3], 1 }
 0x353   :  { %3702 = vsyncpa [#allocation6], 1 }
 0x354   :  { %3703 = vsyncpa [#allocation9], 1 }
 0x355   :  { %3704 = vsyncpa [#allocation4], 1 }
 0x356   :  { %3705 = vsyncpa [#allocation12], 1 }

</bundles_post_ra>
